<compile_context>
chip_gen: v7x
topology: tpu7x:2x2x1
jax: 0.10.0
libtpu: 0.0.40
codegen_flags: <defaults>
</compile_context>

<pallas_src>
import functools

import jax
import jax.numpy as jnp
from jax.experimental import pallas as pl
from jax.experimental.pallas import tpu as pltpu


def _vae_kernel(
    # inputs
    x_ref, eps_ref,
    w1_ref, b1_ref, w2_ref, b2_ref, w3_ref, b3_ref,
    we_ref, be_ref,
    whmax_ref, whmean_ref, bh_ref,
    wd1_ref, bd1_ref, wd2_ref, bd2_ref, wd3_ref, bd3_ref,
    # outputs
    recon_ref,
    *, latent, cat_pad,
):
    bf16 = jnp.bfloat16
    f32 = jnp.float32
    Bt, N, C = x_ref.shape
    M = Bt * N

    def mm(a, w_ref):
        # bf16 operands, f32 accumulation on the MXU.
        return jnp.dot(a.astype(bf16), w_ref[...], preferred_element_type=f32)

    # --- DeltaNetBase scalar-stream stand-in: pointwise conv blocks ---
    x = x_ref[...].reshape(M, C)                         # (M, C_in)
    f1 = jnp.maximum(mm(x, w1_ref) + b1_ref[...], 0.0)   # (M, c1)
    f2 = jnp.maximum(mm(f1, w2_ref) + b2_ref[...], 0.0)  # (M, c2)
    f3 = jnp.maximum(mm(f2, w3_ref) + b3_ref[...], 0.0)  # (M, c3)

    # --- x = cat(conv_out, dim=1); x = lin_embedding(x)  (single fused matmul)
    csum = f1.shape[1] + f2.shape[1] + f3.shape[1]
    pieces = [f1, f2, f3]
    if cat_pad > csum:
        pieces.append(jnp.zeros((M, cat_pad - csum), f32))
    fcat = jnp.concatenate(pieces, axis=-1)               # (M, cat_pad)
    emb = jnp.maximum(mm(fcat, we_ref) + be_ref[...], 0.0)  # (M, 1024)

    # --- global_max_pool / global_mean_pool per batch element ---
    emb3 = emb.reshape(Bt, N, emb.shape[-1])
    g_max = jnp.max(emb3, axis=1)                          # (Bt, 1024)
    g_mean = jnp.mean(emb3, axis=1)                        # (Bt, 1024)

    # --- fused fc_mu|fc_logvar on cat([x_max, x_mean]) (split-weight, padded)
    head = mm(g_max, whmax_ref) + mm(g_mean, whmean_ref) + bh_ref[...]  # (Bt, 128)
    mu = head[:, :latent]
    logvar = head[:, latent:2 * latent]

    # --- reparameterize: z = mu + eps * exp(0.5 * logvar) ---
    eps = eps_ref[...].reshape(Bt, latent)
    z = mu + eps * jnp.exp(0.5 * logvar)

    # --- decoder: relu(dec1) -> relu(dec2) -> dec3 ---
    h = jnp.maximum(mm(z, wd1_ref) + bd1_ref[...], 0.0)
    h = jnp.maximum(mm(h, wd2_ref) + bd2_ref[...], 0.0)
    out = mm(h, wd3_ref) + bd3_ref[...]                    # (Bt, 3*point_size)
    recon_ref[...] = out.reshape(Bt, 1, out.shape[-1])


def _full_spec(arr):
    """Whole-array block, same block for every grid step (weights)."""
    nd = arr.ndim
    return pl.BlockSpec(arr.shape, lambda b, _nd=nd: (0,) * _nd)


_WEIGHT_NAMES = [
    "w1", "b1", "w2", "b2", "w3", "b3",
    "we_cat", "be",
    "wh_max", "wh_mean", "bh",
    "wd1", "bd1", "wd2", "bd2", "wd3", "bd3",
]


def deltanet_vae_forward(x, eps, p, *, point_size, block_b=2):
    """x: (B, N, C_in) f32, eps: (B, 1, latent) f32. Returns (B, point_size, 3)."""
    B, N, C_in = x.shape
    latent = eps.shape[-1]
    out_dim = p["bd3"].shape[-1]          # 3 * point_size
    cat_pad = p["we_cat"].shape[0]        # padded concat width (256)
    emb_dim = p["we_cat"].shape[1]        # 1024
    assert B % block_b == 0, "batch must be divisible by block_b"

    weights = [p[name] for name in _WEIGHT_NAMES]

    in_specs = (
        [pl.BlockSpec((block_b, N, C_in), lambda b: (b, 0, 0)),
         pl.BlockSpec((block_b, 1, latent), lambda b: (b, 0, 0))]
        + [_full_spec(w) for w in weights]
    )
    out_specs = pl.BlockSpec((block_b, 1, out_dim), lambda b: (b, 0, 0))
    out_shape = jax.ShapeDtypeStruct((B, 1, out_dim), jnp.float32)

    c1 = p["b1"].shape[-1]
    c2 = p["b2"].shape[-1]
    c3 = p["b3"].shape[-1]
    head_w = p["bh"].shape[-1]
    flops = (
        2 * B * N * (C_in * c1 + c1 * c2 + c2 * c3 + cat_pad * emb_dim)
        + 2 * B * (2 * emb_dim * head_w + latent * 256 + 256 * 256 + 256 * out_dim)
    )
    bytes_accessed = (
        x.size * x.dtype.itemsize
        + eps.size * eps.dtype.itemsize
        + sum(int(w.size) * w.dtype.itemsize for w in weights)
        + B * out_dim * 4
    )

    kernel = functools.partial(_vae_kernel, latent=latent, cat_pad=cat_pad)

    recon = pl.pallas_call(
        kernel,
        out_shape=out_shape,
        grid_spec=pltpu.PrefetchScalarGridSpec(
            num_scalar_prefetch=0,
            grid=(B // block_b,),
            in_specs=in_specs,
            out_specs=out_specs,
        ),
        compiler_params=pltpu.CompilerParams(
            dimension_semantics=("parallel",)),
        cost_estimate=pl.CostEstimate(
            flops=int(flops),
            transcendentals=int(B * latent),
            bytes_accessed=int(bytes_accessed)),
    )(x, eps, *weights)

    # forward() of the PyTorch module returns only the reconstruction.
    return recon.reshape(B, point_size, 3)


def make_params(key, in_channels, conv_channels, latent_size, point_size):
    """Deterministic synthetic parameters matching the module's layer shapes.

    Weights for matmuls are pre-fused/padded and stored in bf16; biases in f32.
    """
    c1, c2, c3 = conv_channels
    csum = c1 + c2 + c3                  # 224
    cat_pad = 256                        # padded K for the fused embedding matmul
    emb_dim = 1024
    head_pad = 128                       # padded fused mu|logvar head width
    out_dim = 3 * point_size
    bf16 = jnp.bfloat16

    def lin(k, fan_in, fan_out):
        kw, kb = jax.random.split(k)
        scale = 1.0 / jnp.sqrt(jnp.float32(fan_in))
        w = jax.random.normal(kw, (fan_in, fan_out), jnp.float32) * scale
        b = jax.random.normal(kb, (1, fan_out), jnp.float32) * 0.01
        return w, b

    keys = jax.random.split(key, 10)
    p = {}
    # DeltaNetBase stand-in conv blocks (scalar stream widths = conv_channels)
    w1, p["b1"] = lin(keys[0], in_channels, c1)
    w2, p["b2"] = lin(keys[1], c1, c2)
    w3, p["b3"] = lin(keys[2], c2, c3)
    # lin_embedding = MLP([sum(conv_channels), 1024]); fused K padded 224 -> 256
    we, p["be"] = lin(keys[3], csum, emb_dim)
    we_cat = jnp.zeros((cat_pad, emb_dim), jnp.float32).at[:csum].set(we)
    # fc_mu / fc_logvar: Linear(2*1024, latent) -> split into [max | mean]
    # halves and fused into one 128-wide (zero-padded) head per branch.
    wmu, bmu = lin(keys[4], 2 * emb_dim, latent_size)
    wlv, blv = lin(keys[5], 2 * emb_dim, latent_size)
    wh_max = jnp.zeros((emb_dim, head_pad), jnp.float32)
    wh_max = wh_max.at[:, :latent_size].set(wmu[:emb_dim])
    wh_max = wh_max.at[:, latent_size:2 * latent_size].set(wlv[:emb_dim])
    wh_mean = jnp.zeros((emb_dim, head_pad), jnp.float32)
    wh_mean = wh_mean.at[:, :latent_size].set(wmu[emb_dim:])
    wh_mean = wh_mean.at[:, latent_size:2 * latent_size].set(wlv[emb_dim:])
    bh = jnp.zeros((1, head_pad), jnp.float32)
    bh = bh.at[:, :latent_size].set(bmu[0])
    bh = bh.at[:, latent_size:2 * latent_size].set(blv[0])
    p["bh"] = bh
    # decoder
    wd1, p["bd1"] = lin(keys[6], latent_size, 256)
    wd2, p["bd2"] = lin(keys[7], 256, 256)
    wd3, p["bd3"] = lin(keys[8], 256, out_dim)

    # bf16 matmul weights (biases stay f32; added after f32 accumulation).
    p["w1"], p["w2"], p["w3"] = w1.astype(bf16), w2.astype(bf16), w3.astype(bf16)
    p["we_cat"] = we_cat.astype(bf16)
    p["wh_max"], p["wh_mean"] = wh_max.astype(bf16), wh_mean.astype(bf16)
    p["wd1"], p["wd2"], p["wd3"] = wd1.astype(bf16), wd2.astype(bf16), wd3.astype(bf16)
    return p


def reference_forward(x, eps, p, *, point_size):
    """Pure-JAX reference of the same computation (same bf16 matmuls)."""
    relu = jax.nn.relu
    bf16 = jnp.bfloat16
    f32 = jnp.float32
    B, N, C = x.shape
    latent = eps.shape[-1]
    cat_pad = p["we_cat"].shape[0]

    def mm(a, w):
        return jnp.dot(a.astype(bf16), w, preferred_element_type=f32)

    xf = x.reshape(B * N, C)
    f1 = relu(mm(xf, p["w1"]) + p["b1"])
    f2 = relu(mm(f1, p["w2"]) + p["b2"])
    f3 = relu(mm(f2, p["w3"]) + p["b3"])
    csum = f1.shape[1] + f2.shape[1] + f3.shape[1]
    fcat = jnp.concatenate(
        [f1, f2, f3, jnp.zeros((B * N, cat_pad - csum), f32)], axis=-1)
    emb = relu(mm(fcat, p["we_cat"]) + p["be"])
    emb3 = emb.reshape(B, N, -1)
    g_max = jnp.max(emb3, axis=1)
    g_mean = jnp.mean(emb3, axis=1)
    head = mm(g_max, p["wh_max"]) + mm(g_mean, p["wh_mean"]) + p["bh"]
    mu = head[:, :latent]
    logvar = head[:, latent:2 * latent]
    z = mu + eps.reshape(B, latent) * jnp.exp(0.5 * logvar)
    h = relu(mm(z, p["wd1"]) + p["bd1"])
    h = relu(mm(h, p["wd2"]) + p["bd2"])
    out = mm(h, p["wd3"]) + p["bd3"]
    return out.reshape(B, point_size, 3)


if __name__ == "__main__":
    # Small shapes consistent with the module's forward.
    B = 4                 # batch size (grid of 2 steps x 2 elements/step)
    N = 128               # points per cloud
    in_channels = 3
    conv_channels = (32, 64, 128)
    latent_size = 32
    point_size = 128      # out_dim = 384 (lane-dense multiple of 128)
    block_b = 2           # batch elements per grid step -> M = 256

    key = jax.random.PRNGKey(0)
    k_x, k_eps, k_p = jax.random.split(key, 3)

    x = jax.random.normal(k_x, (B, N, in_channels), jnp.float32)
    eps = jax.random.normal(k_eps, (B, 1, latent_size), jnp.float32)
    params = make_params(k_p, in_channels, conv_channels, latent_size, point_size)

    fwd = jax.jit(functools.partial(
        deltanet_vae_forward, point_size=point_size, block_b=block_b))
    recon = jax.block_until_ready(fwd(x, eps, params))

    ref = reference_forward(x, eps, params, point_size=point_size)
    assert recon.shape == (B, point_size, 3), recon.shape
    max_err = float(jnp.max(jnp.abs(recon - ref)))
    assert jnp.allclose(recon, ref, rtol=1e-2, atol=1e-2), max_err

    print("KERNEL_OK")
</pallas_src>

<mosaic_0001>
module attributes {stable_mosaic.version = 11 : i64} {
  func.func @_vae_kernel(%arg0: i32, %arg1: memref<2x128x3xf32, #tpu.memory_space<vmem>>, %arg2: memref<2x1x32xf32, #tpu.memory_space<vmem>>, %arg3: memref<3x32xbf16, #tpu.memory_space<vmem>>, %arg4: memref<1x32xf32, #tpu.memory_space<vmem>>, %arg5: memref<32x64xbf16, #tpu.memory_space<vmem>>, %arg6: memref<1x64xf32, #tpu.memory_space<vmem>>, %arg7: memref<64x128xbf16, #tpu.memory_space<vmem>>, %arg8: memref<1x128xf32, #tpu.memory_space<vmem>>, %arg9: memref<256x1024xbf16, #tpu.memory_space<vmem>>, %arg10: memref<1x1024xf32, #tpu.memory_space<vmem>>, %arg11: memref<1024x128xbf16, #tpu.memory_space<vmem>>, %arg12: memref<1024x128xbf16, #tpu.memory_space<vmem>>, %arg13: memref<1x128xf32, #tpu.memory_space<vmem>>, %arg14: memref<32x256xbf16, #tpu.memory_space<vmem>>, %arg15: memref<1x256xf32, #tpu.memory_space<vmem>>, %arg16: memref<256x256xbf16, #tpu.memory_space<vmem>>, %arg17: memref<1x256xf32, #tpu.memory_space<vmem>>, %arg18: memref<256x384xbf16, #tpu.memory_space<vmem>>, %arg19: memref<1x384xf32, #tpu.memory_space<vmem>>, %arg20: memref<2x1x384xf32, #tpu.memory_space<vmem>>) attributes {dimension_semantics = [#tpu.dimension_semantics<parallel>], iteration_bounds = array<i64: 2>, scalar_prefetch = 0 : i64, scratch_operands = 0 : i64, tpu.core_type = #tpu.core_type<tc>, window_params = [{transform_indices = @transform_0, window_bounds = array<i64: 2, 128, 3>}, {transform_indices = @transform_1, window_bounds = array<i64: 2, 1, 32>}, {pipeline_mode = #tpu.pipeline_mode<synchronous>, transform_indices = @transform_2, window_bounds = array<i64: 3, 32>}, {pipeline_mode = #tpu.pipeline_mode<synchronous>, transform_indices = @transform_3, window_bounds = array<i64: 1, 32>}, {pipeline_mode = #tpu.pipeline_mode<synchronous>, transform_indices = @transform_4, window_bounds = array<i64: 32, 64>}, {pipeline_mode = #tpu.pipeline_mode<synchronous>, transform_indices = @transform_5, window_bounds = array<i64: 1, 64>}, {pipeline_mode = #tpu.pipeline_mode<synchronous>, transform_indices = @transform_6, window_bounds = array<i64: 64, 128>}, {pipeline_mode = #tpu.pipeline_mode<synchronous>, transform_indices = @transform_7, window_bounds = array<i64: 1, 128>}, {pipeline_mode = #tpu.pipeline_mode<synchronous>, transform_indices = @transform_8, window_bounds = array<i64: 256, 1024>}, {pipeline_mode = #tpu.pipeline_mode<synchronous>, transform_indices = @transform_9, window_bounds = array<i64: 1, 1024>}, {pipeline_mode = #tpu.pipeline_mode<synchronous>, transform_indices = @transform_10, window_bounds = array<i64: 1024, 128>}, {pipeline_mode = #tpu.pipeline_mode<synchronous>, transform_indices = @transform_11, window_bounds = array<i64: 1024, 128>}, {pipeline_mode = #tpu.pipeline_mode<synchronous>, transform_indices = @transform_12, window_bounds = array<i64: 1, 128>}, {pipeline_mode = #tpu.pipeline_mode<synchronous>, transform_indices = @transform_13, window_bounds = array<i64: 32, 256>}, {pipeline_mode = #tpu.pipeline_mode<synchronous>, transform_indices = @transform_14, window_bounds = array<i64: 1, 256>}, {pipeline_mode = #tpu.pipeline_mode<synchronous>, transform_indices = @transform_15, window_bounds = array<i64: 256, 256>}, {pipeline_mode = #tpu.pipeline_mode<synchronous>, transform_indices = @transform_16, window_bounds = array<i64: 1, 256>}, {pipeline_mode = #tpu.pipeline_mode<synchronous>, transform_indices = @transform_17, window_bounds = array<i64: 256, 384>}, {pipeline_mode = #tpu.pipeline_mode<synchronous>, transform_indices = @transform_18, window_bounds = array<i64: 1, 384>}, {transform_indices = @transform_19, window_bounds = array<i64: 2, 1, 384>}]} {
    %c0 = arith.constant 0 : index
    %c0_0 = arith.constant 0 : index
    %c0_1 = arith.constant 0 : index
    %0 = vector.load %arg1[%c0, %c0_0, %c0_1] : memref<2x128x3xf32, #tpu.memory_space<vmem>>, vector<2x128x3xf32>
    %1 = vector.shape_cast %0 : vector<2x128x3xf32> to vector<256x3xf32>
    %2 = arith.truncf %1 : vector<256x3xf32> to vector<256x3xbf16>
    %c0_2 = arith.constant 0 : index
    %c0_3 = arith.constant 0 : index
    %3 = vector.load %arg3[%c0_2, %c0_3] : memref<3x32xbf16, #tpu.memory_space<vmem>>, vector<3x32xbf16>
    %cst = arith.constant dense<0.000000e+00> : vector<256x32xf32>
    %4 = tpu.matmul %2, %3, %cst {dimension_numbers = #tpu.dot_dimension_numbers<[1], [0], [0], [1], [0, 0, 1, 1], [], []>} : vector<256x3xbf16>, vector<3x32xbf16>, vector<256x32xf32> -> vector<256x32xf32>
    %c0_4 = arith.constant 0 : index
    %c0_5 = arith.constant 0 : index
    %5 = vector.load %arg4[%c0_4, %c0_5] : memref<1x32xf32, #tpu.memory_space<vmem>>, vector<1x32xf32>
    %6 = vector.broadcast %5 : vector<1x32xf32> to vector<256x32xf32>
    %7 = arith.addf %4, %6 : vector<256x32xf32>
    %cst_6 = arith.constant 0.000000e+00 : f32
    %8 = vector.broadcast %cst_6 : f32 to vector<256x32xf32>
    %9 = arith.maximumf %7, %8 : vector<256x32xf32>
    %10 = arith.truncf %9 : vector<256x32xf32> to vector<256x32xbf16>
    %c0_7 = arith.constant 0 : index
    %c0_8 = arith.constant 0 : index
    %11 = vector.load %arg5[%c0_7, %c0_8] : memref<32x64xbf16, #tpu.memory_space<vmem>>, vector<32x64xbf16>
    %cst_9 = arith.constant dense<0.000000e+00> : vector<256x64xf32>
    %12 = tpu.matmul %10, %11, %cst_9 {dimension_numbers = #tpu.dot_dimension_numbers<[1], [0], [0], [1], [0, 0, 1, 1], [], []>} : vector<256x32xbf16>, vector<32x64xbf16>, vector<256x64xf32> -> vector<256x64xf32>
    %c0_10 = arith.constant 0 : index
    %c0_11 = arith.constant 0 : index
    %13 = vector.load %arg6[%c0_10, %c0_11] : memref<1x64xf32, #tpu.memory_space<vmem>>, vector<1x64xf32>
    %14 = vector.broadcast %13 : vector<1x64xf32> to vector<256x64xf32>
    %15 = arith.addf %12, %14 : vector<256x64xf32>
    %cst_12 = arith.constant 0.000000e+00 : f32
    %16 = vector.broadcast %cst_12 : f32 to vector<256x64xf32>
    %17 = arith.maximumf %15, %16 : vector<256x64xf32>
    %18 = arith.truncf %17 : vector<256x64xf32> to vector<256x64xbf16>
    %c0_13 = arith.constant 0 : index
    %c0_14 = arith.constant 0 : index
    %19 = vector.load %arg7[%c0_13, %c0_14] : memref<64x128xbf16, #tpu.memory_space<vmem>>, vector<64x128xbf16>
    %cst_15 = arith.constant dense<0.000000e+00> : vector<256x128xf32>
    %20 = tpu.matmul %18, %19, %cst_15 {dimension_numbers = #tpu.dot_dimension_numbers<[1], [0], [0], [1], [0, 0, 1, 1], [], []>} : vector<256x64xbf16>, vector<64x128xbf16>, vector<256x128xf32> -> vector<256x128xf32>
    %c0_16 = arith.constant 0 : index
    %c0_17 = arith.constant 0 : index
    %21 = vector.load %arg8[%c0_16, %c0_17] : memref<1x128xf32, #tpu.memory_space<vmem>>, vector<1x128xf32>
    %22 = vector.broadcast %21 : vector<1x128xf32> to vector<256x128xf32>
    %23 = arith.addf %20, %22 : vector<256x128xf32>
    %cst_18 = arith.constant 0.000000e+00 : f32
    %24 = vector.broadcast %cst_18 : f32 to vector<256x128xf32>
    %25 = arith.maximumf %23, %24 : vector<256x128xf32>
    %cst_19 = arith.constant 0.000000e+00 : f32
    %26 = vector.broadcast %cst_19 : f32 to vector<256x32xf32>
    %27 = tpu.concatenate %9, %17, %25, %26 in 1 : vector<256x32xf32>, vector<256x64xf32>, vector<256x128xf32>, vector<256x32xf32> -> vector<256x256xf32>
    %28 = arith.truncf %27 : vector<256x256xf32> to vector<256x256xbf16>
    %c0_20 = arith.constant 0 : index
    %c0_21 = arith.constant 0 : index
    %29 = vector.load %arg9[%c0_20, %c0_21] : memref<256x1024xbf16, #tpu.memory_space<vmem>>, vector<256x1024xbf16>
    %cst_22 = arith.constant dense<0.000000e+00> : vector<256x1024xf32>
    %30 = tpu.matmul %28, %29, %cst_22 {dimension_numbers = #tpu.dot_dimension_numbers<[1], [0], [0], [1], [0, 0, 1, 1], [], []>} : vector<256x256xbf16>, vector<256x1024xbf16>, vector<256x1024xf32> -> vector<256x1024xf32>
    %c0_23 = arith.constant 0 : index
    %c0_24 = arith.constant 0 : index
    %31 = vector.load %arg10[%c0_23, %c0_24] : memref<1x1024xf32, #tpu.memory_space<vmem>>, vector<1x1024xf32>
    %32 = vector.broadcast %31 : vector<1x1024xf32> to vector<256x1024xf32>
    %33 = arith.addf %30, %32 : vector<256x1024xf32>
    %cst_25 = arith.constant 0.000000e+00 : f32
    %34 = vector.broadcast %cst_25 : f32 to vector<256x1024xf32>
    %35 = arith.maximumf %33, %34 : vector<256x1024xf32>
    %36 = vector.shape_cast %35 : vector<256x1024xf32> to vector<2x128x1024xf32>
    %cst_26 = arith.constant dense<0xFF800000> : vector<2x1024xf32>
    %37 = vector.multi_reduction <maximumf>, %36, %cst_26 [1] : vector<2x128x1024xf32> to vector<2x1024xf32>
    %cst_27 = arith.constant dense<0.000000e+00> : vector<2x1024xf32>
    %38 = vector.multi_reduction <add>, %36, %cst_27 [1] : vector<2x128x1024xf32> to vector<2x1024xf32>
    %cst_28 = arith.constant 1.280000e+02 : f32
    %39 = vector.broadcast %cst_28 : f32 to vector<2x1024xf32>
    %40 = arith.divf %38, %39 : vector<2x1024xf32>
    %41 = arith.truncf %37 : vector<2x1024xf32> to vector<2x1024xbf16>
    %c0_29 = arith.constant 0 : index
    %c0_30 = arith.constant 0 : index
    %42 = vector.load %arg11[%c0_29, %c0_30] : memref<1024x128xbf16, #tpu.memory_space<vmem>>, vector<1024x128xbf16>
    %cst_31 = arith.constant dense<0.000000e+00> : vector<2x128xf32>
    %43 = tpu.matmul %41, %42, %cst_31 {dimension_numbers = #tpu.dot_dimension_numbers<[1], [0], [0], [1], [0, 0, 1, 1], [], []>} : vector<2x1024xbf16>, vector<1024x128xbf16>, vector<2x128xf32> -> vector<2x128xf32>
    %44 = arith.truncf %40 : vector<2x1024xf32> to vector<2x1024xbf16>
    %c0_32 = arith.constant 0 : index
    %c0_33 = arith.constant 0 : index
    %45 = vector.load %arg12[%c0_32, %c0_33] : memref<1024x128xbf16, #tpu.memory_space<vmem>>, vector<1024x128xbf16>
    %cst_34 = arith.constant dense<0.000000e+00> : vector<2x128xf32>
    %46 = tpu.matmul %44, %45, %cst_34 {dimension_numbers = #tpu.dot_dimension_numbers<[1], [0], [0], [1], [0, 0, 1, 1], [], []>} : vector<2x1024xbf16>, vector<1024x128xbf16>, vector<2x128xf32> -> vector<2x128xf32>
    %47 = arith.addf %43, %46 : vector<2x128xf32>
    %c0_35 = arith.constant 0 : index
    %c0_36 = arith.constant 0 : index
    %48 = vector.load %arg13[%c0_35, %c0_36] : memref<1x128xf32, #tpu.memory_space<vmem>>, vector<1x128xf32>
    %49 = vector.broadcast %48 : vector<1x128xf32> to vector<2x128xf32>
    %50 = arith.addf %47, %49 : vector<2x128xf32>
    %51 = vector.extract_strided_slice %50 {offsets = [0, 0], sizes = [2, 32], strides = [1, 1]} : vector<2x128xf32> to vector<2x32xf32>
    %52 = vector.extract_strided_slice %50 {offsets = [0, 32], sizes = [2, 32], strides = [1, 1]} : vector<2x128xf32> to vector<2x32xf32>
    %c0_37 = arith.constant 0 : index
    %c0_38 = arith.constant 0 : index
    %c0_39 = arith.constant 0 : index
    %53 = vector.load %arg2[%c0_37, %c0_38, %c0_39] : memref<2x1x32xf32, #tpu.memory_space<vmem>>, vector<2x1x32xf32>
    %54 = vector.shape_cast %53 : vector<2x1x32xf32> to vector<2x32xf32>
    %cst_40 = arith.constant 5.000000e-01 : f32
    %55 = vector.broadcast %cst_40 : f32 to vector<2x32xf32>
    %56 = arith.mulf %55, %52 : vector<2x32xf32>
    %57 = math.exp %56 : vector<2x32xf32>
    %58 = arith.mulf %54, %57 : vector<2x32xf32>
    %59 = arith.addf %51, %58 : vector<2x32xf32>
    %60 = arith.truncf %59 : vector<2x32xf32> to vector<2x32xbf16>
    %c0_41 = arith.constant 0 : index
    %c0_42 = arith.constant 0 : index
    %61 = vector.load %arg14[%c0_41, %c0_42] : memref<32x256xbf16, #tpu.memory_space<vmem>>, vector<32x256xbf16>
    %cst_43 = arith.constant dense<0.000000e+00> : vector<2x256xf32>
    %62 = tpu.matmul %60, %61, %cst_43 {dimension_numbers = #tpu.dot_dimension_numbers<[1], [0], [0], [1], [0, 0, 1, 1], [], []>} : vector<2x32xbf16>, vector<32x256xbf16>, vector<2x256xf32> -> vector<2x256xf32>
    %c0_44 = arith.constant 0 : index
    %c0_45 = arith.constant 0 : index
    %63 = vector.load %arg15[%c0_44, %c0_45] : memref<1x256xf32, #tpu.memory_space<vmem>>, vector<1x256xf32>
    %64 = vector.broadcast %63 : vector<1x256xf32> to vector<2x256xf32>
    %65 = arith.addf %62, %64 : vector<2x256xf32>
    %cst_46 = arith.constant 0.000000e+00 : f32
    %66 = vector.broadcast %cst_46 : f32 to vector<2x256xf32>
    %67 = arith.maximumf %65, %66 : vector<2x256xf32>
    %68 = arith.truncf %67 : vector<2x256xf32> to vector<2x256xbf16>
    %c0_47 = arith.constant 0 : index
    %c0_48 = arith.constant 0 : index
    %69 = vector.load %arg16[%c0_47, %c0_48] : memref<256x256xbf16, #tpu.memory_space<vmem>>, vector<256x256xbf16>
    %cst_49 = arith.constant dense<0.000000e+00> : vector<2x256xf32>
    %70 = tpu.matmul %68, %69, %cst_49 {dimension_numbers = #tpu.dot_dimension_numbers<[1], [0], [0], [1], [0, 0, 1, 1], [], []>} : vector<2x256xbf16>, vector<256x256xbf16>, vector<2x256xf32> -> vector<2x256xf32>
    %c0_50 = arith.constant 0 : index
    %c0_51 = arith.constant 0 : index
    %71 = vector.load %arg17[%c0_50, %c0_51] : memref<1x256xf32, #tpu.memory_space<vmem>>, vector<1x256xf32>
    %72 = vector.broadcast %71 : vector<1x256xf32> to vector<2x256xf32>
    %73 = arith.addf %70, %72 : vector<2x256xf32>
    %cst_52 = arith.constant 0.000000e+00 : f32
    %74 = vector.broadcast %cst_52 : f32 to vector<2x256xf32>
    %75 = arith.maximumf %73, %74 : vector<2x256xf32>
    %76 = arith.truncf %75 : vector<2x256xf32> to vector<2x256xbf16>
    %c0_53 = arith.constant 0 : index
    %c0_54 = arith.constant 0 : index
    %77 = vector.load %arg18[%c0_53, %c0_54] : memref<256x384xbf16, #tpu.memory_space<vmem>>, vector<256x384xbf16>
    %cst_55 = arith.constant dense<0.000000e+00> : vector<2x384xf32>
    %78 = tpu.matmul %76, %77, %cst_55 {dimension_numbers = #tpu.dot_dimension_numbers<[1], [0], [0], [1], [0, 0, 1, 1], [], []>} : vector<2x256xbf16>, vector<256x384xbf16>, vector<2x384xf32> -> vector<2x384xf32>
    %c0_56 = arith.constant 0 : index
    %c0_57 = arith.constant 0 : index
    %79 = vector.load %arg19[%c0_56, %c0_57] : memref<1x384xf32, #tpu.memory_space<vmem>>, vector<1x384xf32>
    %80 = vector.broadcast %79 : vector<1x384xf32> to vector<2x384xf32>
    %81 = arith.addf %78, %80 : vector<2x384xf32>
    %82 = vector.shape_cast %81 : vector<2x384xf32> to vector<2x1x384xf32>
    %c0_58 = arith.constant 0 : index
    %c0_59 = arith.constant 0 : index
    %c0_60 = arith.constant 0 : index
    %83 = vector.load %arg20[%c0_58, %c0_59, %c0_60] : memref<2x1x384xf32, #tpu.memory_space<vmem>>, vector<2x1x384xf32>
    tpu.vector_store %arg20[%c0_58, %c0_59, %c0_60], %82 {strides = array<i32>} : memref<2x1x384xf32, #tpu.memory_space<vmem>>, vector<2x1x384xf32>,
    return
  }
  func.func @transform_0(%arg0: i32) -> (i32, i32, i32) {
    %c0_i32 = arith.constant 0 : i32
    %c0_i32_0 = arith.constant 0 : i32
    %c0_i32_1 = arith.constant 0 : i32
    return %arg0, %c0_i32, %c0_i32_0 : i32, i32, i32
  }
  func.func @transform_1(%arg0: i32) -> (i32, i32, i32) {
    %c0_i32 = arith.constant 0 : i32
    %c0_i32_0 = arith.constant 0 : i32
    %c0_i32_1 = arith.constant 0 : i32
    return %arg0, %c0_i32, %c0_i32_0 : i32, i32, i32
  }
  func.func @transform_2(%arg0: i32) -> (i32, i32) {
    %c0_i32 = arith.constant 0 : i32
    %c0_i32_0 = arith.constant 0 : i32
    %c0_i32_1 = arith.constant 0 : i32
    return %c0_i32, %c0_i32_0 : i32, i32
  }
  func.func @transform_3(%arg0: i32) -> (i32, i32) {
    %c0_i32 = arith.constant 0 : i32
    %c0_i32_0 = arith.constant 0 : i32
    %c0_i32_1 = arith.constant 0 : i32
    return %c0_i32, %c0_i32_0 : i32, i32
  }
  func.func @transform_4(%arg0: i32) -> (i32, i32) {
    %c0_i32 = arith.constant 0 : i32
    %c0_i32_0 = arith.constant 0 : i32
    %c0_i32_1 = arith.constant 0 : i32
    return %c0_i32, %c0_i32_0 : i32, i32
  }
  func.func @transform_5(%arg0: i32) -> (i32, i32) {
    %c0_i32 = arith.constant 0 : i32
    %c0_i32_0 = arith.constant 0 : i32
    %c0_i32_1 = arith.constant 0 : i32
    return %c0_i32, %c0_i32_0 : i32, i32
  }
  func.func @transform_6(%arg0: i32) -> (i32, i32) {
    %c0_i32 = arith.constant 0 : i32
    %c0_i32_0 = arith.constant 0 : i32
    %c0_i32_1 = arith.constant 0 : i32
    return %c0_i32, %c0_i32_0 : i32, i32
  }
  func.func @transform_7(%arg0: i32) -> (i32, i32) {
    %c0_i32 = arith.constant 0 : i32
    %c0_i32_0 = arith.constant 0 : i32
    %c0_i32_1 = arith.constant 0 : i32
    return %c0_i32, %c0_i32_0 : i32, i32
  }
  func.func @transform_8(%arg0: i32) -> (i32, i32) {
    %c0_i32 = arith.constant 0 : i32
    %c0_i32_0 = arith.constant 0 : i32
    %c0_i32_1 = arith.constant 0 : i32
    return %c0_i32, %c0_i32_0 : i32, i32
  }
  func.func @transform_9(%arg0: i32) -> (i32, i32) {
    %c0_i32 = arith.constant 0 : i32
    %c0_i32_0 = arith.constant 0 : i32
    %c0_i32_1 = arith.constant 0 : i32
    return %c0_i32, %c0_i32_0 : i32, i32
  }
  func.func @transform_10(%arg0: i32) -> (i32, i32) {
    %c0_i32 = arith.constant 0 : i32
    %c0_i32_0 = arith.constant 0 : i32
    %c0_i32_1 = arith.constant 0 : i32
    return %c0_i32, %c0_i32_0 : i32, i32
  }
  func.func @transform_11(%arg0: i32) -> (i32, i32) {
    %c0_i32 = arith.constant 0 : i32
    %c0_i32_0 = arith.constant 0 : i32
    %c0_i32_1 = arith.constant 0 : i32
    return %c0_i32, %c0_i32_0 : i32, i32
  }
  func.func @transform_12(%arg0: i32) -> (i32, i32) {
    %c0_i32 = arith.constant 0 : i32
    %c0_i32_0 = arith.constant 0 : i32
    %c0_i32_1 = arith.constant 0 : i32
    return %c0_i32, %c0_i32_0 : i32, i32
  }
  func.func @transform_13(%arg0: i32) -> (i32, i32) {
    %c0_i32 = arith.constant 0 : i32
    %c0_i32_0 = arith.constant 0 : i32
    %c0_i32_1 = arith.constant 0 : i32
    return %c0_i32, %c0_i32_0 : i32, i32
  }
  func.func @transform_14(%arg0: i32) -> (i32, i32) {
    %c0_i32 = arith.constant 0 : i32
    %c0_i32_0 = arith.constant 0 : i32
    %c0_i32_1 = arith.constant 0 : i32
    return %c0_i32, %c0_i32_0 : i32, i32
  }
  func.func @transform_15(%arg0: i32) -> (i32, i32) {
    %c0_i32 = arith.constant 0 : i32
    %c0_i32_0 = arith.constant 0 : i32
    %c0_i32_1 = arith.constant 0 : i32
    return %c0_i32, %c0_i32_0 : i32, i32
  }
  func.func @transform_16(%arg0: i32) -> (i32, i32) {
    %c0_i32 = arith.constant 0 : i32
    %c0_i32_0 = arith.constant 0 : i32
    %c0_i32_1 = arith.constant 0 : i32
    return %c0_i32, %c0_i32_0 : i32, i32
  }
  func.func @transform_17(%arg0: i32) -> (i32, i32) {
    %c0_i32 = arith.constant 0 : i32
    %c0_i32_0 = arith.constant 0 : i32
    %c0_i32_1 = arith.constant 0 : i32
    return %c0_i32, %c0_i32_0 : i32, i32
  }
  func.func @transform_18(%arg0: i32) -> (i32, i32) {
    %c0_i32 = arith.constant 0 : i32
    %c0_i32_0 = arith.constant 0 : i32
    %c0_i32_1 = arith.constant 0 : i32
    return %c0_i32, %c0_i32_0 : i32, i32
  }
  func.func @transform_19(%arg0: i32) -> (i32, i32, i32) {
    %c0_i32 = arith.constant 0 : i32
    %c0_i32_0 = arith.constant 0 : i32
    %c0_i32_1 = arith.constant 0 : i32
    return %arg0, %c0_i32, %c0_i32_0 : i32, i32, i32
  }
}

</mosaic_0001>

<bundles_post_ra>
// kernel: deltanet_vae_forward.1
= control target key start
LH: loop header
LB: loop body
LE: loop exit
PB: predicated region body
PF: predicated region fallthrough
CT: control target
= control target key end

     0   :  { %s11782_s0 = inlined_call_operand.vmem [shape: f32[4,128,3], index: 0, kind: input, shape index: {}]   ;;  %s11783_s1 = inlined_call_operand.vmem [shape: f32[4,1,32], index: 1, kind: input, shape index: {}]   ;;  %s11784_s2 = inlined_call_operand.hbm [shape: bf16[3,32], index: 2, kind: input, shape index: {}]   ;;  %s11785_s3 = inlined_call_operand.hbm [shape: f32[1,32], index: 3, kind: input, shape index: {}]   ;;  %s11786_s4 = inlined_call_operand.hbm [shape: bf16[32,64], index: 4, kind: input, shape index: {}]   ;;  %s11787_s5 = inlined_call_operand.hbm [shape: f32[1,64], index: 5, kind: input, shape index: {}]   ;;  %s11788_s6 = inlined_call_operand.vmem [shape: bf16[64,128], index: 6, kind: input, shape index: {}]   ;;  %s11789_s7 = inlined_call_operand.hbm [shape: f32[1,128], index: 7, kind: input, shape index: {}]   ;;  %s11790_s8 = inlined_call_operand.hbm [shape: bf16[256,1024], index: 8, kind: input, shape index: {}]   ;;  %s11791_s9 = inlined_call_operand.vmem [shape: f32[1,1024], index: 9, kind: input, shape index: {}]   ;;  %s11792_s10 = inlined_call_operand.vmem [shape: bf16[1024,128], index: 10, kind: input, shape index: {}]   ;;  %s11793_s11 = inlined_call_operand.hbm [shape: bf16[1024,128], index: 11, kind: input, shape index: {}]   ;;  %s11794_s12 = inlined_call_operand.hbm [shape: f32[1,128], index: 12, kind: input, shape index: {}]   ;;  %s11795_s13 = inlined_call_operand.vmem [shape: bf16[32,256], index: 13, kind: input, shape index: {}]   ;;  %s11796_s14 = inlined_call_operand.hbm [shape: f32[1,256], index: 14, kind: input, shape index: {}]   ;;  %s11797_s15 = inlined_call_operand.hbm [shape: bf16[256,256], index: 15, kind: input, shape index: {}]   ;;  %s11798_s16 = inlined_call_operand.hbm [shape: f32[1,256], index: 16, kind: input, shape index: {}]   ;;  %s11799_s17 = inlined_call_operand.hbm [shape: bf16[256,384], index: 17, kind: input, shape index: {}]   ;;  %s11800_s18 = inlined_call_operand.hbm [shape: f32[1,384], index: 18, kind: input, shape index: {}]   ;;  %s11801_s19 = inlined_call_operand.vmem [shape: f32[4,1,384], index: 19, kind: output, shape index: {}]  }
   0x1   :  { %11865 = sst [smem:[#allocation68_spill]] %s11782_s0 }
   0x2   :  { %11866 = sst [smem:[#allocation69_spill]] %s11783_s1 }
   0x3   :  { %11867 = sst [smem:[#allocation70_spill]] %s11784_s2 }
   0x4   :  { %11868 = sst [smem:[#allocation71_spill]] %s11785_s3 }
   0x5   :  { %11869 = sst [smem:[#allocation72_spill]] %s11787_s5 }
   0x6   :  { %11870 = sst [smem:[#allocation73_spill]] %s11790_s8 }
   0x7   :  { %11871 = sst [smem:[#allocation74_spill]] %s11791_s9 }
   0x8   :  { %11872 = sst [smem:[#allocation75_spill]] %s11792_s10 }
   0x9   :  { %11873 = sst [smem:[#allocation76_spill]] %s11794_s12 }
   0xa   :  { %11874 = sst [smem:[#allocation77_spill]] %s11795_s13 }
   0xb   :  { %11875 = sst [smem:[#allocation78_spill]] %s11797_s15 }
   0xc   :  { %11876 = sst [smem:[#allocation79_spill]] %s11801_s19 }
   0xd   :  { %24 = vsyncpa [#allocation3], 0 }
   0xe   :  { %25 = vsyncpa [#allocation5], 0 }
   0xf   :  { %26 = vsyncpa [#allocation8], 0 }
  0x10   :  { %27 = vsyncpa [#allocation11], 0 }
  0x11   :  { %28 = vsyncpa [#allocation14], 0 }
  0x12   :  { %29 = vsyncpa [#allocation17], 0 }
  0x13   :  { %30 = vsyncpa [#allocation20], 0  ;;  %s9221_s0 = smov 0  }
  0x14 LB: > { %s9095_s30 = smov [#allocation4]   ;;  %s11804_s21 = sadd.s32 4294967295, %s9093_s0   ;;  %s9093_s0 = sphi %s9221_s0, %s36_s0  }
  0x15   : > { %s500_s20 = sshll.u32 %s9095_s30, 4  ;;  %p7136_p0 = scmp.ge.s32.totalorder %s9093_s0, 1  ;;  %s9235_s20 = int_to_ptr.vmem [resolvable:$true] %s500_s20 }
  0x16   : > { %p476_p1 = scmp.lt.s32.totalorder %s9093_s0, 3  ;;  %p9231_p2 = scmp.eq.s32.totalorder %s11804_s21, 0 }
  0x17   : > { %s9096_s2 = smov [#allocation7]   ;;  %s9097_s24 = smov [#allocation10]  }
  0x18   : > { %s11877_s1 = scalar_select %p9231_p2, 1, 0 }
  0x19   : > { %p9237_p3 = pnand %p7136_p0, %p476_p1  ;;  %s524_s23 = sshll.u32 %s9096_s2, 4  ;;  %s9243_s23 = int_to_ptr.vmem [resolvable:$true] %s524_s23 }
  0x1a   : > { %s548_s25 = sshll.u32 %s9097_s24, 4  ;;  %s9098_s26 = smov [#allocation13]   ;;  %s9251_s25 = int_to_ptr.vmem [resolvable:$true] %s548_s25 }
  0x1b   : > { %s11878_s22 = scalar_select %p9237_p3, 1, 0 }
  0x1c   : > { %p8180_p4 = pneg %p9237_p3  ;;  %s9253_s27 = sshll.u32 %s9098_s26, 4  ;;  %s582_s27 = int_to_ptr.vmem [resolvable:$true] %s9253_s27 }
  0x1d   : > { %s11880_s30 = sld [smem:[#allocation71_spill]] }
  0x1e   : > { %p9247_p5 = pnand %p9231_p2, %p8180_p4 }
  0x20   : > { %p9263_p7 = pneg %p9247_p5 }
  0x23   : > { %s8695_s2 = scalar_lea.hbm %s11880_s30, 16 }
  0x24   : > { %p8696_p6 = scmp.ne.s32.totalorder %s11880_s30, %s8695_s2  ;;  %p8702_p10 = scmp.lt.u32.totalorder %s8695_s2, %s11880_s30 }
  0x26   : > { %p8698_p8 = pnand %p9263_p7, %p8696_p6 }
  0x28   : > { %p8699_p9 = pneg %p8698_p8 }
  0x2a   : > { %p8704_p11 = pnand %p8702_p10, %p8699_p9 }
  0x2c   : > { %8707 = shalt.err (!%p8704_p11)
}
  0x2d   : > { %s8708_s19 = scalar_lea.vmem %s9235_s20, 16  ;;  %s8715_s21 = scalar_lea.vmem %s9235_s20, 32 }
  0x2e   : > { %p8709_p12 = scmp.ne.s32.totalorder %s9235_s20, %s8708_s19  ;;  %p8716_p1 = scmp.lt.s32.totalorder %s9235_s20, %s9235_s20 }
  0x2f   : > { %p8717_p4 = scmp.lt.s32.totalorder %s8715_s21, %s8708_s19 }
  0x30   : > { %p8711_p13 = pnand %p8709_p12, %p9263_p7 }
  0x31   : > { %p8718_p6 = por %p8717_p4, %p8716_p1 }
  0x32   : > { %p8712_p0 = pneg %p8711_p13 }
  0x34   : > { %p8719_p8 = pnand %p8718_p6, %p8712_p0 }
  0x36   : > { %8722 = shalt.err (!%p8719_p8)
}
  0x37   : > { %8186 = dma.hbm_to_vmem [thread:$0]  (!%p9247_p5), %s11880_s30, 16, %s9235_s20, [#allocation5]  }
  0x38   : > { %s11882_s5 = sld [smem:[#allocation72_spill]] }
  0x3e   : > { %s8723_s26 = scalar_lea.hbm %s11882_s5, 16 }
  0x3f   : > { %p8724_p9 = scmp.ne.s32.totalorder %s11882_s5, %s8723_s26  ;;  %p8730_p12 = scmp.lt.u32.totalorder %s8723_s26, %s11882_s5 }
  0x41   : > { %p8726_p10 = pnand %p8724_p9, %p9263_p7 }
  0x43   : > { %p8727_p11 = pneg %p8726_p10 }
  0x45   : > { %p8732_p13 = pnand %p8730_p12, %p8727_p11 }
  0x47   : > { %8735 = shalt.err (!%p8732_p13)
}
  0x48   : > { %s8736_s20 = scalar_lea.vmem %s9243_s23, 16  ;;  %s8743_s9 = scalar_lea.vmem %s9243_s23, 32 }
  0x49   : > { %p8737_p0 = scmp.ne.s32.totalorder %s9243_s23, %s8736_s20  ;;  %p8744_p6 = scmp.lt.s32.totalorder %s9243_s23, %s9243_s23 }
  0x4a   : > { %p8745_p8 = scmp.lt.s32.totalorder %s8743_s9, %s8736_s20 }
  0x4b   : > { %p8739_p1 = pnand %p8737_p0, %p9263_p7 }
  0x4c   : > { %p8746_p9 = por %p8745_p8, %p8744_p6 }
  0x4d   : > { %p8740_p4 = pneg %p8739_p1 }
  0x4f   : > { %p8747_p10 = pnand %p8746_p9, %p8740_p4 }
  0x51   : > { %8750 = shalt.err (!%p8747_p10)
}
  0x52   : > { %8192 = dma.hbm_to_vmem [thread:$0]  (!%p9247_p5), %s11882_s5, 16, %s9243_s23, [#allocation8]  }
  0x53   : > { %s11883_s8 = sld [smem:[#allocation73_spill]] }
  0x59   : > { %s8751_s2 = scalar_lea.hbm %s11883_s8, 16384 }
  0x5a   : > { %p8752_p11 = scmp.ne.s32.totalorder %s11883_s8, %s8751_s2  ;;  %p8758_p0 = scmp.lt.u32.totalorder %s8751_s2, %s11883_s8 }
  0x5c   : > { %p8754_p12 = pnand %p8752_p11, %p9263_p7 }
  0x5e   : > { %p8755_p13 = pneg %p8754_p12 }
  0x60   : > { %p8760_p1 = pnand %p8758_p0, %p8755_p13 }
  0x62   : > { %8763 = shalt.err (!%p8760_p1)
}
  0x63   : > { %s8764_s23 = scalar_lea.vmem %s9251_s25, 16384  ;;  %p8772_p9 = scmp.lt.s32.totalorder %s9251_s25, %s9251_s25 }
  0x64   : > { %p8765_p4 = scmp.ne.s32.totalorder %s9251_s25, %s8764_s23  ;;  %p8773_p10 = scmp.lt.s32.totalorder %s8764_s23, %s8764_s23 }
  0x66   : > { %p8767_p6 = pnand %p8765_p4, %p9263_p7  ;;  %p8774_p11 = por %p8773_p10, %p8772_p9 }
  0x68   : > { %p8768_p8 = pneg %p8767_p6 }
  0x6a   : > { %p8775_p12 = pnand %p8774_p11, %p8768_p8 }
  0x6c   : > { %8778 = shalt.err (!%p8775_p12)
}
  0x6d   : > { %s9099_s9 = smov 512   ;;  %s9100_s10 = smov 32  }
  0x6e   : > { %8198 = dma.hbm_to_vmem [thread:$0]  (!%p9247_p5), %s11883_s8, 16384, %s9251_s25, [#allocation11], %s9099_s9, %s9099_s9, %s9100_s10  }
  0x6f   : > { %s11884_s12 = sld [smem:[#allocation76_spill]] }
  0x75   : > { %s8779_s26 = scalar_lea.hbm %s11884_s12, 16 }
  0x76   : > { %p8780_p13 = scmp.ne.s32.totalorder %s11884_s12, %s8779_s26  ;;  %p8786_p4 = scmp.lt.u32.totalorder %s8779_s26, %s11884_s12 }
  0x78   : > { %p8782_p0 = pnand %p8780_p13, %p9263_p7 }
  0x7a   : > { %p8783_p1 = pneg %p8782_p0 }
  0x7c   : > { %p8788_p6 = pnand %p8786_p4, %p8783_p1 }
  0x7e   : > { %8791 = shalt.err (!%p8788_p6)
}
  0x7f   : > { %s8792_s13 = scalar_lea.vmem %s582_s27, 16  ;;  %s8799_s25 = scalar_lea.vmem %s582_s27, 32 }
  0x80   : > { %p8793_p8 = scmp.ne.s32.totalorder %s582_s27, %s8792_s13  ;;  %p8800_p11 = scmp.lt.s32.totalorder %s582_s27, %s582_s27 }
  0x81   : > { %p8801_p12 = scmp.lt.s32.totalorder %s8799_s25, %s8792_s13 }
  0x82   : > { %p8795_p9 = pnand %p8793_p8, %p9263_p7 }
  0x83   : > { %p8802_p2 = por %p8801_p12, %p8800_p11 }
  0x84   : > { %p8796_p10 = pneg %p8795_p9 }
  0x86   : > { %p8803_p3 = pnand %p8802_p2, %p8796_p10 }
  0x88   : > { %8806 = shalt.err (!%p8803_p3)
}
  0x89   : > { %8204 = dma.hbm_to_vmem [thread:$0]  (!%p9247_p5), %s11884_s12, 16, %s582_s27, [#allocation14]  }
  0x8a   : > { %s9101_s28 = smov [#allocation16]   ;;  %s11885_s15 = sld [smem:[#allocation78_spill]] }
  0x8b   : > { %s605_s29 = sshll.u32 %s9101_s28, 4  ;;  %s606_s29 = int_to_ptr.vmem [resolvable:$true] %s605_s29 }
  0x90   : > { %s8807_s19 = scalar_lea.hbm %s11885_s15, 4096 }
  0x91   : > { %p8808_p13 = scmp.ne.s32.totalorder %s11885_s15, %s8807_s19  ;;  %p8814_p0 = scmp.lt.u32.totalorder %s8807_s19, %s11885_s15 }
  0x93   : > { %p8810_p2 = pnand %p8808_p13, %p9263_p7 }
  0x95   : > { %p8811_p3 = pneg %p8810_p2 }
  0x97   : > { %p8816_p1 = pnand %p8814_p0, %p8811_p3 }
  0x99   : > { %8819 = shalt.err (!%p8816_p1)
}
  0x9a   : > { %s8820_s27 = scalar_lea.vmem %s606_s29, 4096  ;;  %p8828_p9 = scmp.lt.s32.totalorder %s606_s29, %s606_s29 }
  0x9b   : > { %p8821_p4 = scmp.ne.s32.totalorder %s606_s29, %s8820_s27  ;;  %p8829_p10 = scmp.lt.s32.totalorder %s8820_s27, %s8820_s27 }
  0x9d   : > { %p8823_p6 = pnand %p8821_p4, %p9263_p7  ;;  %p8830_p11 = por %p8829_p10, %p8828_p9 }
  0x9f   : > { %p8824_p8 = pneg %p8823_p6 }
  0xa1   : > { %p8831_p12 = pnand %p8830_p11, %p8824_p8 }
  0xa3   : > { %8834 = shalt.err (!%p8831_p12)
}
  0xa4   : > { %s9102_s25 = smov 128   ;;  %s9103_s9 = smov 8  }
  0xa5   : > { %8210 = dma.hbm_to_vmem [thread:$0]  (!%p9247_p5), %s11885_s15, 4096, %s606_s29, [#allocation17], %s9102_s25, %s9102_s25, %s9103_s9  }
  0xa6   : > { %s9104_s2 = smov [#allocation19]   ;;  %s8835_s20 = scalar_lea.hbm %s11799_s17, 6144 }
  0xa7   : > { %s629_s26 = sshll.u32 %s9104_s2, 4  ;;  %p8836_p13 = scmp.ne.s32.totalorder %s11799_s17, %s8835_s20  ;;  %s630_s26 = int_to_ptr.vmem [resolvable:$true] %s629_s26 }
  0xa8   : > { %p8842_p0 = scmp.lt.u32.totalorder %s8835_s20, %s11799_s17 }
  0xa9   : > { %p8838_p2 = pnand %p8836_p13, %p9263_p7 }
  0xab   : > { %p8839_p3 = pneg %p8838_p2 }
  0xad   : > { %p8844_p1 = pnand %p8842_p0, %p8839_p3 }
  0xaf   : > { %8847 = shalt.err (!%p8844_p1)
}
  0xb0   : > { %s8848_s29 = scalar_lea.vmem %s630_s26, 6144  ;;  %p8856_p9 = scmp.lt.s32.totalorder %s630_s26, %s630_s26 }
  0xb1   : > { %p8849_p4 = scmp.ne.s32.totalorder %s630_s26, %s8848_s29  ;;  %p8857_p10 = scmp.lt.s32.totalorder %s8848_s29, %s8848_s29 }
  0xb3   : > { %p8851_p6 = pnand %p8849_p4, %p9263_p7  ;;  %p8858_p11 = por %p8857_p10, %p8856_p9 }
  0xb5   : > { %p8852_p8 = pneg %p8851_p6 }
  0xb7   : > { %p8859_p12 = pnand %p8858_p11, %p8852_p8 }
  0xb9   : > { %8862 = shalt.err (!%p8859_p12)
}
  0xba   : > { %s9105_s25 = smov 192   ;;  %s9106_s9 = smov 12  }
  0xbb   : > { %8216 = dma.hbm_to_vmem [thread:$0]  (!%p9247_p5), %s11799_s17, 6144, %s630_s26, [#allocation20], %s9105_s25, %s9105_s25, %s9106_s9  }
  0xbc   : > { %s9107_s28 = smov [#allocation2]   ;;  %s9108_s19 = smov [#allocation6]  }
  0xbd   : > { %s489_s2 = sshll.u32 %s9107_s28, 4  ;;  %s510_s21 = sshll.u32 %s9108_s19, 4  ;;  %s490_s2 = int_to_ptr.vmem [resolvable:$true] %s489_s2  ;;  %s511_s21 = int_to_ptr.vmem [resolvable:$true] %s510_s21 }
  0xbe   : > { %s11886_s13 = sld [smem:[#allocation70_spill]] }
  0xc4   : > { %s8863_s27 = scalar_lea.hbm %s11886_s13, 32 }
  0xc5   : > { %p8864_p13 = scmp.ne.s32.totalorder %s11886_s13, %s8863_s27  ;;  %p8870_p0 = scmp.lt.u32.totalorder %s8863_s27, %s11886_s13 }
  0xc7   : > { %p8866_p2 = pnand %p8864_p13, %p9263_p7 }
  0xc9   : > { %p8867_p3 = pneg %p8866_p2 }
  0xcb   : > { %p8872_p1 = pnand %p8870_p0, %p8867_p3 }
  0xcd   : > { %8875 = shalt.err (!%p8872_p1)
}
  0xce   : > { %s8876_s26 = scalar_lea.vmem %s490_s2, 32  ;;  %p8884_p9 = scmp.lt.s32.totalorder %s490_s2, %s490_s2 }
  0xcf   : > { %p8877_p4 = scmp.ne.s32.totalorder %s490_s2, %s8876_s26  ;;  %p8885_p10 = scmp.lt.s32.totalorder %s8876_s26, %s8876_s26 }
  0xd1   : > { %p8879_p6 = pnand %p8877_p4, %p9263_p7  ;;  %p8886_p11 = por %p8885_p10, %p8884_p9 }
  0xd3   : > { %p8880_p8 = pneg %p8879_p6 }
  0xd5   : > { %p8887_p12 = pnand %p8886_p11, %p8880_p8 }
  0xd7   : > { %8890 = shalt.err (!%p8887_p12)
}
  0xd8   : > { %8183 = dma.hbm_to_vmem [thread:$0]  (!%p9247_p5), %s11886_s13, 32, %s490_s2, [#allocation3]  }
  0xd9   : > { %s8891_s9 = scalar_lea.hbm %s11786_s4, 256 }
  0xda   : > { %p8892_p13 = scmp.ne.s32.totalorder %s11786_s4, %s8891_s9  ;;  %p8898_p0 = scmp.lt.u32.totalorder %s8891_s9, %s11786_s4 }
  0xdc   : > { %p8894_p2 = pnand %p8892_p13, %p9263_p7 }
  0xde   : > { %p8895_p3 = pneg %p8894_p2 }
  0xe0   : > { %p8900_p1 = pnand %p8898_p0, %p8895_p3 }
  0xe2   : > { %8903 = shalt.err (!%p8900_p1)
}
  0xe3   : > { %s8904_s20 = scalar_lea.vmem %s511_s21, 256  ;;  %p8912_p9 = scmp.lt.s32.totalorder %s511_s21, %s511_s21 }
  0xe4   : > { %p8905_p4 = scmp.ne.s32.totalorder %s511_s21, %s8904_s20  ;;  %p8913_p10 = scmp.lt.s32.totalorder %s8904_s20, %s8904_s20 }
  0xe6   : > { %p8907_p6 = pnand %p8905_p4, %p9263_p7  ;;  %p8914_p11 = por %p8913_p10, %p8912_p9 }
  0xe8   : > { %p8908_p8 = pneg %p8907_p6 }
  0xea   : > { %p8915_p12 = pnand %p8914_p11, %p8908_p8 }
  0xec   : > { %8918 = shalt.err (!%p8915_p12)
}
  0xed   : > { %s9109_s2 = smov 64   ;;  %s9110_s23 = smov 4  }
  0xee   : > { %8189 = dma.hbm_to_vmem [thread:$0]  (!%p9247_p5), %s11786_s4, 256, %s511_s21, [#allocation5], %s9109_s2, %s9109_s2, %s9110_s23  }
  0xef   : > { %s9111_s26 = smov [#allocation9]   ;;  %s9112_s25 = smov [#allocation12]  }
  0xf0   : > { %s538_s8 = sshll.u32 %s9111_s26, 4  ;;  %s567_s12 = sshll.u32 %s9112_s25, 4  ;;  %s539_s8 = int_to_ptr.vmem [resolvable:$true] %s538_s8  ;;  %s568_s12 = int_to_ptr.vmem [resolvable:$true] %s567_s12 }
  0xf1   : > { %s8919_s5 = scalar_lea.hbm %s11789_s7, 16 }
  0xf2   : > { %p8920_p13 = scmp.ne.s32.totalorder %s11789_s7, %s8919_s5  ;;  %p8926_p0 = scmp.lt.u32.totalorder %s8919_s5, %s11789_s7 }
  0xf4   : > { %p8922_p2 = pnand %p8920_p13, %p9263_p7 }
  0xf6   : > { %p8923_p3 = pneg %p8922_p2 }
  0xf8   : > { %p8928_p1 = pnand %p8926_p0, %p8923_p3 }
  0xfa   : > { %8931 = shalt.err (!%p8928_p1)
}
  0xfb   : > { %s8932_s21 = scalar_lea.vmem %s539_s8, 16  ;;  %s8939_s27 = scalar_lea.vmem %s539_s8, 32 }
  0xfc   : > { %p8933_p4 = scmp.ne.s32.totalorder %s539_s8, %s8932_s21  ;;  %p8940_p9 = scmp.lt.s32.totalorder %s539_s8, %s539_s8 }
  0xfd   : > { %p8941_p10 = scmp.lt.s32.totalorder %s8939_s27, %s8932_s21 }
  0xfe   : > { %p8935_p6 = pnand %p8933_p4, %p9263_p7 }
  0xff   : > { %p8942_p11 = por %p8941_p10, %p8940_p9 }
 0x100   : > { %p8936_p8 = pneg %p8935_p6 }
 0x102   : > { %p8943_p12 = pnand %p8942_p11, %p8936_p8 }
 0x104   : > { %8946 = shalt.err (!%p8943_p12)
}
 0x105   : > { %8195 = dma.hbm_to_vmem [thread:$0]  (!%p9247_p5), %s11789_s7, 16, %s539_s8, [#allocation8]  }
 0x106   : > { %s8947_s9 = scalar_lea.hbm %s11793_s11, 8192 }
 0x107   : > { %p8948_p13 = scmp.ne.s32.totalorder %s11793_s11, %s8947_s9  ;;  %p8954_p0 = scmp.lt.u32.totalorder %s8947_s9, %s11793_s11 }
 0x109   : > { %p8950_p2 = pnand %p8948_p13, %p9263_p7 }
 0x10b   : > { %p8951_p3 = pneg %p8950_p2 }
 0x10d   : > { %p8956_p1 = pnand %p8954_p0, %p8951_p3 }
 0x10f   : > { %8959 = shalt.err (!%p8956_p1)
}
 0x110   : > { %s8960_s20 = scalar_lea.vmem %s568_s12, 8192  ;;  %p8968_p9 = scmp.lt.s32.totalorder %s568_s12, %s568_s12 }
 0x111   : > { %p8961_p4 = scmp.ne.s32.totalorder %s568_s12, %s8960_s20  ;;  %p8969_p10 = scmp.lt.s32.totalorder %s8960_s20, %s8960_s20 }
 0x113   : > { %p8963_p6 = pnand %p8961_p4, %p9263_p7  ;;  %p8970_p11 = por %p8969_p10, %p8968_p9 }
 0x115   : > { %p8964_p8 = pneg %p8963_p6 }
 0x117   : > { %p8971_p12 = pnand %p8970_p11, %p8964_p8 }
 0x119   : > { %8974 = shalt.err (!%p8971_p12)
}
 0x11a   : > { %8201 = dma.hbm_to_vmem [thread:$0]  (!%p9247_p5), %s11793_s11, 8192, %s568_s12, [#allocation11], %s9109_s2, %s9109_s2, %s9110_s23  }
 0x11b   : > { %s9113_s27 = smov [#allocation15]   ;;  %s9114_s26 = smov [#allocation18]  }
 0x11c   : > { %s595_s29 = sshll.u32 %s9113_s27, 4  ;;  %s619_s25 = sshll.u32 %s9114_s26, 4  ;;  %s596_s29 = int_to_ptr.vmem [resolvable:$true] %s595_s29  ;;  %s620_s25 = int_to_ptr.vmem [resolvable:$true] %s619_s25 }
 0x11d   : > { %s8975_s5 = scalar_lea.hbm %s11796_s14, 32 }
 0x11e   : > { %p8976_p13 = scmp.ne.s32.totalorder %s11796_s14, %s8975_s5  ;;  %p8982_p0 = scmp.lt.u32.totalorder %s8975_s5, %s11796_s14 }
 0x120   : > { %p8978_p2 = pnand %p8976_p13, %p9263_p7 }
 0x122   : > { %p8979_p3 = pneg %p8978_p2 }
 0x124   : > { %p8984_p1 = pnand %p8982_p0, %p8979_p3 }
 0x126   : > { %8987 = shalt.err (!%p8984_p1)
}
 0x127   : > { %s8988_s2 = scalar_lea.vmem %s596_s29, 32  ;;  %p8996_p9 = scmp.lt.s32.totalorder %s596_s29, %s596_s29 }
 0x128   : > { %p8989_p4 = scmp.ne.s32.totalorder %s596_s29, %s8988_s2  ;;  %p8997_p10 = scmp.lt.s32.totalorder %s8988_s2, %s8988_s2 }
 0x12a   : > { %p8991_p6 = pnand %p8989_p4, %p9263_p7  ;;  %p8998_p11 = por %p8997_p10, %p8996_p9 }
 0x12c   : > { %p8992_p8 = pneg %p8991_p6 }
 0x12e   : > { %p8999_p12 = pnand %p8998_p11, %p8992_p8 }
 0x130   : > { %9002 = shalt.err (!%p8999_p12)
}
 0x131   : > { %8207 = dma.hbm_to_vmem [thread:$0]  (!%p9247_p5), %s11796_s14, 32, %s596_s29, [#allocation14]  }
 0x132   : > { %s9003_s27 = scalar_lea.hbm %s11798_s16, 32 }
 0x133   : > { %p9004_p13 = scmp.ne.s32.totalorder %s11798_s16, %s9003_s27  ;;  %p9010_p0 = scmp.lt.u32.totalorder %s9003_s27, %s11798_s16 }
 0x135   : > { %p9006_p2 = pnand %p9004_p13, %p9263_p7 }
 0x137   : > { %p9007_p3 = pneg %p9006_p2 }
 0x139   : > { %p9012_p1 = pnand %p9010_p0, %p9007_p3 }
 0x13b   : > { %9015 = shalt.err (!%p9012_p1)
}
 0x13c   : > { %s9016_s10 = scalar_lea.vmem %s620_s25, 32  ;;  %p9024_p9 = scmp.lt.s32.totalorder %s620_s25, %s620_s25 }
 0x13d   : > { %p9017_p4 = scmp.ne.s32.totalorder %s620_s25, %s9016_s10  ;;  %p9025_p10 = scmp.lt.s32.totalorder %s9016_s10, %s9016_s10 }
 0x13f   : > { %p9019_p6 = pnand %p9017_p4, %p9263_p7  ;;  %p9026_p11 = por %p9025_p10, %p9024_p9 }
 0x141   : > { %p9020_p8 = pneg %p9019_p6 }
 0x143   : > { %p9027_p12 = pnand %p9026_p11, %p9020_p8 }
 0x145   : > { %9030 = shalt.err (!%p9027_p12)
}
 0x146   : > { %8213 = dma.hbm_to_vmem [thread:$0]  (!%p9247_p5), %s11798_s16, 32, %s620_s25, [#allocation17]  }
 0x147   : > { %s9115_s19 = smov [#allocation21]   ;;  %s9031_s12 = scalar_lea.hbm %s11800_s18, 48 }
 0x148   : > { %s643_s20 = sshll.u32 %s9115_s19, 4  ;;  %p9032_p13 = scmp.ne.s32.totalorder %s11800_s18, %s9031_s12  ;;  %s644_s20 = int_to_ptr.vmem [resolvable:$true] %s643_s20 }
 0x149   : > { %p9038_p0 = scmp.lt.u32.totalorder %s9031_s12, %s11800_s18 }
 0x14a   : > { %p9034_p2 = pnand %p9032_p13, %p9263_p7 }
 0x14c   : > { %p9035_p3 = pneg %p9034_p2 }
 0x14e   : > { %p9040_p1 = pnand %p9038_p0, %p9035_p3 }
 0x150   : > { %9043 = shalt.err (!%p9040_p1)
}
 0x151   : > { %s9044_s25 = scalar_lea.vmem %s644_s20, 48  ;;  %s9051_s15 = scalar_lea.vmem %s644_s20, 64 }
 0x152   : > { %p9045_p4 = scmp.ne.s32.totalorder %s644_s20, %s9044_s25  ;;  %p9052_p9 = scmp.lt.s32.totalorder %s644_s20, %s644_s20 }
 0x153   : > { %p9053_p10 = scmp.lt.s32.totalorder %s9051_s15, %s9044_s25 }
 0x154   : > { %p9047_p6 = pnand %p9045_p4, %p9263_p7 }
 0x155   : > { %p9054_p11 = por %p9053_p10, %p9052_p9 }
 0x156   : > { %p9048_p8 = pneg %p9047_p6 }
 0x158   : > { %p9055_p12 = pnand %p9054_p11, %p9048_p8 }
 0x15a   : > { %9058 = shalt.err (!%p9055_p12)
}
 0x15b   : > { %8219 = dma.hbm_to_vmem [thread:$0]  (!%p9247_p5), %s11800_s18, 48, %s644_s20, [#allocation20]  }
 0x15c   : > { %p11887_p13 = scmp.ne.s32.totalorder %s11878_s22, 0 }
 0x15e   : > { %674 = sbr.rel (%p11887_p13) target bundleno = 2806 (0xaf6), region = 96 }
 0x165   : > { %p11888_p2 = scmp.ne.s32.totalorder %s11877_s1, 0 }
 0x167   : > { %9064 = dma.done.wait (%p11888_p2), [#allocation3], 32  }
 0x168   : > { %9066 = vsyncadd (%p11888_p2), [#allocation3], 4294967264 }
 0x169   : > { %9068 = dma.done.wait (%p11888_p2), [#allocation5], 272  }
 0x16a   : > { %9070 = vsyncadd (%p11888_p2), [#allocation5], 4294967024 }
 0x16b   : > { %9072 = dma.done.wait (%p11888_p2), [#allocation8], 32  }
 0x16c   : > { %9074 = vsyncadd (%p11888_p2), [#allocation8], 4294967264 }
 0x16d   : > { %9076 = dma.done.wait (%p11888_p2), [#allocation11], 24576  }
 0x16e   : > { %9078 = vsyncadd (%p11888_p2), [#allocation11], 4294942720 }
 0x16f   : > { %9080 = dma.done.wait (%p11888_p2), [#allocation14], 48  }
 0x170   : > { %9082 = vsyncadd (%p11888_p2), [#allocation14], 4294967248 }
 0x171   : > { %9084 = dma.done.wait (%p11888_p2), [#allocation17], 4128  }
 0x172   : > { %9086 = vsyncadd (%p11888_p2), [#allocation17], 4294963168 }
 0x173   : > { %9088 = dma.done.wait (%p11888_p2), [#allocation20], 6192  }
 0x174   : > { %9090 = vsyncadd (%p11888_p2), [#allocation20], 4294961104  ;;  %vm907_vm0 = vcmask 1040384   ;;  %s11889_s22 = sadd.s32 4294967295, %s9093_s0   ;;  %vm908_vm1 = vcmask 1041408   ;;  %v9116_v0 = vmov 65535  }
 0x175   : > { %s7165_s3 = sshll.u32 %s11889_s22, 1  ;;  %v909_v1 = vsel %vm907_vm0, 4294967295, %v9116_v0  ;;  %s11890_s28 = sld [smem:[#allocation68_spill]]  ;;  %v850_v3 = vld [vmem:[#allocation2] sm:$0x3]  ;;  %vm858_vm2 = vcmask 23552  }
 0x176   : > { %p784_p5 = scmp.lt.s32.totalorder %s7165_s3, 3  ;;  %v910_v2 = vsel %vm908_vm1, %v909_v1, 0  ;;  %v8440_v53 = vld [vmem:[#allocation6] sm:$0xff]   ;;  %v8441_v54 = vld [vmem:[#allocation6 + $0x8] sm:$0xff]   ;;  %v8445_v58 = vld [vmem:[%s11788_s6 + $0x18] sm:$0xff]   ;;  %vm1146_vm3 = vcmask 261120  }
 0x177   : > { %v912_v6 = vand.u32 %v910_v2, %v850_v3  ;;  %8051 = vmatprep.subr.bf16.mxu1 %v8440_v53  ;;  %v8442_v55 = vld [vmem:[%s11788_s6] sm:$0xff]   ;;  %v8443_v56 = vld [vmem:[%s11788_s6 + $0x8] sm:$0xff]   ;;  %v8444_v57 = vld [vmem:[%s11788_s6 + $0x10] sm:$0xff]   ;;  %vm1443_vm4 = vcmask 523264   ;;  %s9117_s26 = smov 32   ;;  %s9118_s25 = smov 96  }
 0x178   : > { %s12054_s3 = smov (!%p784_p5, %s7165_s3), 3  ;;  %8052 = vmatpush3.bf16.msra.mxu1 %v8440_v53  ;;  %v9619_v59 = vld [vmem:[#allocation4] ss:$0 sm:$0xff]  ;;  %vm1973_vm5 = vcmask 785408   ;;  %s11939_s5 = sld [smem:[#allocation74_spill]]  ;;  %vm4917_vm7 = vcmask 1041409  }
 0x179   : > { %s7763_s24 = sshll.u32 %s12054_s3, 7  ;;  %8017 = vmatprep.subr.bf16.mxu0 %v912_v6  ;;  %8053 = vmatprep.subr.bf16.mxu1 %v8441_v54  ;;  %vm10005_vm6 = vmpackc.low %vm1973_vm5, %vm1973_vm5  ;;  %s12047_s27 = sld [smem:[#allocation69_spill]] }
 0x17a   : > { %8018 = vmatpush3.bf16.msra.mxu0 %v912_v6  ;;  %s8127_s15 = smul.u32 3, %s12054_s3 }
 0x17b   : > { %s9557_s19 = scalar_lea.vmem %s11890_s28, %s7763_s24  ;;  %8087 = vmatprep.subr.bf16.mxu0 %v8442_v55  ;;  %s11966_s28 = sld [smem:[#allocation75_spill]] }
 0x17c   : > { %v802_v4 = vld [vmem:[%s9557_s19] sm:$0xff]  ;;  %v803_v5 = vld [vmem:[%s9557_s19 + $0x8] sm:$0xff]  ;;  %v804_v8 = vld [vmem:[%s9557_s19 + $0x10] sm:$0xff]  ;;  %8054 = vmatpush3.bf16.msra.mxu1 %v8441_v54  ;;  %s12051_s24 = sld [smem:[#allocation79_spill]] }
 0x17d   : > { %v834_v7 = vpack.c.bf16 %v803_v5, %v802_v4  ;;  %v805_v9 = vld [vmem:[%s9557_s19 + $0x18] sm:$0xff]  ;;  %v806_v10 = vld [vmem:[%s9557_s19 + $0x20] sm:$0xff]  ;;  %v807_v11 = vld [vmem:[%s9557_s19 + $0x28] sm:$0xff] }
 0x17e   : > { %v835_v12 = vpack.c.bf16 %v805_v9, %v804_v8  ;;  %v836_v13 = vpack.c.bf16 %v807_v11, %v806_v10  ;;  %v808_v14 = vld [vmem:[%s9557_s19 + $0x30] sm:$0xff]  ;;  %v809_v15 = vld [vmem:[%s9557_s19 + $0x38] sm:$0xff]  ;;  %v810_v16 = vld [vmem:[%s9557_s19 + $0x40] sm:$0xff] }
 0x17f   : > { %8019 = vmatprep.mubr.msk.bf16.mxu0 %vm858_vm2, %v834_v7  ;;  %v811_v17 = vld [vmem:[%s9557_s19 + $0x48] sm:$0xff]  ;;  %v837_v18 = vpack.c.bf16 %v809_v15, %v808_v14  ;;  %v812_v20 = vld [vmem:[%s9557_s19 + $0x50] sm:$0xff]  ;;  %v813_v21 = vld [vmem:[%s9557_s19 + $0x58] sm:$0xff] }
 0x180   : > { %8020 = vmatmul.mubr.msk.bf16.vlgmr.msra.gmra.mrb[0].mxu0 %vm858_vm2, %v835_v12  ;;  %v838_v19 = vpack.c.bf16 %v811_v17, %v810_v16  ;;  %v814_v22 = vld [vmem:[%s9557_s19 + $0x60] sm:$0xff]  ;;  %v815_v23 = vld [vmem:[%s9557_s19 + $0x68] sm:$0xff]  ;;  %v839_v24 = vpack.c.bf16 %v813_v21, %v812_v20  ;;  %v816_v26 = vld [vmem:[%s9557_s19 + $0x70] sm:$0xff] }
 0x181   : > { %8023 = vmatprep.mubr.msk.bf16.mxu0 %vm858_vm2, %v836_v13  ;;  %v840_v25 = vpack.c.bf16 %v815_v23, %v814_v22  ;;  %v817_v27 = vld [vmem:[%s9557_s19 + $0x78] sm:$0xff]  ;;  %v818_v28 = vld [vmem:[%s9557_s19 + $0x80] sm:$0xff]  ;;  %v819_v29 = vld [vmem:[%s9557_s19 + $0x88] sm:$0xff]  ;;  %8088 = vmatpush3.bf16.msra.mxu0 %v8442_v55 }
 0x182   : > { %v841_v30 = vpack.c.bf16 %v817_v27, %v816_v26  ;;  %v842_v31 = vpack.c.bf16 %v819_v29, %v818_v28  ;;  %v820_v32 = vld [vmem:[%s9557_s19 + $0x90] sm:$0xff]  ;;  %v821_v33 = vld [vmem:[%s9557_s19 + $0x98] sm:$0xff]  ;;  %v822_v34 = vld [vmem:[%s9557_s19 + $0xa0] sm:$0xff]  ;;  %8089 = vmatprep.subr.bf16.mxu0 %v8443_v56  ;;  %s799_s10 = scalar_lea.vmem %s12051_s24, %s8127_s15 }
 0x183   : > { %v823_v35 = vld [vmem:[%s9557_s19 + $0xa8] sm:$0xff]  ;;  %v843_v36 = vpack.c.bf16 %v821_v33, %v820_v32  ;;  %v824_v38 = vld [vmem:[%s9557_s19 + $0xb0] sm:$0xff]  ;;  %v825_v39 = vld [vmem:[%s9557_s19 + $0xb8] sm:$0xff] }
 0x184   : > { %v844_v37 = vpack.c.bf16 %v823_v35, %v822_v34  ;;  %v826_v40 = vld [vmem:[%s9557_s19 + $0xc0] sm:$0xff]  ;;  %v827_v41 = vld [vmem:[%s9557_s19 + $0xc8] sm:$0xff]  ;;  %v845_v42 = vpack.c.bf16 %v825_v39, %v824_v38  ;;  %v828_v44 = vld [vmem:[%s9557_s19 + $0xd0] sm:$0xff] }
 0x185   : > { %v846_v43 = vpack.c.bf16 %v827_v41, %v826_v40  ;;  %v829_v45 = vld [vmem:[%s9557_s19 + $0xd8] sm:$0xff]  ;;  %v830_v46 = vld [vmem:[%s9557_s19 + $0xe0] sm:$0xff]  ;;  %v831_v47 = vld [vmem:[%s9557_s19 + $0xe8] sm:$0xff]  ;;  %8090 = vmatpush3.bf16.msra.mxu0 %v8443_v56 }
 0x186   : > { %v847_v48 = vpack.c.bf16 %v829_v45, %v828_v44  ;;  %v848_v49 = vpack.c.bf16 %v831_v47, %v830_v46  ;;  %v832_v50 = vld [vmem:[%s9557_s19 + $0xf0] sm:$0xff]  ;;  %v833_v51 = vld [vmem:[%s9557_s19 + $0xf8] sm:$0xff]  ;;  %8091 = vmatprep.subr.bf16.mxu0 %v8444_v57  ;;  %s12046_s19 = sld [smem:[#allocation77_spill]] }
 0x187   : > { %v849_v52 = vpack.c.bf16 %v833_v51, %v832_v50 }
 0x188   : > { %8024 = vmatmul.mubr.msk.bf16.gmra.mrb[4].mxu0 %vm858_vm2, %v837_v18 }
 0x189   : > { %8027 = vmatprep.mubr.msk.bf16.mxu0 %vm858_vm2, %v838_v19  ;;  %8092 = vmatpush3.bf16.msra.mxu0 %v8444_v57 }
 0x18a   : > { %8093 = vmatprep.subr.bf16.mxu0 %v8445_v58 }
 0x18d   : > { %8094 = vmatpush3.bf16.msra.mxu0 %v8445_v58 }
 0x190   : > { %8028 = vmatmul.mubr.msk.bf16.gmra.mrb[8].mxu0 %vm858_vm2, %v839_v24 }
 0x191   : > { %8031 = vmatprep.mubr.msk.bf16.mxu0 %vm858_vm2, %v840_v25 }
 0x198   : > { %8032 = vmatmul.mubr.msk.bf16.gmra.mrb[12].mxu0 %vm858_vm2, %v841_v30 }
 0x199   : > { %8035 = vmatprep.mubr.msk.bf16.mxu0 %vm858_vm2, %v842_v31 }
 0x1a0   : > { %8036 = vmatmul.mubr.msk.bf16.gmra.mrb[16].mxu0 %vm858_vm2, %v843_v36 }
 0x1a1   : > { %8039 = vmatprep.mubr.msk.bf16.mxu0 %vm858_vm2, %v844_v37 }
 0x1a8   : > { %8040 = vmatmul.mubr.msk.bf16.gmra.mrb[20].mxu0 %vm858_vm2, %v845_v42 }
 0x1a9   : > { %8043 = vmatprep.mubr.msk.bf16.mxu0 %vm858_vm2, %v846_v43 }
 0x1b0   : > { %8044 = vmatmul.mubr.msk.bf16.gmra.mrb[24].mxu0 %vm858_vm2, %v847_v48 }
 0x1b1   : > { %8047 = vmatprep.mubr.msk.bf16.mxu0 %vm858_vm2, %v848_v49 }
 0x1b8   : > { %8048 = vmatmul.mubr.msk.bf16.gmra.mrb[28].mxu0 %vm858_vm2, %v849_v52 }
 0x253   : > { %v8021_v60 = vpop.f32.mrb[0].mxu0 }
 0x254   : > { %v948_v61 = vpop.f32.mrb[1].mxu0  ;;  %v9625_v0 = vadd.f32 %v8021_v60, %v9619_v59 }
 0x255   : > { %v9622_v62 = vadd.f32 %v9619_v59, %v948_v61  ;;  %v8022_v63 = vpop.f32.mrb[2].mxu0 }
 0x256   : > { %v9628_v1 = vadd.f32 %v8022_v63, %v9619_v59  ;;  %v951_v2 = vpop.f32.mrb[3].mxu0  ;;  %v11839_v7 = vmax.f32 %v9625_v0, 0.0 }
 0x257   : > { %v9631_v3 = vadd.f32 %v9619_v59, %v951_v2  ;;  %v11841_v5 = vmax.f32 %v9622_v62, 0.0 }
 0x258   : > { %v11840_v4 = vmax.f32 %v9628_v1, 0.0 }
 0x259   : > { %v11842_v6 = vmax.f32 %v9631_v3, 0.0 }
 0x25a   : > { %v1108_v10 = vpack.c.bf16 %v11840_v4, %v11839_v7 }
 0x25b   : > { %v8025_v8 = vpop.f32.mrb[4].mxu0  ;;  %v1107_v9 = vpack.c.bf16 %v11842_v6, %v11841_v5  ;;  %v2090_v6 = vld [vmem:[#allocation10 + $0xa0] sm:$0xff] }
 0x25c   : > { %v9646_v11 = vadd.f32 %v8025_v8, %v9619_v59  ;;  %v964_v12 = vpop.f32.mrb[5].mxu0 }
 0x25d   : > { %v9649_v13 = vadd.f32 %v9619_v59, %v964_v12  ;;  %v8026_v14 = vpop.f32.mrb[6].mxu0  ;;  %8055 = vmatprep.mubr.msk.bf16.mxu1 %vm1146_vm3, %v1107_v9 }
 0x25e   : > { %v11835_v15 = vmax.f32 %v9646_v11, 0.0  ;;  %v9654_v16 = vadd.f32 %v8026_v14, %v9619_v59  ;;  %v967_v17 = vpop.f32.mrb[7].mxu0  ;;  %8056 = vmatmul.mubr.msk.bf16.vlgmr.msra.gmra.mrb[0].mxu1 %vm1146_vm3, %v1108_v10 }
 0x25f   : > { %v11837_v18 = vmax.f32 %v9649_v13, 0.0  ;;  %v9659_v19 = vadd.f32 %v9619_v59, %v967_v17 }
 0x260   : > { %v11836_v20 = vmax.f32 %v9654_v16, 0.0 }
 0x261   : > { %v11838_v21 = vmax.f32 %v9659_v19, 0.0 }
 0x262   : > { %v1110_v22 = vpack.c.bf16 %v11836_v20, %v11835_v15 }
 0x263   : > { %v1109_v23 = vpack.c.bf16 %v11838_v21, %v11837_v18  ;;  %v8029_v24 = vpop.f32.mrb[8].mxu0 }
 0x264   : > { %v9672_v25 = vadd.f32 %v8029_v24, %v9619_v59  ;;  %v980_v26 = vpop.f32.mrb[9].mxu0 }
 0x265   : > { %v9675_v27 = vadd.f32 %v9619_v59, %v980_v26  ;;  %v8030_v28 = vpop.f32.mrb[10].mxu0  ;;  %8059 = vmatprep.mubr.msk.bf16.mxu1 %vm1146_vm3, %v1109_v23 }
 0x266   : > { %v11831_v29 = vmax.f32 %v9672_v25, 0.0  ;;  %v9680_v30 = vadd.f32 %v8030_v28, %v9619_v59  ;;  %v983_v31 = vpop.f32.mrb[11].mxu0  ;;  %8060 = vmatmul.mubr.msk.bf16.gmra.mrb[4].mxu1 %vm1146_vm3, %v1110_v22 }
 0x267   : > { %v11833_v32 = vmax.f32 %v9675_v27, 0.0  ;;  %v9685_v33 = vadd.f32 %v9619_v59, %v983_v31 }
 0x268   : > { %v11832_v34 = vmax.f32 %v9680_v30, 0.0 }
 0x269   : > { %v11834_v35 = vmax.f32 %v9685_v33, 0.0 }
 0x26a   : > { %v1112_v36 = vpack.c.bf16 %v11832_v34, %v11831_v29 }
 0x26b   : > { %v1111_v37 = vpack.c.bf16 %v11834_v35, %v11833_v32  ;;  %v8033_v38 = vpop.f32.mrb[12].mxu0 }
 0x26c   : > { %v9698_v39 = vadd.f32 %v8033_v38, %v9619_v59  ;;  %v996_v40 = vpop.f32.mrb[13].mxu0 }
 0x26d   : > { %v9701_v41 = vadd.f32 %v9619_v59, %v996_v40  ;;  %v8034_v42 = vpop.f32.mrb[14].mxu0  ;;  %8063 = vmatprep.mubr.msk.bf16.mxu1 %vm1146_vm3, %v1111_v37 }
 0x26e   : > { %v11827_v43 = vmax.f32 %v9698_v39, 0.0  ;;  %v9706_v44 = vadd.f32 %v8034_v42, %v9619_v59  ;;  %v999_v45 = vpop.f32.mrb[15].mxu0  ;;  %8064 = vmatmul.mubr.msk.bf16.gmra.mrb[8].mxu1 %vm1146_vm3, %v1112_v36 }
 0x26f   : > { %v11829_v46 = vmax.f32 %v9701_v41, 0.0  ;;  %v9711_v47 = vadd.f32 %v9619_v59, %v999_v45 }
 0x270   : > { %v11828_v48 = vmax.f32 %v9706_v44, 0.0 }
 0x271   : > { %v11830_v49 = vmax.f32 %v9711_v47, 0.0 }
 0x272   : > { %v1114_v50 = vpack.c.bf16 %v11828_v48, %v11827_v43 }
 0x273   : > { %v1113_v51 = vpack.c.bf16 %v11830_v49, %v11829_v46  ;;  %v8037_v52 = vpop.f32.mrb[16].mxu0 }
 0x274   : > { %v9724_v53 = vadd.f32 %v8037_v52, %v9619_v59  ;;  %v1012_v54 = vpop.f32.mrb[17].mxu0 }
 0x275   : > { %v9727_v55 = vadd.f32 %v9619_v59, %v1012_v54  ;;  %v8038_v56 = vpop.f32.mrb[18].mxu0  ;;  %8067 = vmatprep.mubr.msk.bf16.mxu1 %vm1146_vm3, %v1113_v51 }
 0x276   : > { %v11821_v57 = vmax.f32 %v9724_v53, 0.0  ;;  %v9732_v58 = vadd.f32 %v8038_v56, %v9619_v59  ;;  %v1015_v60 = vpop.f32.mrb[19].mxu0  ;;  %8068 = vmatmul.mubr.msk.bf16.gmra.mrb[12].mxu1 %vm1146_vm3, %v1114_v50 }
 0x277   : > { %v11825_v61 = vmax.f32 %v9727_v55, 0.0  ;;  %v9737_v63 = vadd.f32 %v9619_v59, %v1015_v60 }
 0x278   : > { %v11822_v2 = vmax.f32 %v9732_v58, 0.0 }
 0x279   : > { %v11826_v8 = vmax.f32 %v9737_v63, 0.0 }
 0x27a   : > { %v1116_v9 = vpack.c.bf16 %v11822_v2, %v11821_v57 }
 0x27b   : > { %v1115_v10 = vpack.c.bf16 %v11826_v8, %v11825_v61  ;;  %v8041_v12 = vpop.f32.mrb[20].mxu0 }
 0x27c   : > { %v9750_v14 = vadd.f32 %v8041_v12, %v9619_v59  ;;  %v1028_v17 = vpop.f32.mrb[21].mxu0 }
 0x27d   : > { %v9753_v22 = vadd.f32 %v9619_v59, %v1028_v17  ;;  %v8042_v23 = vpop.f32.mrb[22].mxu0  ;;  %8071 = vmatprep.mubr.msk.bf16.mxu1 %vm1146_vm3, %v1115_v10 }
 0x27e   : > { %v11811_v24 = vmax.f32 %v9750_v14, 0.0  ;;  %v9758_v26 = vadd.f32 %v8042_v23, %v9619_v59  ;;  %v1031_v28 = vpop.f32.mrb[23].mxu0  ;;  %8072 = vmatmul.mubr.msk.bf16.gmra.mrb[16].mxu1 %vm1146_vm3, %v1116_v9 }
 0x27f   : > { %v11817_v31 = vmax.f32 %v9753_v22, 0.0  ;;  %v9763_v36 = vadd.f32 %v9619_v59, %v1031_v28 }
 0x280   : > { %v11816_v37 = vmax.f32 %v9758_v26, 0.0 }
 0x281   : > { %v11818_v38 = vmax.f32 %v9763_v36, 0.0 }
 0x282   : > { %v1118_v40 = vpack.c.bf16 %v11816_v37, %v11811_v24 }
 0x283   : > { %v1117_v42 = vpack.c.bf16 %v11818_v38, %v11817_v31  ;;  %v8045_v45 = vpop.f32.mrb[24].mxu0 }
 0x284   : > { %v9776_v50 = vadd.f32 %v8045_v45, %v9619_v59  ;;  %v1044_v51 = vpop.f32.mrb[25].mxu0 }
 0x285   : > { %v9779_v52 = vadd.f32 %v9619_v59, %v1044_v51  ;;  %v8046_v54 = vpop.f32.mrb[26].mxu0  ;;  %8075 = vmatprep.mubr.msk.bf16.mxu1 %vm1146_vm3, %v1117_v42 }
 0x286   : > { %11891 = vst [vmem:[#allocation29_spill] sm:$0xff] %v9776_v50  ;;  %v11812_v56 = vmax.f32 %v9776_v50, 0.0  ;;  %v9784_v60 = vadd.f32 %v8046_v54, %v9619_v59  ;;  %v1047_v9 = vpop.f32.mrb[27].mxu0  ;;  %8076 = vmatmul.mubr.msk.bf16.gmra.mrb[20].mxu1 %vm1146_vm3, %v1118_v40 }
 0x287   : > { %v11814_v10 = vmax.f32 %v9779_v52, 0.0  ;;  %v9789_v12 = vadd.f32 %v9619_v59, %v1047_v9 }
 0x288   : > { %11892 = vst [vmem:[#allocation30_spill] sm:$0xff] %v9784_v60  ;;  %v11813_v17 = vmax.f32 %v9784_v60, 0.0 }
 0x289   : > { %v11815_v23 = vmax.f32 %v9789_v12, 0.0 }
 0x28a   : > { %v1120_v28 = vpack.c.bf16 %v11813_v17, %v11812_v56 }
 0x28b   : > { %v1119_v42 = vpack.c.bf16 %v11815_v23, %v11814_v10  ;;  %v8049_v40 = vpop.f32.mrb[28].mxu0 }
 0x28c   : > { %v9802_v45 = vadd.f32 %v8049_v40, %v9619_v59  ;;  %v1060_v51 = vpop.f32.mrb[29].mxu0 }
 0x28d   : > { %v9805_v54 = vadd.f32 %v9619_v59, %v1060_v51  ;;  %v8050_v9 = vpop.f32.mrb[30].mxu0  ;;  %8079 = vmatprep.mubr.msk.bf16.mxu1 %vm1146_vm3, %v1119_v42 }
 0x28e   : > { %11893 = vst [vmem:[#allocation31_spill] sm:$0xff] %v9802_v45  ;;  %v11819_v24 = vmax.f32 %v9802_v45, 0.0  ;;  %v9810_v56 = vadd.f32 %v8050_v9, %v9619_v59  ;;  %v1063_v17 = vpop.f32.mrb[31].mxu0  ;;  %8080 = vmatmul.mubr.msk.bf16.gmra.mrb[24].mxu1 %vm1146_vm3, %v1120_v28  ;;  %v2098_v45 = vld [vmem:[#allocation10 + $0xe0] sm:$0xff] }
 0x28f   : > { %11894 = vst [vmem:[#allocation32_spill] sm:$0xff] %v9805_v54  ;;  %v11823_v10 = vmax.f32 %v9805_v54, 0.0  ;;  %v9815_v40 = vadd.f32 %v9619_v59, %v1063_v17  ;;  %v9829_v59 = vld [vmem:[#allocation7] ss:$0 sm:$0xff]  ;;  %v2110_v54 = vld [vmem:[#allocation10 + $0x140] sm:$0xff] }
 0x290   : > { %11895 = vst [vmem:[#allocation33_spill] sm:$0xff] %v9810_v56  ;;  %v11820_v23 = vmax.f32 %v9810_v56, 0.0 }
 0x291   : > { %11896 = vst [vmem:[#allocation34_spill] sm:$0xff] %v9815_v40  ;;  %v11824_v51 = vmax.f32 %v9815_v40, 0.0  ;;  %v2115_v40 = vld [vmem:[#allocation10 + $0x168] sm:$0xff] }
 0x292   : > { %v1122_v42 = vpack.c.bf16 %v11820_v23, %v11819_v24 }
 0x293   : > { %v1121_v9 = vpack.c.bf16 %v11824_v51, %v11823_v10 }
 0x295   : > { %8083 = vmatprep.mubr.msk.bf16.mxu1 %vm1146_vm3, %v1121_v9 }
 0x296   : > { %8084 = vmatmul.mubr.msk.bf16.gmra.mrb[28].mxu1 %vm1146_vm3, %v1122_v42 }
 0x331   : > { %v8057_v17 = vpop.f32.mrb[0].mxu1 }
 0x332   : > { %v1238_v28 = vadd.f32 %v8057_v17, %v9829_v59  ;;  %v1229_v37 = vpop.f32.mrb[1].mxu1 }
 0x333   : > { %v1230_v31 = vadd.f32 %v9829_v59, %v1229_v37  ;;  %v8058_v38 = vpop.f32.mrb[2].mxu1 }
 0x334   : > { %v1241_v24 = vadd.f32 %v8058_v38, %v9829_v59  ;;  %v1232_v23 = vpop.f32.mrb[3].mxu1  ;;  %v1358_v2 = vmax.f32 %v1238_v28, 0.0 }
 0x335   : > { %v1233_v57 = vadd.f32 %v9829_v59, %v1232_v23  ;;  %v1356_v51 = vmax.f32 %v1230_v31, 0.0 }
 0x336   : > { %v1359_v10 = vmax.f32 %v1241_v24, 0.0 }
 0x337   : > { %v1357_v9 = vmax.f32 %v1233_v57, 0.0 }
 0x338   : > { %v1389_v61 = vpack.c.bf16 %v1359_v10, %v1358_v2  ;;  %v8290_v42 = vpack.i.bf16 %v1359_v10, %v1358_v2 }
 0x339   : > { %v1388_v8 = vpack.c.bf16 %v1357_v9, %v1356_v51  ;;  %v8061_v43 = vpop.f32.mrb[4].mxu1  ;;  %v8280_v48 = vpack.i.bf16 %v1357_v9, %v1356_v51 }
 0x33a   : > { %v1254_v17 = vadd.f32 %v8061_v43, %v9829_v59  ;;  %8291 = vrot.lane.b32.xlu1 %v8290_v42, %s9117_s26  ;;  %v1245_v37 = vpop.f32.mrb[5].mxu1 }
 0x33b   : > { %v1246_v38 = vadd.f32 %v9829_v59, %v1245_v37  ;;  %v8062_v46 = vpop.f32.mrb[6].mxu1  ;;  %8281 = vrot.lane.b32.xlu0 %v8280_v48, %s9117_s26  ;;  %8095 = vmatprep.mubr.msk.bf16.mxu0 %vm1443_vm4, %v1388_v8 }
 0x33c   : > { %v1362_v57 = vmax.f32 %v1254_v17, 0.0  ;;  %v1257_v2 = vadd.f32 %v8062_v46, %v9829_v59  ;;  %v1248_v24 = vpop.f32.mrb[7].mxu1  ;;  %8096 = vmatmul.mubr.msk.bf16.vlgmr.msra.gmra.mrb[32].mxu0 %vm1443_vm4, %v1389_v61 }
 0x33d   : > { %v1360_v31 = vmax.f32 %v1246_v38, 0.0  ;;  %v1249_v43 = vadd.f32 %v9829_v59, %v1248_v24 }
 0x33e   : > { %v1363_v10 = vmax.f32 %v1257_v2, 0.0 }
 0x33f   : > { %v1361_v23 = vmax.f32 %v1249_v43, 0.0 }
 0x340   : > { %v9843_v51 = vpack.i.bf16 %v1363_v10, %v1362_v57  ;;  %v1391_v28 = vpack.c.bf16 %v1363_v10, %v1362_v57 }
 0x341   : > { %v9845_v9 = vpack.i.bf16 %v1361_v23, %v1360_v31  ;;  %v1390_v42 = vpack.c.bf16 %v1361_v23, %v1360_v31  ;;  %v8065_v48 = vpop.f32.mrb[8].mxu1 }
 0x342   : > { %v1270_v8 = vadd.f32 %v8065_v48, %v9829_v59  ;;  %v1261_v17 = vpop.f32.mrb[9].mxu1 }
 0x343   : > { %v1262_v46 = vadd.f32 %v9829_v59, %v1261_v17  ;;  %v8066_v37 = vpop.f32.mrb[10].mxu1  ;;  %8099 = vmatprep.mubr.msk.bf16.mxu0 %vm1443_vm4, %v1390_v42 }
 0x344   : > { %v1366_v61 = vmax.f32 %v1270_v8, 0.0  ;;  %v1273_v38 = vadd.f32 %v8066_v37, %v9829_v59  ;;  %v1264_v2 = vpop.f32.mrb[11].mxu1  ;;  %8100 = vmatmul.mubr.msk.bf16.gmra.mrb[36].mxu0 %vm1443_vm4, %v1391_v28 }
 0x345   : > { %v1364_v24 = vmax.f32 %v1262_v46, 0.0  ;;  %v1265_v57 = vadd.f32 %v9829_v59, %v1264_v2 }
 0x346   : > { %v1367_v43 = vmax.f32 %v1273_v38, 0.0 }
 0x347   : > { %v1365_v31 = vmax.f32 %v1265_v57, 0.0 }
 0x348   : > { %v9853_v10 = vpack.i.bf16 %v1367_v43, %v1366_v61  ;;  %v1393_v23 = vpack.c.bf16 %v1367_v43, %v1366_v61 }
 0x349   : > { %v9855_v48 = vpack.i.bf16 %v1365_v31, %v1364_v24  ;;  %v1392_v17 = vpack.c.bf16 %v1365_v31, %v1364_v24  ;;  %v8069_v49 = vpop.f32.mrb[12].mxu1 }
 0x34a   : > { %v1286_v42 = vadd.f32 %v8069_v49, %v9829_v59  ;;  %v1277_v8 = vpop.f32.mrb[13].mxu1 }
 0x34b   : > { %v1278_v37 = vadd.f32 %v9829_v59, %v1277_v8  ;;  %v8070_v29 = vpop.f32.mrb[14].mxu1  ;;  %8103 = vmatprep.mubr.msk.bf16.mxu0 %vm1443_vm4, %v1392_v17 }
 0x34c   : > { %v1370_v28 = vmax.f32 %v1286_v42, 0.0  ;;  %v1289_v46 = vadd.f32 %v8070_v29, %v9829_v59  ;;  %v1280_v38 = vpop.f32.mrb[15].mxu1  ;;  %8104 = vmatmul.mubr.msk.bf16.gmra.mrb[40].mxu0 %vm1443_vm4, %v1393_v23 }
 0x34d   : > { %v1368_v2 = vmax.f32 %v1278_v37, 0.0  ;;  %v1281_v61 = vadd.f32 %v9829_v59, %v1280_v38 }
 0x34e   : > { %v1371_v57 = vmax.f32 %v1289_v46, 0.0 }
 0x34f   : > { %v1369_v24 = vmax.f32 %v1281_v61, 0.0 }
 0x350   : > { %v9863_v43 = vpack.i.bf16 %v1371_v57, %v1370_v28  ;;  %v1395_v49 = vpack.c.bf16 %v1371_v57, %v1370_v28 }
 0x351   : > { %v9865_v31 = vpack.i.bf16 %v1369_v24, %v1368_v2  ;;  %v1394_v8 = vpack.c.bf16 %v1369_v24, %v1368_v2  ;;  %v8073_v34 = vpop.f32.mrb[16].mxu1 }
 0x352   : > { %v1302_v17 = vadd.f32 %v8073_v34, %v9829_v59  ;;  %v1293_v42 = vpop.f32.mrb[17].mxu1 }
 0x353   : > { %v1294_v29 = vadd.f32 %v9829_v59, %v1293_v42  ;;  %v8074_v32 = vpop.f32.mrb[18].mxu1  ;;  %8107 = vmatprep.mubr.msk.bf16.mxu0 %vm1443_vm4, %v1394_v8 }
 0x354   : > { %v1374_v23 = vmax.f32 %v1302_v17, 0.0  ;;  %v1305_v37 = vadd.f32 %v8074_v32, %v9829_v59  ;;  %v1296_v46 = vpop.f32.mrb[19].mxu1  ;;  %8108 = vmatmul.mubr.msk.bf16.gmra.mrb[44].mxu0 %vm1443_vm4, %v1395_v49 }
 0x355   : > { %v1372_v38 = vmax.f32 %v1294_v29, 0.0  ;;  %v1297_v28 = vadd.f32 %v9829_v59, %v1296_v46 }
 0x356   : > { %v1375_v61 = vmax.f32 %v1305_v37, 0.0 }
 0x357   : > { %v1373_v2 = vmax.f32 %v1297_v28, 0.0 }
 0x358   : > { %v9873_v57 = vpack.i.bf16 %v1375_v61, %v1374_v23  ;;  %v1397_v34 = vpack.c.bf16 %v1375_v61, %v1374_v23 }
 0x359   : > { %v9875_v24 = vpack.i.bf16 %v1373_v2, %v1372_v38  ;;  %v1396_v42 = vpack.c.bf16 %v1373_v2, %v1372_v38  ;;  %v8077_v35 = vpop.f32.mrb[20].mxu1 }
 0x35a   : > { %v1318_v8 = vadd.f32 %v8077_v35, %v9829_v59  ;;  %v1309_v17 = vpop.f32.mrb[21].mxu1 }
 0x35b   : > { %v1310_v32 = vadd.f32 %v9829_v59, %v1309_v17  ;;  %v8078_v15 = vpop.f32.mrb[22].mxu1  ;;  %8111 = vmatprep.mubr.msk.bf16.mxu0 %vm1443_vm4, %v1396_v42 }
 0x35c   : > { %v1378_v49 = vmax.f32 %v1318_v8, 0.0  ;;  %v1321_v29 = vadd.f32 %v8078_v15, %v9829_v59  ;;  %v1312_v37 = vpop.f32.mrb[23].mxu1  ;;  %8112 = vmatmul.mubr.msk.bf16.gmra.mrb[48].mxu0 %vm1443_vm4, %v1397_v34 }
 0x35d   : > { %v1376_v46 = vmax.f32 %v1310_v32, 0.0  ;;  %v1313_v23 = vadd.f32 %v9829_v59, %v1312_v37 }
 0x35e   : > { %v1379_v28 = vmax.f32 %v1321_v29, 0.0 }
 0x35f   : > { %v1377_v38 = vmax.f32 %v1313_v23, 0.0 }
 0x360   : > { %v9883_v61 = vpack.i.bf16 %v1379_v28, %v1378_v49  ;;  %v1399_v35 = vpack.c.bf16 %v1379_v28, %v1378_v49 }
 0x361   : > { %v9885_v2 = vpack.i.bf16 %v1377_v38, %v1376_v46  ;;  %v1398_v17 = vpack.c.bf16 %v1377_v38, %v1376_v46  ;;  %v8081_v20 = vpop.f32.mrb[24].mxu1 }
 0x362   : > { %v1334_v42 = vadd.f32 %v8081_v20, %v9829_v59  ;;  %v1325_v8 = vpop.f32.mrb[25].mxu1 }
 0x363   : > { %v1326_v15 = vadd.f32 %v9829_v59, %v1325_v8  ;;  %v8082_v18 = vpop.f32.mrb[26].mxu1  ;;  %8115 = vmatprep.mubr.msk.bf16.mxu0 %vm1443_vm4, %v1398_v17 }
 0x364   : > { %v1382_v34 = vmax.f32 %v1334_v42, 0.0  ;;  %v1337_v32 = vadd.f32 %v8082_v18, %v9829_v59  ;;  %v1328_v29 = vpop.f32.mrb[27].mxu1  ;;  %8116 = vmatmul.mubr.msk.bf16.gmra.mrb[52].mxu0 %vm1443_vm4, %v1399_v35 }
 0x365   : > { %v1380_v37 = vmax.f32 %v1326_v15, 0.0  ;;  %v1329_v49 = vadd.f32 %v9829_v59, %v1328_v29 }
 0x366   : > { %v1383_v23 = vmax.f32 %v1337_v32, 0.0 }
 0x367   : > { %v1381_v46 = vmax.f32 %v1329_v49, 0.0 }
 0x368   : > { %v9893_v28 = vpack.i.bf16 %v1383_v23, %v1382_v34  ;;  %v1401_v20 = vpack.c.bf16 %v1383_v23, %v1382_v34 }
 0x369   : > { %v9895_v38 = vpack.i.bf16 %v1381_v46, %v1380_v37  ;;  %v1400_v8 = vpack.c.bf16 %v1381_v46, %v1380_v37  ;;  %v8085_v21 = vpop.f32.mrb[28].mxu1 }
 0x36a   : > { %v1350_v17 = vadd.f32 %v8085_v21, %v9829_v59  ;;  %v1341_v42 = vpop.f32.mrb[29].mxu1 }
 0x36b   : > { %v1342_v18 = vadd.f32 %v9829_v59, %v1341_v42  ;;  %v8086_v7 = vpop.f32.mrb[30].mxu1  ;;  %8119 = vmatprep.mubr.msk.bf16.mxu0 %vm1443_vm4, %v1400_v8  ;;  %v2070_v8 = vld [vmem:[#allocation10] sm:$0xff] }
 0x36c   : > { %v1386_v35 = vmax.f32 %v1350_v17, 0.0  ;;  %v1353_v15 = vadd.f32 %v8086_v7, %v9829_v59  ;;  %v1344_v32 = vpop.f32.mrb[31].mxu1  ;;  %8120 = vmatmul.mubr.msk.bf16.gmra.mrb[56].mxu0 %vm1443_vm4, %v1401_v20  ;;  %v2074_v7 = vld [vmem:[#allocation10 + $0x20] sm:$0xff]  ;;  %v2071_v17 = vld [vmem:[#allocation10 + $0x8] sm:$0xff] }
 0x36d   : > { %v1384_v29 = vmax.f32 %v1342_v18, 0.0  ;;  %v1345_v34 = vadd.f32 %v9829_v59, %v1344_v32  ;;  %v7227_v4 = vcombine.low %v2070_v8, %v2074_v7  ;;  %v7228_v20 = vcombine.high %v2070_v8, %v2074_v7  ;;  %v2075_v18 = vld [vmem:[#allocation10 + $0x28] sm:$0xff]  ;;  %v2082_v32 = vld [vmem:[#allocation10 + $0x60] sm:$0xff] }
 0x36e   : > { %v1387_v49 = vmax.f32 %v1353_v15, 0.0  ;;  %v7229_v5 = vcombine.low %v2071_v17, %v2075_v18  ;;  %v7230_v59 = vcombine.high %v2071_v17, %v2075_v18  ;;  %v2078_v15 = vld [vmem:[#allocation10 + $0x40] sm:$0xff]  ;;  %v2087_v8 = vld [vmem:[#allocation10 + $0x88] sm:$0xff] }
 0x36f   : > { %v1385_v37 = vmax.f32 %v1345_v34, 0.0  ;;  %2880 = vmatprep.subr.bf16.mxu1 %v7228_v20  ;;  %v2079_v34 = vld [vmem:[#allocation10 + $0x48] sm:$0xff]  ;;  %v2094_v18 = vld [vmem:[#allocation10 + $0xc0] sm:$0xff] }
 0x370   : > { %v9903_v23 = vpack.i.bf16 %v1387_v49, %v1386_v35  ;;  %v1403_v21 = vpack.c.bf16 %v1387_v49, %v1386_v35  ;;  %2881 = vmatpush1.bf16.msra.mxu1 %v7227_v4  ;;  %3073 = vmatprep.subr.bf16.mxu0 %v7230_v59  ;;  %v7235_v35 = vcombine.low %v2078_v15, %v2082_v32  ;;  %v2083_v49 = vld [vmem:[#allocation10 + $0x68] sm:$0xff] }
 0x371   : > { %v9905_v46 = vpack.i.bf16 %v1385_v37, %v1384_v29  ;;  %v1402_v42 = vpack.c.bf16 %v1385_v37, %v1384_v29  ;;  %v7236_v29 = vcombine.high %v2078_v15, %v2082_v32  ;;  %3074 = vmatpush1.bf16.msra.mxu0 %v7229_v5  ;;  %v7237_v37 = vcombine.low %v2079_v34, %v2083_v49  ;;  %v2091_v20 = vld [vmem:[#allocation10 + $0xa8] sm:$0xff] }
 0x372   : > { %v7245_v4 = vcombine.low %v2087_v8, %v2091_v20  ;;  %v7246_v59 = vcombine.high %v2087_v8, %v2091_v20  ;;  %v7252_v56 = vcombine.high %v2094_v18, %v2098_v45  ;;  %v2095_v15 = vld [vmem:[#allocation10 + $0xc8] sm:$0xff]  ;;  %v2114_v8 = vld [vmem:[#allocation10 + $0x160] sm:$0xff] }
 0x373   : > { %8123 = vmatprep.mubr.msk.bf16.mxu0 %vm1443_vm4, %v1402_v42  ;;  %2882 = vmatprep.subr.bf16.mxu1 %v7236_v29  ;;  %v2086_v42 = vld [vmem:[#allocation10 + $0x80] sm:$0xff]  ;;  %v2099_v32 = vld [vmem:[#allocation10 + $0xe8] sm:$0xff] }
 0x374   : > { %8124 = vmatmul.mubr.msk.bf16.gmra.mrb[60].mxu0 %vm1443_vm4, %v1403_v21  ;;  %v7238_v21 = vcombine.high %v2079_v34, %v2083_v49  ;;  %2883 = vmatpush1.bf16.msra.mxu1 %v7235_v35  ;;  %v7243_v7 = vcombine.low %v2086_v42, %v2090_v6  ;;  %v7244_v17 = vcombine.high %v2086_v42, %v2090_v6  ;;  %v2102_v34 = vld [vmem:[#allocation10 + $0x100] sm:$0xff]  ;;  %v2103_v49 = vld [vmem:[#allocation10 + $0x108] sm:$0xff] }
 0x375   : > { %v7254_v5 = vcombine.high %v2095_v15, %v2099_v32  ;;  %v2106_v29 = vld [vmem:[#allocation10 + $0x120] sm:$0xff]  ;;  %v7251_v35 = vcombine.low %v2094_v18, %v2098_v45  ;;  %v7253_v6 = vcombine.low %v2095_v15, %v2099_v32  ;;  %v2111_v20 = vld [vmem:[#allocation10 + $0x148] sm:$0xff] }
 0x376   : > { %3075 = vmatprep.subr.bf16.mxu0 %v7238_v21  ;;  %2884 = vmatprep.subr.bf16.mxu1 %v7244_v17  ;;  %v2107_v21 = vld [vmem:[#allocation10 + $0x128] sm:$0xff]  ;;  %v7260_v42 = vcombine.high %v2102_v34, %v2106_v29  ;;  %v7259_v17 = vcombine.low %v2102_v34, %v2106_v29  ;;  %v7270_v60 = vcombine.high %v2111_v20, %v2115_v40  ;;  %v2122_v45 = vld [vmem:[#allocation10 + $0x1a0] sm:$0xff] }
 0x377   : > { %3076 = vmatpush1.bf16.msra.mxu0 %v7237_v37  ;;  %v7262_v37 = vcombine.high %v2103_v49, %v2107_v21  ;;  %v7261_v50 = vcombine.low %v2103_v49, %v2107_v21  ;;  %v2119_v18 = vld [vmem:[#allocation10 + $0x188] sm:$0xff]  ;;  %v7269_v15 = vcombine.low %v2111_v20, %v2115_v40  ;;  %v2130_v34 = vld [vmem:[#allocation10 + $0x1e0] sm:$0xff] }
 0x378   : > { %3077 = vmatprep.subr.bf16.mxu0 %v7246_v59  ;;  %2885 = vmatpush1.bf16.msra.mxu1 %v7243_v7  ;;  %v7268_v59 = vcombine.high %v2110_v54, %v2114_v8  ;;  %v2118_v7 = vld [vmem:[#allocation10 + $0x180] sm:$0xff]  ;;  %v2127_v29 = vld [vmem:[#allocation10 + $0x1c8] sm:$0xff] }
 0x379   : > { %2886 = vmatprep.subr.bf16.mxu1 %v7252_v56  ;;  %v2123_v56 = vld [vmem:[#allocation10 + $0x1a8] sm:$0xff]  ;;  %v7276_v32 = vcombine.high %v2118_v7, %v2122_v45  ;;  %v7275_v49 = vcombine.low %v2118_v7, %v2122_v45  ;;  %v2146_v7 = vld [vmem:[#allocation10 + $0x260] sm:$0xff] }
 0x37a   : > { %v7277_v21 = vcombine.low %v2119_v18, %v2123_v56  ;;  %v2143_v45 = vld [vmem:[#allocation10 + $0x248] sm:$0xff] }
 0x37b   : > { %3078 = vmatpush1.bf16.msra.mxu0 %v7245_v4  ;;  %v7267_v4 = vcombine.low %v2110_v54, %v2114_v8  ;;  %v2138_v54 = vld [vmem:[#allocation10 + $0x220] sm:$0xff]  ;;  %v2139_v8 = vld [vmem:[#allocation10 + $0x228] sm:$0xff] }
 0x37c   : > { %3079 = vmatprep.subr.bf16.mxu0 %v7254_v5  ;;  %2887 = vmatpush1.bf16.msra.mxu1 %v7251_v35  ;;  %v7278_v5 = vcombine.high %v2119_v18, %v2123_v56  ;;  %v2126_v35 = vld [vmem:[#allocation10 + $0x1c0] sm:$0xff] }
 0x37d   : > { %2888 = vmatprep.subr.bf16.mxu1 %v7260_v42  ;;  %v7284_v42 = vcombine.high %v2126_v35, %v2130_v34  ;;  %v7283_v40 = vcombine.low %v2126_v35, %v2130_v34  ;;  %v2154_v35 = vld [vmem:[#allocation10 + $0x2a0] sm:$0xff]  ;;  %v2151_v34 = vld [vmem:[#allocation10 + $0x288] sm:$0xff] }
 0x37f   : > { %3080 = vmatpush1.bf16.msra.mxu0 %v7253_v6  ;;  %v2131_v6 = vld [vmem:[#allocation10 + $0x1e8] sm:$0xff] }
 0x380   : > { %3081 = vmatprep.subr.bf16.mxu0 %v7262_v37  ;;  %2889 = vmatpush1.bf16.msra.mxu1 %v7259_v17  ;;  %v7286_v37 = vcombine.high %v2127_v29, %v2131_v6  ;;  %v2134_v17 = vld [vmem:[#allocation10 + $0x200] sm:$0xff] }
 0x381   : > { %2890 = vmatprep.subr.bf16.mxu1 %v7268_v59  ;;  %v7292_v20 = vcombine.high %v2134_v17, %v2138_v54  ;;  %v7291_v18 = vcombine.low %v2134_v17, %v2138_v54  ;;  %v2162_v17 = vld [vmem:[#allocation10 + $0x2e0] sm:$0xff]  ;;  %v2159_v54 = vld [vmem:[#allocation10 + $0x2c8] sm:$0xff] }
 0x383   : > { %3082 = vmatpush1.bf16.msra.mxu0 %v7261_v50  ;;  %v2135_v50 = vld [vmem:[#allocation10 + $0x208] sm:$0xff] }
 0x384   : > { %3083 = vmatprep.subr.bf16.mxu0 %v7270_v60  ;;  %2891 = vmatpush1.bf16.msra.mxu1 %v7267_v4  ;;  %v7285_v60 = vcombine.low %v2127_v29, %v2131_v6  ;;  %v7294_v59 = vcombine.high %v2135_v50, %v2139_v8  ;;  %v2142_v4 = vld [vmem:[#allocation10 + $0x240] sm:$0xff]  ;;  %v7293_v56 = vcombine.low %v2135_v50, %v2139_v8 }
 0x385   : > { %2892 = vmatprep.subr.bf16.mxu1 %v7276_v32  ;;  %v7300_v32 = vcombine.high %v2142_v4, %v2146_v7  ;;  %v7299_v29 = vcombine.low %v2142_v4, %v2146_v7  ;;  %v2170_v4 = vld [vmem:[#allocation10 + $0x320] sm:$0xff]  ;;  %v2167_v7 = vld [vmem:[#allocation10 + $0x308] sm:$0xff] }
 0x387   : > { %3084 = vmatpush1.bf16.msra.mxu0 %v7269_v15  ;;  %v2147_v15 = vld [vmem:[#allocation10 + $0x268] sm:$0xff] }
 0x388   : > { %3085 = vmatprep.subr.bf16.mxu0 %v7278_v5  ;;  %2893 = vmatpush1.bf16.msra.mxu1 %v7275_v49  ;;  %v7302_v5 = vcombine.high %v2143_v45, %v2147_v15  ;;  %v2150_v49 = vld [vmem:[#allocation10 + $0x280] sm:$0xff]  ;;  %v7301_v6 = vcombine.low %v2143_v45, %v2147_v15 }
 0x389   : > { %2894 = vmatprep.subr.bf16.mxu1 %v7284_v42  ;;  %v7308_v42 = vcombine.high %v2150_v49, %v2154_v35  ;;  %v7307_v50 = vcombine.low %v2150_v49, %v2154_v35  ;;  %v2178_v49 = vld [vmem:[#allocation10 + $0x360] sm:$0xff]  ;;  %v2175_v35 = vld [vmem:[#allocation10 + $0x348] sm:$0xff] }
 0x38b   : > { %3086 = vmatpush1.bf16.msra.mxu0 %v7277_v21  ;;  %v2155_v21 = vld [vmem:[#allocation10 + $0x2a8] sm:$0xff] }
 0x38c   : > { %3087 = vmatprep.subr.bf16.mxu0 %v7286_v37  ;;  %2895 = vmatpush1.bf16.msra.mxu1 %v7283_v40  ;;  %v7310_v37 = vcombine.high %v2151_v34, %v2155_v21  ;;  %v2158_v40 = vld [vmem:[#allocation10 + $0x2c0] sm:$0xff]  ;;  %v7309_v8 = vcombine.low %v2151_v34, %v2155_v21 }
 0x38d   : > { %2896 = vmatprep.subr.bf16.mxu1 %v7292_v20  ;;  %v7316_v20 = vcombine.high %v2158_v40, %v2162_v17  ;;  %v7315_v45 = vcombine.low %v2158_v40, %v2162_v17  ;;  %v2186_v40 = vld [vmem:[#allocation10 + $0x3a0] sm:$0xff]  ;;  %v2183_v17 = vld [vmem:[#allocation10 + $0x388] sm:$0xff] }
 0x38f   : > { %3088 = vmatpush1.bf16.msra.mxu0 %v7285_v60  ;;  %v2163_v60 = vld [vmem:[#allocation10 + $0x2e8] sm:$0xff] }
 0x390   : > { %3089 = vmatprep.subr.bf16.mxu0 %v7294_v59  ;;  %2897 = vmatpush1.bf16.msra.mxu1 %v7291_v18  ;;  %v7318_v59 = vcombine.high %v2159_v54, %v2163_v60  ;;  %v2166_v18 = vld [vmem:[#allocation10 + $0x300] sm:$0xff]  ;;  %v7317_v15 = vcombine.low %v2159_v54, %v2163_v60 }
 0x391   : > { %2898 = vmatprep.subr.bf16.mxu1 %v7300_v32  ;;  %v7324_v32 = vcombine.high %v2166_v18, %v2170_v4  ;;  %v7323_v34 = vcombine.low %v2166_v18, %v2170_v4 }
 0x393   : > { %3090 = vmatpush1.bf16.msra.mxu0 %v7293_v56  ;;  %v2171_v56 = vld [vmem:[#allocation10 + $0x328] sm:$0xff] }
 0x394   : > { %3091 = vmatprep.subr.bf16.mxu0 %v7302_v5  ;;  %2899 = vmatpush1.bf16.msra.mxu1 %v7299_v29  ;;  %v7326_v5 = vcombine.high %v2167_v7, %v2171_v56  ;;  %v2174_v29 = vld [vmem:[#allocation10 + $0x340] sm:$0xff]  ;;  %v7325_v21 = vcombine.low %v2167_v7, %v2171_v56 }
 0x395   : > { %2900 = vmatprep.subr.bf16.mxu1 %v7308_v42  ;;  %v7332_v42 = vcombine.high %v2174_v29, %v2178_v49  ;;  %v7331_v54 = vcombine.low %v2174_v29, %v2178_v49  ;;  %v2190_v7 = vld [vmem:[#allocation10 + $0x3c0] sm:$0xff] }
 0x396   : > { %v2194_v56 = vld [vmem:[#allocation10 + $0x3e0] sm:$0xff] }
 0x397   : > { %3092 = vmatpush1.bf16.msra.mxu0 %v7301_v6  ;;  %v2179_v6 = vld [vmem:[#allocation10 + $0x368] sm:$0xff] }
 0x398   : > { %3093 = vmatprep.subr.bf16.mxu0 %v7310_v37  ;;  %2901 = vmatpush1.bf16.msra.mxu1 %v7307_v50  ;;  %v7334_v37 = vcombine.high %v2175_v35, %v2179_v6  ;;  %v2182_v50 = vld [vmem:[#allocation10 + $0x380] sm:$0xff]  ;;  %v7333_v60 = vcombine.low %v2175_v35, %v2179_v6  ;;  %v9909_v35 = vld [vmem:[#allocation9] ss:$0 sm:$0xff] }
 0x399   : > { %2902 = vmatprep.subr.bf16.mxu1 %v7316_v20  ;;  %v7340_v20 = vcombine.high %v2182_v50, %v2186_v40  ;;  %v7339_v18 = vcombine.low %v2182_v50, %v2186_v40 }
 0x39b   : > { %3094 = vmatpush1.bf16.msra.mxu0 %v7309_v8  ;;  %v2187_v8 = vld [vmem:[#allocation10 + $0x3a8] sm:$0xff] }
 0x39c   : > { %3095 = vmatprep.subr.bf16.mxu0 %v7318_v59  ;;  %2903 = vmatpush1.bf16.msra.mxu1 %v7315_v45  ;;  %v7342_v59 = vcombine.high %v2183_v17, %v2187_v8  ;;  %v7341_v4 = vcombine.low %v2183_v17, %v2187_v8  ;;  %v2191_v45 = vld [vmem:[#allocation10 + $0x3c8] sm:$0xff]  ;;  %v9914_v17 = vld [vmem:[#allocation10 + $0x10] sm:$0xff] }
 0x39d   : > { %2904 = vmatprep.subr.bf16.mxu1 %v7324_v32  ;;  %v2195_v32 = vld [vmem:[#allocation10 + $0x3e8] sm:$0xff]  ;;  %v9916_v8 = vld [vmem:[#allocation10 + $0x30] sm:$0xff] }
 0x39e   : > { %v7349_v29 = vcombine.low %v2191_v45, %v2195_v32  ;;  %v7350_v49 = vcombine.high %v2191_v45, %v2195_v32 }
 0x39f   : > { %3096 = vmatpush1.bf16.msra.mxu0 %v7317_v15  ;;  %v7348_v15 = vcombine.high %v2190_v7, %v2194_v56 }
 0x3a0   : > { %3097 = vmatprep.subr.bf16.mxu0 %v7326_v5  ;;  %2905 = vmatpush1.bf16.msra.mxu1 %v7323_v34  ;;  %v7347_v5 = vcombine.low %v2190_v7, %v2194_v56 }
 0x3a1   : > { %2906 = vmatprep.subr.bf16.mxu1 %v7332_v42 }
 0x3a3   : > { %3098 = vmatpush1.bf16.msra.mxu0 %v7325_v21 }
 0x3a4   : > { %3099 = vmatprep.subr.bf16.mxu0 %v7334_v37  ;;  %2907 = vmatpush1.bf16.msra.mxu1 %v7331_v54 }
 0x3a5   : > { %2908 = vmatprep.subr.bf16.mxu1 %v7340_v20  ;;  %v7232_v20 = vcombine.high %v9914_v17, %v9916_v8 }
 0x3a7   : > { %3100 = vmatpush1.bf16.msra.mxu0 %v7333_v60  ;;  %v7231_v60 = vcombine.low %v9914_v17, %v9916_v8 }
 0x3a8   : > { %3101 = vmatprep.subr.bf16.mxu0 %v7342_v59  ;;  %2909 = vmatpush1.bf16.msra.mxu1 %v7339_v18  ;;  %v9923_v59 = vld [vmem:[#allocation10 + $0x18] sm:$0xff] }
 0x3a9   : > { %2910 = vmatprep.subr.bf16.mxu1 %v7348_v15  ;;  %v9925_v18 = vld [vmem:[#allocation10 + $0x38] sm:$0xff] }
 0x3aa   : > { %v7233_v56 = vcombine.low %v9923_v59, %v9925_v18  ;;  %v7234_v45 = vcombine.high %v9923_v59, %v9925_v18 }
 0x3ab   : > { %3102 = vmatpush1.bf16.msra.mxu0 %v7341_v4 }
 0x3ac   : > { %2911 = vmatpush1.bf16.msra.mxu1 %v7347_v5  ;;  %3103 = vmatprep.subr.bf16.mxu0 %v7350_v49 }
 0x3ad   : > { %3266 = vmatprep.subr.bf16.mxu1 %v7232_v20 }
 0x3af   : > { %3104 = vmatpush1.bf16.msra.mxu0 %v7349_v29 }
 0x3b0   : > { %3459 = vmatprep.subr.bf16.mxu0 %v7234_v45 }
 0x40f   : > { %v8097_v6 = vpop.f32.mrb[32].mxu0 }
 0x410   : > { %v1535_v34 = vadd.f32 %v8097_v6, %v9909_v35  ;;  %v1526_v21 = vpop.f32.mrb[33].mxu0 }
 0x411   : > { %v1527_v42 = vadd.f32 %v9909_v35, %v1526_v21  ;;  %v8098_v37 = vpop.f32.mrb[34].mxu0 }
 0x412   : > { %v1538_v50 = vadd.f32 %v8098_v37, %v9909_v35  ;;  %v1529_v40 = vpop.f32.mrb[35].mxu0  ;;  %v1655_v4 = vmax.f32 %v1535_v34, 0.0 }
 0x413   : > { %v1530_v54 = vadd.f32 %v9909_v35, %v1529_v40  ;;  %v1653_v15 = vmax.f32 %v1527_v42, 0.0 }
 0x414   : > { %v1656_v7 = vmax.f32 %v1538_v50, 0.0 }
 0x415   : > { %v1654_v32 = vmax.f32 %v1530_v54, 0.0 }
 0x416   : > { %v8295_v5 = vpack.i.bf16 %v1656_v7, %v1655_v4 }
 0x417   : > { %v8285_v29 = vpack.i.bf16 %v1654_v32, %v1653_v15  ;;  %v8101_v49 = vpop.f32.mrb[36].mxu0 }
 0x418   : > { %v1551_v6 = vadd.f32 %v8101_v49, %v9909_v35  ;;  %8296 = vrot.lane.b32.xlu1 %v8295_v5, %s9118_s25  ;;  %v1542_v34 = vpop.f32.mrb[37].mxu0 }
 0x419   : > { %v1543_v21 = vadd.f32 %v9909_v35, %v1542_v34  ;;  %v8102_v37 = vpop.f32.mrb[38].mxu0  ;;  %8286 = vrot.lane.b32.xlu0 %v8285_v29, %s9118_s25 }
 0x41a   : > { %v1554_v50 = vadd.f32 %v8102_v37, %v9909_v35  ;;  %v1545_v42 = vpop.f32.mrb[39].mxu0  ;;  %v1659_v54 = vmax.f32 %v1551_v6, 0.0 }
 0x41b   : > { %v1546_v40 = vadd.f32 %v9909_v35, %v1545_v42  ;;  %v1657_v4 = vmax.f32 %v1543_v21, 0.0 }
 0x41c   : > { %v1660_v20 = vmax.f32 %v1554_v50, 0.0 }
 0x41d   : > { %v1658_v7 = vmax.f32 %v1546_v40, 0.0  ;;  %8301 = vrot.lane.b32.xlu0 %v9845_v9, %s9117_s26 }
 0x41e   : > { %v8315_v45 = vpack.i.bf16 %v1660_v20, %v1659_v54 }
 0x41f   : > { %v8305_v15 = vpack.i.bf16 %v1658_v7, %v1657_v4  ;;  %v8105_v32 = vpop.f32.mrb[40].mxu0 }
 0x420   : > { %v1567_v5 = vadd.f32 %v8105_v32, %v9909_v35  ;;  %v1558_v49 = vpop.f32.mrb[41].mxu0 }
 0x421   : > { %v1559_v29 = vadd.f32 %v9909_v35, %v1558_v49  ;;  %v8106_v34 = vpop.f32.mrb[42].mxu0  ;;  %8306 = vrot.lane.b32.xlu1 %v8305_v15, %s9118_s25  ;;  %8311 = vrot.lane.b32.xlu0 %v9843_v51, %s9117_s26 }
 0x422   : > { %v1663_v6 = vmax.f32 %v1567_v5, 0.0  ;;  %v1570_v21 = vadd.f32 %v8106_v34, %v9909_v35  ;;  %v1561_v37 = vpop.f32.mrb[43].mxu0 }
 0x423   : > { %v1661_v50 = vmax.f32 %v1559_v29, 0.0  ;;  %v1562_v9 = vadd.f32 %v9909_v35, %v1561_v37 }
 0x424   : > { %v1664_v42 = vmax.f32 %v1570_v21, 0.0 }
 0x425   : > { %v1662_v40 = vmax.f32 %v1562_v9, 0.0  ;;  %8316 = vrot.lane.b32.xlu1 %v8315_v45, %s9118_s25  ;;  %8321 = vrot.lane.b32.xlu0 %v9855_v48, %s9117_s26 }
 0x426   : > { %v8335_v54 = vpack.i.bf16 %v1664_v42, %v1663_v6 }
 0x427   : > { %v8325_v20 = vpack.i.bf16 %v1662_v40, %v1661_v50  ;;  %v8109_v4 = vpop.f32.mrb[44].mxu0 }
 0x428   : > { %v1583_v7 = vadd.f32 %v8109_v4, %v9909_v35  ;;  %v1574_v51 = vpop.f32.mrb[45].mxu0 }
 0x429   : > { %v1575_v15 = vadd.f32 %v9909_v35, %v1574_v51  ;;  %v8110_v32 = vpop.f32.mrb[46].mxu0  ;;  %8326 = vrot.lane.b32.xlu1 %v8325_v20, %s9118_s25  ;;  %8331 = vrot.lane.b32.xlu0 %v9853_v10, %s9117_s26 }
 0x42a   : > { %v1667_v5 = vmax.f32 %v1583_v7, 0.0  ;;  %v1586_v45 = vadd.f32 %v8110_v32, %v9909_v35  ;;  %v1577_v49 = vpop.f32.mrb[47].mxu0 }
 0x42b   : > { %v1665_v29 = vmax.f32 %v1575_v15, 0.0  ;;  %v1578_v48 = vadd.f32 %v9909_v35, %v1577_v49 }
 0x42c   : > { %v1668_v34 = vmax.f32 %v1586_v45, 0.0 }
 0x42d   : > { %v1666_v6 = vmax.f32 %v1578_v48, 0.0  ;;  %8336 = vrot.lane.b32.xlu1 %v8335_v54, %s9118_s25  ;;  %8341 = vrot.lane.b32.xlu0 %v9865_v31, %s9117_s26 }
 0x42e   : > { %v8355_v21 = vpack.i.bf16 %v1668_v34, %v1667_v5 }
 0x42f   : > { %v8345_v37 = vpack.i.bf16 %v1666_v6, %v1665_v29  ;;  %v8113_v50 = vpop.f32.mrb[48].mxu0 }
 0x430   : > { %v1599_v9 = vadd.f32 %v8113_v50, %v9909_v35  ;;  %v1590_v10 = vpop.f32.mrb[49].mxu0 }
 0x431   : > { %v1591_v42 = vadd.f32 %v9909_v35, %v1590_v10  ;;  %v8114_v40 = vpop.f32.mrb[50].mxu0  ;;  %8346 = vrot.lane.b32.xlu1 %v8345_v37, %s9118_s25  ;;  %8351 = vrot.lane.b32.xlu0 %v9863_v43, %s9117_s26 }
 0x432   : > { %v1671_v20 = vmax.f32 %v1599_v9, 0.0  ;;  %v1602_v54 = vadd.f32 %v8114_v40, %v9909_v35  ;;  %v1593_v4 = vpop.f32.mrb[51].mxu0 }
 0x433   : > { %v1669_v7 = vmax.f32 %v1591_v42, 0.0  ;;  %v1594_v31 = vadd.f32 %v9909_v35, %v1593_v4 }
 0x434   : > { %v1672_v51 = vmax.f32 %v1602_v54, 0.0 }
 0x435   : > { %v1670_v15 = vmax.f32 %v1594_v31, 0.0  ;;  %8356 = vrot.lane.b32.xlu1 %v8355_v21, %s9118_s25  ;;  %8361 = vrot.lane.b32.xlu0 %v9875_v24, %s9117_s26 }
 0x436   : > { %v8375_v32 = vpack.i.bf16 %v1672_v51, %v1671_v20 }
 0x437   : > { %v8365_v5 = vpack.i.bf16 %v1670_v15, %v1669_v7  ;;  %v8117_v45 = vpop.f32.mrb[52].mxu0 }
 0x438   : > { %v1615_v49 = vadd.f32 %v8117_v45, %v9909_v35  ;;  %v1606_v43 = vpop.f32.mrb[53].mxu0 }
 0x439   : > { %v1607_v29 = vadd.f32 %v9909_v35, %v1606_v43  ;;  %v8118_v48 = vpop.f32.mrb[54].mxu0  ;;  %8366 = vrot.lane.b32.xlu1 %v8365_v5, %s9118_s25  ;;  %8371 = vrot.lane.b32.xlu0 %v9873_v57, %s9117_s26 }
 0x43a   : > { %v1675_v34 = vmax.f32 %v1615_v49, 0.0  ;;  %v1618_v6 = vadd.f32 %v8118_v48, %v9909_v35  ;;  %v1609_v21 = vpop.f32.mrb[55].mxu0 }
 0x43b   : > { %v1673_v37 = vmax.f32 %v1607_v29, 0.0  ;;  %v1610_v24 = vadd.f32 %v9909_v35, %v1609_v21 }
 0x43c   : > { %v1676_v50 = vmax.f32 %v1618_v6, 0.0 }
 0x43d   : > { %v1674_v9 = vmax.f32 %v1610_v24, 0.0  ;;  %8376 = vrot.lane.b32.xlu1 %v8375_v32, %s9118_s25  ;;  %8381 = vrot.lane.b32.xlu0 %v9885_v2, %s9117_s26 }
 0x43e   : > { %v8395_v10 = vpack.i.bf16 %v1676_v50, %v1675_v34 }
 0x43f   : > { %v8385_v42 = vpack.i.bf16 %v1674_v9, %v1673_v37  ;;  %v8121_v40 = vpop.f32.mrb[56].mxu0 }
 0x440   : > { %v1631_v20 = vadd.f32 %v8121_v40, %v9909_v35  ;;  %v1622_v57 = vpop.f32.mrb[57].mxu0  ;;  %v8282_v40 = vpop.permute.xlu0 %8281 }
 0x441   : > { %v1623_v54 = vadd.f32 %v9909_v35, %v1622_v57  ;;  %v8122_v4 = vpop.f32.mrb[58].mxu0  ;;  %8386 = vrot.lane.b32.xlu1 %v8385_v42, %s9118_s25  ;;  %8391 = vrot.lane.b32.xlu0 %v9883_v61, %s9117_s26 }
 0x442   : > { %v1679_v7 = vmax.f32 %v1631_v20, 0.0  ;;  %v1634_v31 = vadd.f32 %v8122_v4, %v9909_v35  ;;  %v1625_v51 = vpop.f32.mrb[59].mxu0  ;;  %v8284_v20 = vunpack.i.h.bf16 %v8282_v40 }
 0x443   : > { %v1677_v15 = vmax.f32 %v1623_v54, 0.0  ;;  %v1626_v2 = vadd.f32 %v9909_v35, %v1625_v51 }
 0x444   : > { %v1680_v32 = vmax.f32 %v1634_v31, 0.0 }
 0x445   : > { %v1678_v5 = vmax.f32 %v1626_v2, 0.0  ;;  %8396 = vrot.lane.b32.xlu1 %v8395_v10, %s9118_s25  ;;  %8401 = vrot.lane.b32.xlu0 %v9895_v38, %s9117_s26  ;;  %v11899_v2 = vmax.f32 %v9631_v3, 0.0 }
 0x446   : > { %v8415_v45 = vpack.i.bf16 %v1680_v32, %v1679_v7 }
 0x447   : > { %v8405_v49 = vpack.i.bf16 %v1678_v5, %v1677_v15  ;;  %v8125_v43 = vpop.f32.mrb[60].mxu0  ;;  %v1942_v32 = vsel %vm1146_vm3, %v11899_v2, %v8284_v20  ;;  %v11900_v5 = vmax.f32 %v9622_v62, 0.0  ;;  %v2101_v2 = vld [vmem:[#allocation10 + $0xf8] sm:$0xff] }
 0x448   : > { %v1647_v29 = vadd.f32 %v8125_v43, %v9909_v35  ;;  %v1638_v61 = vpop.f32.mrb[61].mxu0  ;;  %v2081_v43 = vld [vmem:[#allocation10 + $0x58] sm:$0xff] }
 0x449   : > { %v1639_v48 = vadd.f32 %v9909_v35, %v1638_v61  ;;  %v8126_v34 = vpop.f32.mrb[62].mxu0  ;;  %8406 = vrot.lane.b32.xlu1 %v8405_v49, %s9118_s25  ;;  %8411 = vrot.lane.b32.xlu0 %v9893_v28, %s9117_s26  ;;  %v8292_v28 = vpop.permute.xlu1 %8291  ;;  %v2084_v49 = vld [vmem:[#allocation10 + $0x70] sm:$0xff] }
 0x44a   : > { %v1683_v6 = vmax.f32 %v1647_v29, 0.0  ;;  %v1650_v21 = vadd.f32 %v8126_v34, %v9909_v35  ;;  %v1641_v37 = vpop.f32.mrb[63].mxu0  ;;  %v8294_v15 = vunpack.i.h.bf16 %v8292_v28  ;;  %v2085_v29 = vld [vmem:[#allocation10 + $0x78] sm:$0xff]  ;;  %v8293_v61 = vunpack.i.l.bf16 %v8292_v28 }
 0x44b   : > { %v1681_v24 = vmax.f32 %v1639_v48, 0.0  ;;  %v1642_v38 = vadd.f32 %v9909_v35, %v1641_v37  ;;  %v8283_v35 = vunpack.i.l.bf16 %v8282_v40  ;;  %v2088_v37 = vld [vmem:[#allocation10 + $0x90] sm:$0xff]  ;;  %v11902_v28 = vmax.f32 %v9625_v0, 0.0 }
 0x44c   : > { %v1684_v50 = vmax.f32 %v1650_v21, 0.0  ;;  %v7241_v0 = vcombine.low %v2081_v43, %v2085_v29 }
 0x44d   : > { %v1682_v9 = vmax.f32 %v1642_v38, 0.0  ;;  %8416 = vrot.lane.b32.xlu1 %v8415_v45, %s9118_s25  ;;  %8421 = vrot.lane.b32.xlu0 %v9905_v46, %s9117_s26  ;;  %v1941_v45 = vsel %vm1146_vm3, %v11900_v5, %v8283_v35  ;;  %v2092_v38 = vld [vmem:[#allocation10 + $0xb0] sm:$0xff]  ;;  %v1943_v40 = vsel %vm1146_vm3, %v11902_v28, %v8293_v61 }
 0x44e   : > { %v8435_v10 = vpack.i.bf16 %v1684_v50, %v1683_v6  ;;  %v2089_v50 = vld [vmem:[#allocation10 + $0x98] sm:$0xff]  ;;  %v7248_v35 = vcombine.high %v2088_v37, %v2092_v38 }
 0x44f   : > { %v8425_v42 = vpack.i.bf16 %v1682_v9, %v1681_v24  ;;  %v7242_v24 = vcombine.high %v2081_v43, %v2085_v29  ;;  %v2093_v9 = vld [vmem:[#allocation10 + $0xb8] sm:$0xff] }
 0x451   : > { %8426 = vrot.lane.b32.xlu1 %v8425_v42, %s9118_s25  ;;  %8431 = vrot.lane.b32.xlu0 %v9903_v23, %s9117_s26  ;;  %v2080_v23 = vld [vmem:[#allocation10 + $0x50] sm:$0xff]  ;;  %s793_s26 = scalar_lea.vmem %s12047_s27, %s12054_s3 }
 0x452   : > { %v7240_v62 = vcombine.high %v2080_v23, %v2084_v49  ;;  %v7239_v20 = vcombine.low %v2080_v23, %v2084_v49  ;;  %v2100_v23 = vld [vmem:[#allocation10 + $0xf0] sm:$0xff] }
 0x453   : > { %v2108_v49 = vld [vmem:[#allocation10 + $0x130] sm:$0xff] }
 0x455   : > { %8436 = vrot.lane.b32.xlu1 %v8435_v10, %s9118_s25  ;;  %v11901_v10 = vmax.f32 %v9628_v1, 0.0 }
 0x457   : > { %v1944_v42 = vsel %vm1146_vm3, %v11901_v10, %v8294_v15  ;;  %v2097_v15 = vld [vmem:[#allocation10 + $0xd8] sm:$0xff] }
 0x458   : > { %v7258_v29 = vcombine.high %v2097_v15, %v2101_v2 }
 0x48a   : > { %v8297_v57 = vpop.permute.xlu1 %8296 }
 0x48b   : > { %v8287_v54 = vpop.permute.xlu0 %8286  ;;  %v8299_v4 = vunpack.i.h.bf16 %v8297_v57  ;;  %v8298_v7 = vunpack.i.l.bf16 %v8297_v57  ;;  %v7250_v57 = vcombine.high %v2089_v50, %v2093_v9 }
 0x48c   : > { %v8289_v31 = vunpack.i.h.bf16 %v8287_v54  ;;  %v8288_v46 = vunpack.i.l.bf16 %v8287_v54 }
 0x48d   : > { %v10021_v3 = vpack.c.bf16 %v8299_v4, %v8298_v7  ;;  %v1977_v17 = vsel %vm1973_vm5, %v1944_v42, %v8299_v4  ;;  %v1976_v8 = vsel %vm1973_vm5, %v1943_v40, %v8298_v7  ;;  %v7249_v7 = vcombine.low %v2089_v50, %v2093_v9  ;;  %v2112_v40 = vld [vmem:[#allocation10 + $0x150] sm:$0xff] }
 0x48e   : > { %v1975_v48 = vsel %vm1973_vm5, %v1942_v32, %v8289_v31  ;;  %v1974_v34 = vsel %vm1973_vm5, %v1941_v45, %v8288_v46  ;;  %v10017_v6 = vpack.c.bf16 %v8289_v31, %v8288_v46  ;;  %v2096_v46 = vld [vmem:[#allocation10 + $0xd0] sm:$0xff]  ;;  %v10051_v32 = vpack.c.bf16 %v1977_v17, %v1976_v8  ;;  %v2113_v17 = vld [vmem:[#allocation10 + $0x158] sm:$0xff] }
 0x48f   : > { %v10019_v21 = vpack.c.bf16 %v1975_v48, %v1974_v34  ;;  %v7256_v5 = vcombine.high %v2096_v46, %v2100_v23  ;;  %v2104_v45 = vld [vmem:[#allocation10 + $0x110] sm:$0xff]  ;;  %v7255_v61 = vcombine.low %v2096_v46, %v2100_v23  ;;  %v7257_v48 = vcombine.low %v2097_v15, %v2101_v2  ;;  %v2117_v8 = vld [vmem:[#allocation10 + $0x178] sm:$0xff] }
 0x490   : > { %7357 = vmatprep.mubr.msk.bf16.mxu1 %vm10005_vm6, %v10017_v6  ;;  %7405 = vmatprep.mubr.msk.bf16.mxu0 %vm10005_vm6, %v10017_v6  ;;  %v11903_v34 = vmax.f32 %v9659_v19, 0.0  ;;  %v2105_v19 = vld [vmem:[#allocation10 + $0x118] sm:$0xff]  ;;  %v2120_v23 = vld [vmem:[#allocation10 + $0x190] sm:$0xff]  ;;  %v7274_v2 = vcombine.high %v2113_v17, %v2117_v8 }
 0x491   : > { %2913 = vmatmul.mubr.bf16.vlgmr.msra.gmra.mrb[32].mxu1 %v10019_v21  ;;  %3106 = vmatmul.mubr.bf16.vlgmr.msra.gmra.mrb[64].mxu0 %v10019_v21  ;;  %v2124_v15 = vld [vmem:[#allocation10 + $0x1b0] sm:$0xff] }
 0x492   : > { %3267 = vmatpush1.bf16.msra.mxu1 %v7231_v60  ;;  %7360 = vmatprep.mubr.msk.bf16.mxu1 %vm10005_vm6, %v10021_v3  ;;  %v8302_v60 = vpop.permute.xlu0 %8301 }
 0x493   : > { %7408 = vmatprep.mubr.msk.bf16.mxu0 %vm10005_vm6, %v10021_v3  ;;  %v8307_v1 = vpop.permute.xlu1 %8306  ;;  %3460 = vmatpush1.bf16.msra.mxu0 %v7233_v56  ;;  %v8304_v59 = vunpack.i.h.bf16 %v8302_v60  ;;  %v8303_v18 = vunpack.i.l.bf16 %v8302_v60  ;;  %v7247_v56 = vcombine.low %v2088_v37, %v2092_v38  ;;  %v7264_v38 = vcombine.high %v2104_v45, %v2108_v49 }
 0x494   : > { %v8309_v54 = vunpack.i.h.bf16 %v8307_v1  ;;  %v8308_v31 = vunpack.i.l.bf16 %v8307_v1  ;;  %3268 = vmatprep.subr.bf16.mxu1 %v7240_v62  ;;  %3461 = vmatprep.subr.bf16.mxu0 %v7242_v24  ;;  %v11904_v62 = vmax.f32 %v9649_v13, 0.0  ;;  %v2109_v13 = vld [vmem:[#allocation10 + $0x138] sm:$0xff] }
 0x495   : > { %v1946_v37 = vsel %vm1146_vm3, %v11903_v34, %v8304_v59  ;;  %v7265_v46 = vcombine.low %v2105_v19, %v2109_v13  ;;  %v11905_v59 = vmax.f32 %v9654_v16, 0.0  ;;  %v7280_v16 = vcombine.high %v2120_v23, %v2124_v15 }
 0x496   : > { %3269 = vmatpush1.bf16.msra.mxu1 %v7239_v20  ;;  %v10053_v4 = vpack.c.bf16 %v8309_v54, %v8308_v31  ;;  %v1945_v24 = vsel %vm1146_vm3, %v11904_v62, %v8303_v18  ;;  %v1979_v9 = vsel %vm1973_vm5, %v1946_v37, %v8309_v54  ;;  %v8312_v10 = vpop.permute.xlu0 %8311  ;;  %v2116_v20 = vld [vmem:[#allocation10 + $0x170] sm:$0xff]  ;;  %v7266_v54 = vcombine.high %v2105_v19, %v2109_v13  ;;  %v2129_v19 = vld [vmem:[#allocation10 + $0x1d8] sm:$0xff] }
 0x497   : > { %3462 = vmatpush1.bf16.msra.mxu0 %v7241_v0  ;;  %3270 = vmatprep.subr.bf16.mxu1 %v7248_v35  ;;  %v8317_v43 = vpop.permute.xlu1 %8316  ;;  %v1978_v50 = vsel %vm1973_vm5, %v1945_v24, %v8308_v31  ;;  %v8314_v0 = vunpack.i.h.bf16 %v8312_v10  ;;  %v8313_v35 = vunpack.i.l.bf16 %v8312_v10  ;;  %v7272_v31 = vcombine.high %v2112_v40, %v2116_v20  ;;  %v2128_v37 = vld [vmem:[#allocation10 + $0x1d0] sm:$0xff]  ;;  %v2133_v13 = vld [vmem:[#allocation10 + $0x1f8] sm:$0xff] }
 0x498   : > { %3463 = vmatprep.subr.bf16.mxu0 %v7250_v57  ;;  %v8319_v42 = vunpack.i.h.bf16 %v8317_v43  ;;  %v8318_v28 = vunpack.i.l.bf16 %v8317_v43  ;;  %v10071_v1 = vpack.c.bf16 %v1979_v9, %v1978_v50  ;;  %v7263_v57 = vcombine.low %v2104_v45, %v2108_v49  ;;  %v2132_v62 = vld [vmem:[#allocation10 + $0x1f0] sm:$0xff] }
 0x499   : > { %2923 = vmatmul.mubr.bf16.gmra.mrb[36].mxu1 %v10051_v32  ;;  %3116 = vmatmul.mubr.bf16.gmra.mrb[68].mxu0 %v10051_v32  ;;  %v1948_v18 = vsel %vm1146_vm3, %v11905_v59, %v8314_v0  ;;  %v7271_v45 = vcombine.low %v2112_v40, %v2116_v20  ;;  %v7273_v9 = vcombine.low %v2113_v17, %v2117_v8  ;;  %v11908_v8 = vmax.f32 %v9675_v27, 0.0  ;;  %v2140_v27 = vld [vmem:[#allocation10 + $0x230] sm:$0xff] }
 0x49a   : > { %7363 = vmatprep.mubr.msk.bf16.mxu1 %vm10005_vm6, %v10053_v4  ;;  %7411 = vmatprep.mubr.msk.bf16.mxu0 %vm10005_vm6, %v10053_v4  ;;  %v10073_v60 = vpack.c.bf16 %v8319_v42, %v8318_v28  ;;  %v1981_v43 = vsel %vm1973_vm5, %v1948_v18, %v8319_v42  ;;  %v7279_v42 = vcombine.low %v2120_v23, %v2124_v15  ;;  %v2137_v18 = vld [vmem:[#allocation10 + $0x218] sm:$0xff] }
 0x49b   : > { %3271 = vmatpush1.bf16.msra.mxu1 %v7247_v56  ;;  %3464 = vmatpush1.bf16.msra.mxu0 %v7249_v7  ;;  %v11906_v56 = vmax.f32 %v9646_v11, 0.0  ;;  %v2125_v11 = vld [vmem:[#allocation10 + $0x1b8] sm:$0xff]  ;;  %v7288_v20 = vcombine.high %v2128_v37, %v2132_v62 }
 0x49c   : > { %3272 = vmatprep.subr.bf16.mxu1 %v7256_v5  ;;  %3465 = vmatprep.subr.bf16.mxu0 %v7258_v29  ;;  %v8327_v5 = vpop.permute.xlu1 %8326  ;;  %v8322_v29 = vpop.permute.xlu0 %8321 }
 0x49d   : > { %v1947_v7 = vsel %vm1146_vm3, %v11906_v56, %v8313_v35  ;;  %v8328_v34 = vunpack.i.l.bf16 %v8327_v5  ;;  %v8323_v50 = vunpack.i.l.bf16 %v8322_v29  ;;  %v7287_v35 = vcombine.low %v2128_v37, %v2132_v62  ;;  %v2141_v56 = vld [vmem:[#allocation10 + $0x238] sm:$0xff] }
 0x49e   : > { %v1980_v49 = vsel %vm1973_vm5, %v1947_v7, %v8318_v28  ;;  %v2149_v37 = vld [vmem:[#allocation10 + $0x278] sm:$0xff] }
 0x49f   : > { %3273 = vmatpush1.bf16.msra.mxu1 %v7255_v61  ;;  %3466 = vmatpush1.bf16.msra.mxu0 %v7257_v48  ;;  %v2121_v61 = vld [vmem:[#allocation10 + $0x198] sm:$0xff]  ;;  %v8329_v48 = vunpack.i.h.bf16 %v8327_v5  ;;  %v10091_v24 = vpack.c.bf16 %v1981_v43, %v1980_v49  ;;  %v7289_v49 = vcombine.low %v2129_v19, %v2133_v13  ;;  %v2144_v43 = vld [vmem:[#allocation10 + $0x250] sm:$0xff] }
 0x4a0   : > { %3274 = vmatprep.subr.bf16.mxu1 %v7264_v38  ;;  %3467 = vmatprep.subr.bf16.mxu0 %v7266_v54  ;;  %v8324_v38 = vunpack.i.h.bf16 %v8322_v29  ;;  %v7282_v28 = vcombine.high %v2121_v61, %v2125_v11  ;;  %v8337_v40 = vpop.permute.xlu1 %8336  ;;  %v7281_v0 = vcombine.low %v2121_v61, %v2125_v11  ;;  %v1949_v54 = vsel %vm1146_vm3, %v11908_v8, %v8323_v50  ;;  %v8332_v15 = vpop.permute.xlu0 %8331  ;;  %v2148_v29 = vld [vmem:[#allocation10 + $0x270] sm:$0xff]  ;;  %v2157_v8 = vld [vmem:[#allocation10 + $0x2b8] sm:$0xff] }
 0x4a1   : > { %2933 = vmatmul.mubr.bf16.gmra.mrb[40].mxu1 %v10071_v1  ;;  %3126 = vmatmul.mubr.bf16.gmra.mrb[72].mxu0 %v10071_v1  ;;  %v10093_v10 = vpack.c.bf16 %v8329_v48, %v8328_v34  ;;  %v8338_v59 = vunpack.i.l.bf16 %v8337_v40  ;;  %v8334_v5 = vunpack.i.h.bf16 %v8332_v15  ;;  %v7298_v11 = vcombine.high %v2137_v18, %v2141_v56 }
 0x4a2   : > { %7366 = vmatprep.mubr.msk.bf16.mxu1 %vm10005_vm6, %v10073_v60  ;;  %7414 = vmatprep.mubr.msk.bf16.mxu0 %vm10005_vm6, %v10073_v60  ;;  %v7304_v62 = vcombine.high %v2144_v43, %v2148_v29 }
 0x4a3   : > { %3275 = vmatpush1.bf16.msra.mxu1 %v7263_v57  ;;  %3468 = vmatpush1.bf16.msra.mxu0 %v7265_v46  ;;  %v11907_v57 = vmax.f32 %v9685_v33, 0.0  ;;  %v1982_v46 = vsel %vm1973_vm5, %v1949_v54, %v8328_v34  ;;  %v2136_v33 = vld [vmem:[#allocation10 + $0x210] sm:$0xff]  ;;  %v2145_v34 = vld [vmem:[#allocation10 + $0x258] sm:$0xff] }
 0x4a4   : > { %3276 = vmatprep.subr.bf16.mxu1 %v7272_v31  ;;  %3469 = vmatprep.subr.bf16.mxu0 %v7274_v2  ;;  %v7290_v31 = vcombine.high %v2129_v19, %v2133_v13  ;;  %v8339_v2 = vunpack.i.h.bf16 %v8337_v40  ;;  %v7296_v61 = vcombine.high %v2136_v33, %v2140_v27  ;;  %v7297_v19 = vcombine.low %v2137_v18, %v2141_v56  ;;  %v2164_v18 = vld [vmem:[#allocation10 + $0x2f0] sm:$0xff] }
 0x4a5   : > { %v1950_v17 = vsel %vm1146_vm3, %v11907_v57, %v8324_v38  ;;  %v11909_v38 = vmax.f32 %v9680_v30, 0.0  ;;  %v7306_v30 = vcombine.high %v2145_v34, %v2149_v37 }
 0x4a6   : > { %v1983_v23 = vsel %vm1973_vm5, %v1950_v17, %v8329_v48  ;;  %v7295_v48 = vcombine.low %v2136_v33, %v2140_v27  ;;  %v2153_v17 = vld [vmem:[#allocation10 + $0x298] sm:$0xff]  ;;  %v2160_v27 = vld [vmem:[#allocation10 + $0x2d0] sm:$0xff] }
 0x4a7   : > { %3277 = vmatpush1.bf16.msra.mxu1 %v7271_v45  ;;  %3470 = vmatpush1.bf16.msra.mxu0 %v7273_v9  ;;  %v10111_v7 = vpack.c.bf16 %v1983_v23, %v1982_v46  ;;  %v8333_v45 = vunpack.i.l.bf16 %v8332_v15  ;;  %v1952_v50 = vsel %vm1146_vm3, %v11909_v38, %v8334_v5  ;;  %v11910_v9 = vmax.f32 %v9672_v25, 0.0  ;;  %v2156_v25 = vld [vmem:[#allocation10 + $0x2b0] sm:$0xff] }
 0x4a8   : > { %3278 = vmatprep.subr.bf16.mxu1 %v7280_v16  ;;  %3471 = vmatprep.subr.bf16.mxu0 %v7282_v28  ;;  %v10113_v16 = vpack.c.bf16 %v8339_v2, %v8338_v59  ;;  %v8347_v28 = vpop.permute.xlu1 %8346  ;;  %v1985_v40 = vsel %vm1973_vm5, %v1952_v50, %v8339_v2  ;;  %v7303_v23 = vcombine.low %v2144_v43, %v2148_v29  ;;  %v11911_v5 = vmax.f32 %v9711_v47, 0.0  ;;  %v2172_v38 = vld [vmem:[#allocation10 + $0x330] sm:$0xff] }
 0x4a9   : > { %2943 = vmatmul.mubr.bf16.gmra.mrb[44].mxu1 %v10091_v24  ;;  %3136 = vmatmul.mubr.bf16.gmra.mrb[76].mxu0 %v10091_v24  ;;  %v8348_v57 = vunpack.i.l.bf16 %v8347_v28  ;;  %v7305_v2 = vcombine.low %v2145_v34, %v2149_v37  ;;  %v7314_v33 = vcombine.high %v2153_v17, %v2157_v8  ;;  %v7320_v47 = vcombine.high %v2160_v27, %v2164_v18  ;;  %v2161_v37 = vld [vmem:[#allocation10 + $0x2d8] sm:$0xff] }
 0x4aa   : > { %7369 = vmatprep.mubr.msk.bf16.mxu1 %vm10005_vm6, %v10093_v10  ;;  %7417 = vmatprep.mubr.msk.bf16.mxu0 %vm10005_vm6, %v10093_v10 }
 0x4ab   : > { %3279 = vmatpush1.bf16.msra.mxu1 %v7279_v42  ;;  %3472 = vmatpush1.bf16.msra.mxu0 %v7281_v0  ;;  %v1951_v42 = vsel %vm1146_vm3, %v11910_v9, %v8333_v45  ;;  %v2152_v0 = vld [vmem:[#allocation10 + $0x290] sm:$0xff] }
 0x4ac   : > { %3280 = vmatprep.subr.bf16.mxu1 %v7288_v20  ;;  %3473 = vmatprep.subr.bf16.mxu0 %v7290_v31  ;;  %v1984_v13 = vsel %vm1973_vm5, %v1951_v42, %v8338_v59  ;;  %v8342_v20 = vpop.permute.xlu0 %8341  ;;  %v7312_v59 = vcombine.high %v2152_v0, %v2156_v25  ;;  %v7311_v56 = vcombine.low %v2152_v0, %v2156_v25  ;;  %v8357_v29 = vpop.permute.xlu1 %8356 }
 0x4ad   : > { %v10131_v54 = vpack.c.bf16 %v1985_v40, %v1984_v13  ;;  %v8344_v31 = vunpack.i.h.bf16 %v8342_v20  ;;  %v8343_v46 = vunpack.i.l.bf16 %v8342_v20  ;;  %v8359_v50 = vunpack.i.h.bf16 %v8357_v29  ;;  %v2169_v40 = vld [vmem:[#allocation10 + $0x318] sm:$0xff] }
 0x4ae   : > { %v8358_v9 = vunpack.i.l.bf16 %v8357_v29  ;;  %v7319_v13 = vcombine.low %v2160_v27, %v2164_v18  ;;  %v2173_v20 = vld [vmem:[#allocation10 + $0x338] sm:$0xff] }
 0x4af   : > { %3281 = vmatpush1.bf16.msra.mxu1 %v7287_v35  ;;  %3474 = vmatpush1.bf16.msra.mxu0 %v7289_v49  ;;  %v8349_v35 = vunpack.i.h.bf16 %v8347_v28  ;;  %v1954_v45 = vsel %vm1146_vm3, %v11911_v5, %v8344_v31  ;;  %v11912_v49 = vmax.f32 %v9701_v41, 0.0  ;;  %v2165_v41 = vld [vmem:[#allocation10 + $0x2f8] sm:$0xff]  ;;  %v11913_v31 = vmax.f32 %v9706_v44, 0.0 }
 0x4b0   : > { %3282 = vmatprep.subr.bf16.mxu1 %v7296_v61  ;;  %3475 = vmatprep.subr.bf16.mxu0 %v7298_v11  ;;  %v7313_v61 = vcombine.low %v2153_v17, %v2157_v8  ;;  %v8352_v34 = vpop.permute.xlu0 %8351  ;;  %v7322_v0 = vcombine.high %v2161_v37, %v2165_v41  ;;  %v2180_v17 = vld [vmem:[#allocation10 + $0x370] sm:$0xff]  ;;  %v7330_v8 = vcombine.high %v2169_v40, %v2173_v20  ;;  %v2177_v5 = vld [vmem:[#allocation10 + $0x358] sm:$0xff] }
 0x4b1   : > { %2953 = vmatmul.mubr.bf16.gmra.mrb[48].mxu1 %v10111_v7  ;;  %3146 = vmatmul.mubr.bf16.gmra.mrb[80].mxu0 %v10111_v7  ;;  %v10133_v15 = vpack.c.bf16 %v8349_v35, %v8348_v57  ;;  %v1953_v43 = vsel %vm1146_vm3, %v11912_v49, %v8343_v46  ;;  %v8354_v28 = vunpack.i.h.bf16 %v8352_v34  ;;  %v2188_v49 = vld [vmem:[#allocation10 + $0x3b0] sm:$0xff] }
 0x4b2   : > { %7372 = vmatprep.mubr.msk.bf16.mxu1 %vm10005_vm6, %v10113_v16  ;;  %7420 = vmatprep.mubr.msk.bf16.mxu0 %vm10005_vm6, %v10113_v16  ;;  %v1986_v11 = vsel %vm1973_vm5, %v1953_v43, %v8348_v57  ;;  %v2176_v57 = vld [vmem:[#allocation10 + $0x350] sm:$0xff] }
 0x4b3   : > { %3283 = vmatpush1.bf16.msra.mxu1 %v7295_v48  ;;  %3476 = vmatpush1.bf16.msra.mxu0 %v7297_v19  ;;  %v1987_v48 = vsel %vm1973_vm5, %v1954_v45, %v8349_v35  ;;  %v8353_v19 = vunpack.i.l.bf16 %v8352_v34  ;;  %v7321_v35 = vcombine.low %v2161_v37, %v2165_v41  ;;  %v1956_v46 = vsel %vm1146_vm3, %v11913_v31, %v8354_v28  ;;  %v2184_v45 = vld [vmem:[#allocation10 + $0x390] sm:$0xff] }
 0x4b4   : > { %3284 = vmatprep.subr.bf16.mxu1 %v7304_v62  ;;  %3477 = vmatprep.subr.bf16.mxu0 %v7306_v30  ;;  %v2168_v62 = vld [vmem:[#allocation10 + $0x310] sm:$0xff]  ;;  %v10151_v42 = vpack.c.bf16 %v1987_v48, %v1986_v11  ;;  %v10153_v30 = vpack.c.bf16 %v8359_v50, %v8358_v9  ;;  %v1989_v18 = vsel %vm1973_vm5, %v1956_v46, %v8359_v50  ;;  %v2189_v50 = vld [vmem:[#allocation10 + $0x3b8] sm:$0xff] }
 0x4b5   : > { %v7328_v25 = vcombine.high %v2168_v62, %v2172_v38  ;;  %v7336_v44 = vcombine.high %v2176_v57, %v2180_v17  ;;  %v2196_v28 = vld [vmem:[#allocation10 + $0x3f0] sm:$0xff] }
 0x4b7   : > { %3285 = vmatpush1.bf16.msra.mxu1 %v7303_v23  ;;  %3478 = vmatpush1.bf16.msra.mxu0 %v7305_v2  ;;  %v11914_v23 = vmax.f32 %v9698_v39, 0.0  ;;  %v2181_v39 = vld [vmem:[#allocation10 + $0x378] sm:$0xff] }
 0x4b8   : > { %3286 = vmatprep.subr.bf16.mxu1 %v7312_v59  ;;  %3479 = vmatprep.subr.bf16.mxu0 %v7314_v33  ;;  %v8367_v59 = vpop.permute.xlu1 %8366  ;;  %v7327_v33 = vcombine.low %v2168_v62, %v2172_v38  ;;  %v7338_v41 = vcombine.high %v2177_v5, %v2181_v39  ;;  %v7344_v62 = vcombine.high %v2184_v45, %v2188_v49  ;;  %v2185_v38 = vld [vmem:[#allocation10 + $0x398] sm:$0xff] }
 0x4b9   : > { %2963 = vmatmul.mubr.bf16.gmra.mrb[52].mxu1 %v10131_v54  ;;  %3156 = vmatmul.mubr.bf16.gmra.mrb[84].mxu0 %v10131_v54  ;;  %v1955_v2 = vsel %vm1146_vm3, %v11914_v23, %v8353_v19  ;;  %v8369_v43 = vunpack.i.h.bf16 %v8367_v59  ;;  %v8368_v29 = vunpack.i.l.bf16 %v8367_v59  ;;  %v7337_v19 = vcombine.low %v2177_v5, %v2181_v39  ;;  %v2193_v23 = vld [vmem:[#allocation10 + $0x3d8] sm:$0xff] }
 0x4ba   : > { %7375 = vmatprep.mubr.msk.bf16.mxu1 %vm10005_vm6, %v10133_v15  ;;  %7423 = vmatprep.mubr.msk.bf16.mxu0 %vm10005_vm6, %v10133_v15  ;;  %v1988_v27 = vsel %vm1973_vm5, %v1955_v2, %v8358_v9  ;;  %v2192_v9 = vld [vmem:[#allocation10 + $0x3d0] sm:$0xff]  ;;  %v11917_v39 = vmax.f32 %v9732_v58, 0.0 }
 0x4bb   : > { %3287 = vmatpush1.bf16.msra.mxu1 %v7311_v56  ;;  %3480 = vmatpush1.bf16.msra.mxu0 %v7313_v61  ;;  %v8362_v56 = vpop.permute.xlu0 %8361  ;;  %v7329_v61 = vcombine.low %v2169_v40, %v2173_v20  ;;  %v10171_v11 = vpack.c.bf16 %v1989_v18, %v1988_v27  ;;  %v10173_v37 = vpack.c.bf16 %v8369_v43, %v8368_v29  ;;  %v11915_v40 = vmax.f32 %v9737_v63, 0.0  ;;  %v2197_v63 = vld [vmem:[#allocation10 + $0x3f8] sm:$0xff] }
 0x4bc   : > { %3288 = vmatprep.subr.bf16.mxu1 %v7320_v47  ;;  %3481 = vmatprep.subr.bf16.mxu0 %v7322_v0  ;;  %v8364_v48 = vunpack.i.h.bf16 %v8362_v56  ;;  %v8363_v34 = vunpack.i.l.bf16 %v8362_v56  ;;  %v7335_v47 = vcombine.low %v2176_v57, %v2180_v17  ;;  %v11916_v0 = vmax.f32 %v9727_v55, 0.0 }
 0x4bd   : > { %v7346_v57 = vcombine.high %v2185_v38, %v2189_v50  ;;  %v7352_v46 = vcombine.high %v2192_v9, %v2196_v28  ;;  %v7351_v56 = vcombine.low %v2192_v9, %v2196_v28  ;;  %v7354_v5 = vcombine.high %v2193_v23, %v2197_v63 }
 0x4be   : > { %v1958_v20 = vsel %vm1146_vm3, %v11915_v40, %v8364_v48  ;;  %v11919_v9 = vmax.f32 %v9763_v36, 0.0 }
 0x4bf   : > { %3289 = vmatpush1.bf16.msra.mxu1 %v7319_v13  ;;  %3482 = vmatpush1.bf16.msra.mxu0 %v7321_v35  ;;  %v7343_v13 = vcombine.low %v2184_v45, %v2188_v49  ;;  %v8377_v35 = vpop.permute.xlu1 %8376  ;;  %v8372_v31 = vpop.permute.xlu0 %8371  ;;  %v11918_v49 = vmax.f32 %v9724_v53, 0.0 }
 0x4c0   : > { %3290 = vmatprep.subr.bf16.mxu1 %v7328_v25  ;;  %3483 = vmatprep.subr.bf16.mxu0 %v7330_v8  ;;  %v1957_v25 = vsel %vm1146_vm3, %v11916_v0, %v8363_v34  ;;  %v1991_v8 = vsel %vm1973_vm5, %v1958_v20, %v8369_v43  ;;  %v8379_v2 = vunpack.i.h.bf16 %v8377_v35  ;;  %v8378_v59 = vunpack.i.l.bf16 %v8377_v35 }
 0x4c1   : > { %2973 = vmatmul.mubr.bf16.gmra.mrb[56].mxu1 %v10151_v42  ;;  %3166 = vmatmul.mubr.bf16.gmra.mrb[88].mxu0 %v10151_v42  ;;  %v1990_v17 = vsel %vm1973_vm5, %v1957_v25, %v8368_v29  ;;  %v8374_v27 = vunpack.i.h.bf16 %v8372_v31  ;;  %v8373_v18 = vunpack.i.l.bf16 %v8372_v31 }
 0x4c2   : > { %7378 = vmatprep.mubr.msk.bf16.mxu1 %vm10005_vm6, %v10153_v30  ;;  %7426 = vmatprep.mubr.msk.bf16.mxu0 %vm10005_vm6, %v10153_v30  ;;  %v10191_v55 = vpack.c.bf16 %v1991_v8, %v1990_v17 }
 0x4c3   : > { %3291 = vmatpush1.bf16.msra.mxu1 %v7327_v33  ;;  %3484 = vmatpush1.bf16.msra.mxu0 %v7329_v61  ;;  %v7345_v33 = vcombine.low %v2185_v38, %v2189_v50  ;;  %v1960_v45 = vsel %vm1146_vm3, %v11917_v39, %v8374_v27  ;;  %v1959_v43 = vsel %vm1146_vm3, %v11918_v49, %v8373_v18  ;;  %v8387_v29 = vpop.permute.xlu1 %8386 }
 0x4c4   : > { %3292 = vmatprep.subr.bf16.mxu1 %v7336_v44  ;;  %3485 = vmatprep.subr.bf16.mxu0 %v7338_v41  ;;  %v10193_v44 = vpack.c.bf16 %v8379_v2, %v8378_v59  ;;  %v7353_v61 = vcombine.low %v2193_v23, %v2197_v63  ;;  %v1992_v48 = vsel %vm1973_vm5, %v1959_v43, %v8378_v59  ;;  %v8389_v41 = vunpack.i.h.bf16 %v8387_v29 }
 0x4c5   : > { %v1993_v34 = vsel %vm1973_vm5, %v1960_v45, %v8379_v2  ;;  %v11922_v23 = vmax.f32 %v9750_v14, 0.0  ;;  %v11923_v14 = vmax.f32 %v9789_v12, 0.0  ;;  %v11924_v43 = vmax.f32 %v9779_v52, 0.0  ;;  %v11925_v52 = vld [vmem:[#allocation30_spill] sm:$0xff] }
 0x4c6   : > { %v10211_v38 = vpack.c.bf16 %v1993_v34, %v1992_v48  ;;  %v11926_v12 = vmax.f32 %v11925_v52, 0.0 }
 0x4c7   : > { %3293 = vmatpush1.bf16.msra.mxu1 %v7335_v47  ;;  %3486 = vmatpush1.bf16.msra.mxu0 %v7337_v19  ;;  %v8382_v47 = vpop.permute.xlu0 %8381  ;;  %v11920_v19 = vmax.f32 %v9753_v22, 0.0  ;;  %v8397_v40 = vpop.permute.xlu1 %8396  ;;  %v11921_v22 = vmax.f32 %v9758_v26, 0.0 }
 0x4c8   : > { %3294 = vmatprep.subr.bf16.mxu1 %v7344_v62  ;;  %3487 = vmatprep.subr.bf16.mxu0 %v7346_v57  ;;  %v8388_v62 = vunpack.i.l.bf16 %v8387_v29  ;;  %v8384_v58 = vunpack.i.h.bf16 %v8382_v47  ;;  %v8383_v50 = vunpack.i.l.bf16 %v8382_v47  ;;  %v8399_v35 = vunpack.i.h.bf16 %v8397_v40 }
 0x4c9   : > { %2983 = vmatmul.mubr.bf16.gmra.mrb[60].mxu1 %v10171_v11  ;;  %3176 = vmatmul.mubr.bf16.gmra.mrb[92].mxu0 %v10171_v11  ;;  %v8398_v57 = vunpack.i.l.bf16 %v8397_v40 }
 0x4ca   : > { %7381 = vmatprep.mubr.msk.bf16.mxu1 %vm10005_vm6, %v10173_v37  ;;  %7429 = vmatprep.mubr.msk.bf16.mxu0 %vm10005_vm6, %v10173_v37  ;;  %v10213_v53 = vpack.c.bf16 %v8389_v41, %v8388_v62  ;;  %v1962_v28 = vsel %vm1146_vm3, %v11919_v9, %v8384_v58 }
 0x4cb   : > { %3295 = vmatpush1.bf16.msra.mxu1 %v7343_v13  ;;  %3488 = vmatpush1.bf16.msra.mxu0 %v7345_v33  ;;  %v1961_v13 = vsel %vm1146_vm3, %v11920_v19, %v8383_v50  ;;  %v1995_v0 = vsel %vm1973_vm5, %v1962_v28, %v8389_v41  ;;  %v8392_v25 = vpop.permute.xlu0 %8391  ;;  %v8407_v2 = vpop.permute.xlu1 %8406 }
 0x4cc   : > { %3296 = vmatprep.subr.bf16.mxu1 %v7352_v46  ;;  %3489 = vmatprep.subr.bf16.mxu0 %v7354_v5  ;;  %v1994_v20 = vsel %vm1973_vm5, %v1961_v13, %v8388_v62  ;;  %v8394_v8 = vunpack.i.h.bf16 %v8392_v25  ;;  %v8393_v31 = vunpack.i.l.bf16 %v8392_v25  ;;  %v10233_v46 = vpack.c.bf16 %v8399_v35, %v8398_v57  ;;  %v11927_v13 = vld [vmem:[#allocation29_spill] sm:$0xff] }
 0x4cd   : > { %v10231_v17 = vpack.c.bf16 %v1995_v0, %v1994_v20  ;;  %v8409_v18 = vunpack.i.h.bf16 %v8407_v2  ;;  %v11928_v40 = vmax.f32 %v11927_v13, 0.0 }
 0x4ce   : > { %v1964_v36 = vsel %vm1146_vm3, %v11921_v22, %v8394_v8  ;;  %v1963_v63 = vsel %vm1146_vm3, %v11922_v23, %v8393_v31 }
 0x4cf   : > { %3297 = vmatpush1.bf16.msra.mxu1 %v7351_v56  ;;  %3490 = vmatpush1.bf16.msra.mxu0 %v7353_v61  ;;  %v1996_v59 = vsel %vm1973_vm5, %v1963_v63, %v8398_v57  ;;  %v1997_v33 = vsel %vm1973_vm5, %v1964_v36, %v8399_v35  ;;  %v8402_v27 = vpop.permute.xlu0 %8401  ;;  %v8408_v56 = vunpack.i.l.bf16 %v8407_v2  ;;  %v8417_v61 = vpop.permute.xlu1 %8416  ;;  %v11929_v2 = vld [vmem:[#allocation34_spill] sm:$0xff] }
 0x4d0   : > { %v10251_v5 = vpack.c.bf16 %v1997_v33, %v1996_v59  ;;  %v8404_v39 = vunpack.i.h.bf16 %v8402_v27  ;;  %v8403_v45 = vunpack.i.l.bf16 %v8402_v27  ;;  %v8419_v41 = vunpack.i.h.bf16 %v8417_v61  ;;  %v11931_v27 = vld [vmem:[#allocation32_spill] sm:$0xff] }
 0x4d1   : > { %2993 = vmatmul.mubr.bf16.gmra.mrb[64].mxu1 %v10191_v55  ;;  %3186 = vmatmul.mubr.bf16.gmra.mrb[96].mxu0 %v10191_v55  ;;  %v10253_v49 = vpack.c.bf16 %v8409_v18, %v8408_v56  ;;  %v8418_v62 = vunpack.i.l.bf16 %v8417_v61  ;;  %v11930_v59 = vmax.f32 %v11929_v2, 0.0 }
 0x4d2   : > { %7384 = vmatprep.mubr.msk.bf16.mxu1 %vm10005_vm6, %v10193_v44  ;;  %7432 = vmatprep.mubr.msk.bf16.mxu0 %vm10005_vm6, %v10193_v44  ;;  %v1966_v26 = vsel %vm1146_vm3, %v11923_v14, %v8404_v39  ;;  %v1965_v29 = vsel %vm1146_vm3, %v11924_v43, %v8403_v45 }
 0x4d3   : > { %v1998_v48 = vsel %vm1973_vm5, %v1965_v29, %v8408_v56  ;;  %v1999_v34 = vsel %vm1973_vm5, %v1966_v26, %v8409_v18  ;;  %v8412_v47 = vpop.permute.xlu0 %8411  ;;  %v10273_v28 = vpack.c.bf16 %v8419_v41, %v8418_v62  ;;  %v8427_v0 = vpop.permute.xlu1 %8426  ;;  %v11932_v18 = vmax.f32 %v11931_v27, 0.0 }
 0x4d4   : > { %v10271_v58 = vpack.c.bf16 %v1999_v34, %v1998_v48  ;;  %v8414_v50 = vunpack.i.h.bf16 %v8412_v47  ;;  %v8413_v9 = vunpack.i.l.bf16 %v8412_v47  ;;  %v8429_v8 = vunpack.i.h.bf16 %v8427_v0 }
 0x4d5   : > { %v8428_v31 = vunpack.i.l.bf16 %v8427_v0 }
 0x4d6   : > { %v1968_v19 = vsel %vm1146_vm3, %v11926_v12, %v8414_v50  ;;  %v1967_v20 = vsel %vm1146_vm3, %v11928_v40, %v8413_v9  ;;  %v11935_v9 = vld [vmem:[#allocation31_spill] sm:$0xff] }
 0x4d7   : > { %v2000_v25 = vsel %vm1973_vm5, %v1967_v20, %v8418_v62  ;;  %v2001_v35 = vsel %vm1973_vm5, %v1968_v19, %v8419_v41  ;;  %v8422_v57 = vpop.permute.xlu0 %8421  ;;  %v10293_v63 = vpack.c.bf16 %v8429_v8, %v8428_v31  ;;  %v8437_v39 = vpop.permute.xlu1 %8436  ;;  %v11933_v41 = vld [vmem:[#allocation33_spill] sm:$0xff]  ;;  %v11936_v52 = vmax.f32 %v11935_v9, 0.0 }
 0x4d8   : > { %v10291_v22 = vpack.c.bf16 %v2001_v35, %v2000_v25  ;;  %v8424_v36 = vunpack.i.h.bf16 %v8422_v57  ;;  %v8423_v23 = vunpack.i.l.bf16 %v8422_v57  ;;  %v8439_v43 = vunpack.i.h.bf16 %v8437_v39 }
 0x4d9   : > { %3003 = vmatmul.mubr.bf16.gmra.mrb[68].mxu1 %v10211_v38  ;;  %3196 = vmatmul.mubr.bf16.gmra.mrb[100].mxu0 %v10211_v38  ;;  %v8438_v29 = vunpack.i.l.bf16 %v8437_v39  ;;  %v11934_v62 = vmax.f32 %v11933_v41, 0.0 }
 0x4da   : > { %7387 = vmatprep.mubr.msk.bf16.mxu1 %vm10005_vm6, %v10213_v53  ;;  %7435 = vmatprep.mubr.msk.bf16.mxu0 %vm10005_vm6, %v10213_v53  ;;  %v1970_v33 = vsel %vm1146_vm3, %v11930_v59, %v8424_v36  ;;  %v1969_v56 = vsel %vm1146_vm3, %v11932_v18, %v8423_v23 }
 0x4db   : > { %v2002_v45 = vsel %vm1973_vm5, %v1969_v56, %v8428_v31  ;;  %v2003_v14 = vsel %vm1973_vm5, %v1970_v33, %v8429_v8  ;;  %v8432_v26 = vpop.permute.xlu0 %8431  ;;  %v10313_v47 = vpack.c.bf16 %v8439_v43, %v8438_v29 }
 0x4dc   : > { %v10311_v61 = vpack.c.bf16 %v2003_v14, %v2002_v45  ;;  %v8434_v48 = vunpack.i.h.bf16 %v8432_v26  ;;  %v8433_v34 = vunpack.i.l.bf16 %v8432_v26 }
 0x4de   : > { %v1972_v50 = vsel %vm1146_vm3, %v11934_v62, %v8434_v48  ;;  %v1971_v12 = vsel %vm1146_vm3, %v11936_v52, %v8433_v34 }
 0x4df   : > { %v2004_v19 = vsel %vm1973_vm5, %v1971_v12, %v8438_v29  ;;  %v2005_v13 = vsel %vm1973_vm5, %v1972_v50, %v8439_v43 }
 0x4e0   : > { %v10331_v40 = vpack.c.bf16 %v2005_v13, %v2004_v19 }
 0x4e1   : > { %3013 = vmatmul.mubr.bf16.gmra.mrb[72].mxu1 %v10231_v17  ;;  %3206 = vmatmul.mubr.bf16.gmra.mrb[104].mxu0 %v10231_v17 }
 0x4e2   : > { %7390 = vmatprep.mubr.msk.bf16.mxu1 %vm10005_vm6, %v10233_v46  ;;  %7438 = vmatprep.mubr.msk.bf16.mxu0 %vm10005_vm6, %v10233_v46 }
 0x4e9   : > { %3023 = vmatmul.mubr.bf16.gmra.mrb[76].mxu1 %v10251_v5  ;;  %3216 = vmatmul.mubr.bf16.gmra.mrb[108].mxu0 %v10251_v5 }
 0x4ea   : > { %7393 = vmatprep.mubr.msk.bf16.mxu1 %vm10005_vm6, %v10253_v49  ;;  %7441 = vmatprep.mubr.msk.bf16.mxu0 %vm10005_vm6, %v10253_v49 }
 0x4f1   : > { %3033 = vmatmul.mubr.bf16.gmra.mrb[80].mxu1 %v10271_v58  ;;  %3226 = vmatmul.mubr.bf16.gmra.mrb[112].mxu0 %v10271_v58 }
 0x4f2   : > { %7396 = vmatprep.mubr.msk.bf16.mxu1 %vm10005_vm6, %v10273_v28  ;;  %7444 = vmatprep.mubr.msk.bf16.mxu0 %vm10005_vm6, %v10273_v28 }
 0x4f9   : > { %3043 = vmatmul.mubr.bf16.gmra.mrb[84].mxu1 %v10291_v22  ;;  %3236 = vmatmul.mubr.bf16.gmra.mrb[116].mxu0 %v10291_v22 }
 0x4fa   : > { %7399 = vmatprep.mubr.msk.bf16.mxu1 %vm10005_vm6, %v10293_v63  ;;  %7447 = vmatprep.mubr.msk.bf16.mxu0 %vm10005_vm6, %v10293_v63 }
 0x501   : > { %3053 = vmatmul.mubr.bf16.gmra.mrb[88].mxu1 %v10311_v61  ;;  %3246 = vmatmul.mubr.bf16.gmra.mrb[120].mxu0 %v10311_v61 }
 0x502   : > { %7402 = vmatprep.mubr.msk.bf16.mxu1 %vm10005_vm6, %v10313_v47  ;;  %7450 = vmatprep.mubr.msk.bf16.mxu0 %vm10005_vm6, %v10313_v47 }
 0x509   : > { %3063 = vmatmul.mubr.bf16.gmra.mrb[92].mxu1 %v10331_v40  ;;  %3256 = vmatmul.mubr.bf16.gmra.mrb[124].mxu0 %v10331_v40 }
 0x50a   : > { %7453 = vmatprep.mubr.msk.bf16.mxu1 %vm10005_vm6, %v10017_v6  ;;  %7501 = vmatprep.mubr.msk.bf16.mxu0 %vm10005_vm6, %v10017_v6  ;;  %v8446_v6 = vld [vmem:[#allocation12 + $0x40] sm:$0xff]  }
 0x50b   : > { %7819 = vmatprep.subr.bf16.mxu1 %v8446_v6 }
 0x511   : > { %3299 = vmatmul.mubr.bf16.vlgmr.msra.gmra.mrb[96].mxu1 %v10019_v21  ;;  %3492 = vmatmul.mubr.bf16.vlgmr.msra.gmra.mrb[128].mxu0 %v10019_v21  ;;  %v8447_v21 = vld [vmem:[#allocation12] sm:$0xff]  }
 0x512   : > { %7456 = vmatprep.mubr.msk.bf16.mxu1 %vm10005_vm6, %v10021_v3  ;;  %7504 = vmatprep.mubr.msk.bf16.mxu0 %vm10005_vm6, %v10021_v3  ;;  %v11849_v3 = vlaneseq }
 0x513   : > { %7820 = vmatpush3.bf16.msra.mxu1 %v8447_v21 }
 0x519   : > { %3309 = vmatmul.mubr.bf16.gmra.mrb[100].mxu1 %v10051_v32  ;;  %3502 = vmatmul.mubr.bf16.gmra.mrb[132].mxu0 %v10051_v32  ;;  %v10416_v32 = vshrl.u32 %v11849_v3, 7 }
 0x51a   : > { %7459 = vmatprep.mubr.msk.bf16.mxu1 %vm10005_vm6, %v10053_v4  ;;  %7507 = vmatprep.mubr.msk.bf16.mxu0 %vm10005_vm6, %v10053_v4 }
 0x51b   : > { %11937 = vst [vmem:[#allocation30_spill] sm:$0xff] %v10416_v32  ;;  %v10425_v4 = vsub.s32 0, %v10416_v32 }
 0x51d   : > { %11938 = vst [vmem:[#allocation29_spill] sm:$0xff] %v10425_v4 }
 0x521   : > { %3319 = vmatmul.mubr.bf16.gmra.mrb[104].mxu1 %v10071_v1  ;;  %3512 = vmatmul.mubr.bf16.gmra.mrb[136].mxu0 %v10071_v1  ;;  %v11850_v1 = vsub.s32 2, %v10416_v32 }
 0x522   : > { %7462 = vmatprep.mubr.msk.bf16.mxu1 %vm10005_vm6, %v10073_v60  ;;  %7510 = vmatprep.mubr.msk.bf16.mxu0 %vm10005_vm6, %v10073_v60  ;;  %v2198_v60 = vld [vmem:[%s11939_s5] sm:$0xff] }
 0x529   : > { %3329 = vmatmul.mubr.bf16.gmra.mrb[108].mxu1 %v10091_v24  ;;  %3522 = vmatmul.mubr.bf16.gmra.mrb[140].mxu0 %v10091_v24  ;;  %v10432_v24 = vsub.s32 1, %v10416_v32 }
 0x52a   : > { %7465 = vmatprep.mubr.msk.bf16.mxu1 %vm10005_vm6, %v10093_v10  ;;  %7513 = vmatprep.mubr.msk.bf16.mxu0 %vm10005_vm6, %v10093_v10  ;;  %v2214_v10 = vsub.s32 3, %v10416_v32 }
 0x52b   : > { %11940 = vst [vmem:[#allocation34_spill] sm:$0xff] %v10432_v24 }
 0x531   : > { %3339 = vmatmul.mubr.bf16.gmra.mrb[112].mxu1 %v10111_v7  ;;  %3532 = vmatmul.mubr.bf16.gmra.mrb[144].mxu0 %v10111_v7  ;;  %v8448_v7 = vld [vmem:[#allocation12 + $0x48] sm:$0xff]  }
 0x532   : > { %7468 = vmatprep.mubr.msk.bf16.mxu1 %vm10005_vm6, %v10113_v16  ;;  %7516 = vmatprep.mubr.msk.bf16.mxu0 %vm10005_vm6, %v10113_v16  ;;  %v10438_v16 = vrot.slane %v2198_v60, %v10425_v4 }
 0x533   : > { %7821 = vmatprep.subr.bf16.mxu1 %v8448_v7 }
 0x539   : > { %3349 = vmatmul.mubr.bf16.gmra.mrb[116].mxu1 %v10131_v54  ;;  %3542 = vmatmul.mubr.bf16.gmra.mrb[148].mxu0 %v10131_v54  ;;  %v10442_v54 = vrot.slane %v2198_v60, %v11850_v1 }
 0x53a   : > { %7471 = vmatprep.mubr.msk.bf16.mxu1 %vm10005_vm6, %v10133_v15  ;;  %7519 = vmatprep.mubr.msk.bf16.mxu0 %vm10005_vm6, %v10133_v15  ;;  %v10451_v15 = vrot.slane %v2198_v60, %v10432_v24 }
 0x541   : > { %3359 = vmatmul.mubr.bf16.gmra.mrb[120].mxu1 %v10151_v42  ;;  %3552 = vmatmul.mubr.bf16.gmra.mrb[152].mxu0 %v10151_v42  ;;  %v10453_v42 = vrot.slane %v2198_v60, %v2214_v10 }
 0x542   : > { %7474 = vmatprep.mubr.msk.bf16.mxu1 %vm10005_vm6, %v10153_v30  ;;  %7522 = vmatprep.mubr.msk.bf16.mxu0 %vm10005_vm6, %v10153_v30  ;;  %v8449_v30 = vld [vmem:[#allocation12 + $0x8] sm:$0xff]  }
 0x543   : > { %7822 = vmatpush3.bf16.msra.mxu1 %v8449_v30 }
 0x549   : > { %3369 = vmatmul.mubr.bf16.gmra.mrb[124].mxu1 %v10171_v11  ;;  %3562 = vmatmul.mubr.bf16.gmra.mrb[156].mxu0 %v10171_v11 }
 0x54a   : > { %7477 = vmatprep.mubr.msk.bf16.mxu1 %vm10005_vm6, %v10173_v37  ;;  %7525 = vmatprep.mubr.msk.bf16.mxu0 %vm10005_vm6, %v10173_v37 }
 0x551   : > { %3379 = vmatmul.mubr.bf16.gmra.mrb[128].mxu1 %v10191_v55  ;;  %3572 = vmatmul.mubr.bf16.gmra.mrb[160].mxu0 %v10191_v55 }
 0x552   : > { %7480 = vmatprep.mubr.msk.bf16.mxu1 %vm10005_vm6, %v10193_v44  ;;  %7528 = vmatprep.mubr.msk.bf16.mxu0 %vm10005_vm6, %v10193_v44 }
 0x559   : > { %3389 = vmatmul.mubr.bf16.gmra.mrb[132].mxu1 %v10211_v38  ;;  %3582 = vmatmul.mubr.bf16.gmra.mrb[164].mxu0 %v10211_v38 }
 0x55a   : > { %7483 = vmatprep.mubr.msk.bf16.mxu1 %vm10005_vm6, %v10213_v53  ;;  %7531 = vmatprep.mubr.msk.bf16.mxu0 %vm10005_vm6, %v10213_v53 }
 0x561   : > { %3399 = vmatmul.mubr.bf16.gmra.mrb[136].mxu1 %v10231_v17  ;;  %3592 = vmatmul.mubr.bf16.gmra.mrb[168].mxu0 %v10231_v17 }
 0x562   : > { %7486 = vmatprep.mubr.msk.bf16.mxu1 %vm10005_vm6, %v10233_v46  ;;  %7534 = vmatprep.mubr.msk.bf16.mxu0 %vm10005_vm6, %v10233_v46 }
 0x564   : > { %v2914_v11 = vpop.f32.mrb[32].mxu1  ;;  %v3107_v37 = vpop.f32.mrb[64].mxu0 }
 0x565   : > { %v2915_v55 = vadd.f32 %v2914_v11, %v10438_v16  ;;  %v3108_v44 = vadd.f32 %v3107_v37, %v10442_v54  ;;  %v2916_v38 = vpop.f32.mrb[33].mxu1  ;;  %v3109_v53 = vpop.f32.mrb[65].mxu0 }
 0x566   : > { %v2917_v17 = vadd.f32 %v2916_v38, %v10451_v15  ;;  %v3110_v46 = vadd.f32 %v3109_v53, %v10453_v42  ;;  %v2918_v20 = vpop.f32.mrb[34].mxu1  ;;  %v3111_v0 = vpop.f32.mrb[66].mxu0  ;;  %v8450_v53 = vld [vmem:[#allocation12 + $0x50] sm:$0xff]  }
 0x567   : > { %v2919_v25 = vadd.f32 %v2918_v20, %v10438_v16  ;;  %v3112_v35 = vadd.f32 %v3111_v0, %v10442_v54  ;;  %v2920_v57 = vpop.f32.mrb[35].mxu1  ;;  %v3113_v8 = vpop.f32.mrb[67].mxu0  ;;  %v3652_v23 = vmax.f32 %v2915_v55, 0.0  ;;  %v3654_v2 = vmax.f32 %v3108_v44, 0.0  ;;  %7823 = vmatprep.subr.bf16.mxu1 %v8450_v53 }
 0x568   : > { %v2921_v31 = vadd.f32 %v2920_v57, %v10451_v15  ;;  %v3114_v36 = vadd.f32 %v3113_v8, %v10453_v42  ;;  %v3653_v27 = vmax.f32 %v2917_v17, 0.0  ;;  %v3655_v18 = vmax.f32 %v3110_v46, 0.0 }
 0x569   : > { %v3660_v59 = vmax.f32 %v2919_v25, 0.0  ;;  %v3662_v33 = vmax.f32 %v3112_v35, 0.0  ;;  %3409 = vmatmul.mubr.bf16.gmra.mrb[140].mxu1 %v10251_v5  ;;  %3602 = vmatmul.mubr.bf16.gmra.mrb[172].mxu0 %v10251_v5 }
 0x56a   : > { %v3661_v56 = vmax.f32 %v2921_v31, 0.0  ;;  %v3663_v39 = vmax.f32 %v3114_v36, 0.0  ;;  %7489 = vmatprep.mubr.msk.bf16.mxu1 %vm10005_vm6, %v10253_v49  ;;  %7537 = vmatprep.mubr.msk.bf16.mxu0 %vm10005_vm6, %v10253_v49  ;;  %v8451_v31 = vld [vmem:[#allocation12 + $0x10] sm:$0xff]  }
 0x56b   : > { %v3908_v45 = vmax.f32 %v3652_v23, %v3660_v59  ;;  %v4244_v14 = vadd.f32 %v3660_v59, %v3652_v23  ;;  %v3950_v26 = vmax.f32 %v3654_v2, %v3662_v33  ;;  %v4286_v43 = vadd.f32 %v3662_v33, %v3654_v2  ;;  %7824 = vmatpush3.bf16.msra.mxu1 %v8451_v31 }
 0x56c   : > { %v3929_v29 = vmax.f32 %v3653_v27, %v3661_v56  ;;  %v4265_v48 = vadd.f32 %v3661_v56, %v3653_v27  ;;  %v3971_v34 = vmax.f32 %v3655_v18, %v3663_v39  ;;  %v4307_v5 = vadd.f32 %v3663_v39, %v3655_v18  ;;  %v2924_v41 = vpop.f32.mrb[36].mxu1  ;;  %v3117_v62 = vpop.f32.mrb[68].mxu0 }
 0x56d   : > { %v2925_v50 = vadd.f32 %v2924_v41, %v10438_v16  ;;  %v3118_v9 = vadd.f32 %v3117_v62, %v10442_v54  ;;  %v2926_v52 = vpop.f32.mrb[37].mxu1  ;;  %v3119_v12 = vpop.f32.mrb[69].mxu0 }
 0x56e   : > { %v2927_v19 = vadd.f32 %v2926_v52, %v10451_v15  ;;  %v3120_v49 = vadd.f32 %v3119_v12, %v10453_v42  ;;  %v2928_v13 = vpop.f32.mrb[38].mxu1  ;;  %v3121_v6 = vpop.f32.mrb[70].mxu0 }
 0x56f   : > { %v3668_v21 = vmax.f32 %v2925_v50, 0.0  ;;  %v3670_v60 = vmax.f32 %v3118_v9, 0.0  ;;  %v2929_v10 = vadd.f32 %v2928_v13, %v10438_v16  ;;  %v3122_v7 = vadd.f32 %v3121_v6, %v10442_v54  ;;  %v2930_v30 = vpop.f32.mrb[39].mxu1  ;;  %v3123_v11 = vpop.f32.mrb[71].mxu0 }
 0x570   : > { %v3669_v37 = vmax.f32 %v2927_v19, 0.0  ;;  %v3671_v55 = vmax.f32 %v3120_v49, 0.0  ;;  %v2931_v44 = vadd.f32 %v2930_v30, %v10451_v15  ;;  %v3124_v38 = vadd.f32 %v3123_v11, %v10453_v42 }
 0x571   : > { %v3909_v17 = vmax.f32 %v3908_v45, %v3668_v21  ;;  %v4245_v46 = vadd.f32 %v4244_v14, %v3668_v21  ;;  %v3951_v20 = vmax.f32 %v3950_v26, %v3670_v60  ;;  %v4287_v0 = vadd.f32 %v4286_v43, %v3670_v60  ;;  %3419 = vmatmul.mubr.bf16.gmra.mrb[144].mxu1 %v10271_v58 }
 0x572   : > { %v3930_v25 = vmax.f32 %v3929_v29, %v3669_v37  ;;  %v4266_v35 = vadd.f32 %v4265_v48, %v3669_v37  ;;  %v3972_v57 = vmax.f32 %v3971_v34, %v3671_v55  ;;  %v4308_v8 = vadd.f32 %v4307_v5, %v3671_v55  ;;  %3612 = vmatmul.mubr.bf16.gmra.mrb[176].mxu0 %v10271_v58 }
 0x573   : > { %v3676_v36 = vmax.f32 %v2929_v10, 0.0  ;;  %v3678_v23 = vmax.f32 %v3122_v7, 0.0  ;;  %v3677_v2 = vmax.f32 %v2931_v44, 0.0  ;;  %v3679_v59 = vmax.f32 %v3124_v38, 0.0  ;;  %7492 = vmatprep.mubr.msk.bf16.mxu1 %vm10005_vm6, %v10273_v28  ;;  %7540 = vmatprep.mubr.msk.bf16.mxu0 %vm10005_vm6, %v10273_v28 }
 0x574   : > { %v2934_v33 = vpop.f32.mrb[40].mxu1  ;;  %v3127_v27 = vpop.f32.mrb[72].mxu0 }
 0x575   : > { %v3910_v18 = vmax.f32 %v3909_v17, %v3676_v36  ;;  %v4246_v56 = vadd.f32 %v4245_v46, %v3676_v36  ;;  %v3952_v39 = vmax.f32 %v3951_v20, %v3678_v23  ;;  %v4288_v58 = vadd.f32 %v4287_v0, %v3678_v23  ;;  %v2936_v45 = vpop.f32.mrb[41].mxu1  ;;  %v3129_v14 = vpop.f32.mrb[73].mxu0 }
 0x576   : > { %v3931_v26 = vmax.f32 %v3930_v25, %v3677_v2  ;;  %v4267_v43 = vadd.f32 %v4266_v35, %v3677_v2  ;;  %v3973_v29 = vmax.f32 %v3972_v57, %v3679_v59  ;;  %v4309_v48 = vadd.f32 %v4308_v8, %v3679_v59  ;;  %v2938_v34 = vpop.f32.mrb[42].mxu1  ;;  %v3131_v5 = vpop.f32.mrb[74].mxu0 }
 0x577   : > { %v2935_v41 = vadd.f32 %v2934_v33, %v10438_v16  ;;  %v3128_v28 = vadd.f32 %v3127_v27, %v10442_v54  ;;  %v2937_v62 = vadd.f32 %v2936_v45, %v10451_v15  ;;  %v3130_v50 = vadd.f32 %v3129_v14, %v10453_v42  ;;  %v2940_v9 = vpop.f32.mrb[43].mxu1  ;;  %v3133_v52 = vpop.f32.mrb[75].mxu0 }
 0x578   : > { %v2939_v12 = vadd.f32 %v2938_v34, %v10438_v16  ;;  %v3132_v19 = vadd.f32 %v3131_v5, %v10442_v54  ;;  %v2941_v49 = vadd.f32 %v2940_v9, %v10451_v15  ;;  %v3134_v13 = vadd.f32 %v3133_v52, %v10453_v42 }
 0x579   : > { %v3684_v6 = vmax.f32 %v2935_v41, 0.0  ;;  %v3686_v21 = vmax.f32 %v3128_v28, 0.0  ;;  %v3685_v60 = vmax.f32 %v2937_v62, 0.0  ;;  %v3687_v10 = vmax.f32 %v3130_v50, 0.0  ;;  %3429 = vmatmul.mubr.bf16.gmra.mrb[148].mxu1 %v10291_v22 }
 0x57a   : > { %v3692_v7 = vmax.f32 %v2939_v12, 0.0  ;;  %v3694_v30 = vmax.f32 %v3132_v19, 0.0  ;;  %v3693_v11 = vmax.f32 %v2941_v49, 0.0  ;;  %v3695_v37 = vmax.f32 %v3134_v13, 0.0  ;;  %3622 = vmatmul.mubr.bf16.gmra.mrb[180].mxu0 %v10291_v22  ;;  %7495 = vmatprep.mubr.msk.bf16.mxu1 %vm10005_vm6, %v10293_v63 }
 0x57b   : > { %v3911_v55 = vmax.f32 %v3910_v18, %v3684_v6  ;;  %v4247_v44 = vadd.f32 %v4246_v56, %v3684_v6  ;;  %v3953_v38 = vmax.f32 %v3952_v39, %v3686_v21  ;;  %v4289_v53 = vadd.f32 %v4288_v58, %v3686_v21  ;;  %7543 = vmatprep.mubr.msk.bf16.mxu0 %vm10005_vm6, %v10293_v63 }
 0x57c   : > { %v3932_v17 = vmax.f32 %v3931_v26, %v3685_v60  ;;  %v4268_v46 = vadd.f32 %v4267_v43, %v3685_v60  ;;  %v3974_v20 = vmax.f32 %v3973_v29, %v3687_v10  ;;  %v4310_v0 = vadd.f32 %v4309_v48, %v3687_v10  ;;  %v2944_v25 = vpop.f32.mrb[44].mxu1  ;;  %v3137_v35 = vpop.f32.mrb[76].mxu0 }
 0x57d   : > { %v3912_v57 = vmax.f32 %v3911_v55, %v3692_v7  ;;  %v4248_v22 = vadd.f32 %v4247_v44, %v3692_v7  ;;  %v3954_v8 = vmax.f32 %v3953_v38, %v3694_v30  ;;  %v4290_v31 = vadd.f32 %v4289_v53, %v3694_v30  ;;  %v2946_v36 = vpop.f32.mrb[45].mxu1  ;;  %v3139_v23 = vpop.f32.mrb[77].mxu0 }
 0x57e   : > { %v3933_v2 = vmax.f32 %v3932_v17, %v3693_v11  ;;  %v4269_v59 = vadd.f32 %v4268_v46, %v3693_v11  ;;  %v3975_v33 = vmax.f32 %v3974_v20, %v3695_v37  ;;  %v4311_v27 = vadd.f32 %v4310_v0, %v3695_v37  ;;  %v2948_v18 = vpop.f32.mrb[46].mxu1  ;;  %v3141_v56 = vpop.f32.mrb[78].mxu0  ;;  %v8452_v17 = vld [vmem:[#allocation12 + $0x58] sm:$0xff]  }
 0x57f   : > { %v2945_v63 = vadd.f32 %v2944_v25, %v10438_v16  ;;  %v3138_v39 = vadd.f32 %v3137_v35, %v10442_v54  ;;  %v2947_v58 = vadd.f32 %v2946_v36, %v10451_v15  ;;  %v3140_v45 = vadd.f32 %v3139_v23, %v10453_v42  ;;  %v2950_v14 = vpop.f32.mrb[47].mxu1  ;;  %v3143_v26 = vpop.f32.mrb[79].mxu0  ;;  %7825 = vmatprep.subr.bf16.mxu1 %v8452_v17 }
 0x580   : > { %v2949_v43 = vadd.f32 %v2948_v18, %v10438_v16  ;;  %v3142_v29 = vadd.f32 %v3141_v56, %v10442_v54  ;;  %v2951_v48 = vadd.f32 %v2950_v14, %v10451_v15  ;;  %v3144_v34 = vadd.f32 %v3143_v26, %v10453_v42 }
 0x581   : > { %v3700_v5 = vmax.f32 %v2945_v63, 0.0  ;;  %v3702_v41 = vmax.f32 %v3138_v39, 0.0  ;;  %v3701_v28 = vmax.f32 %v2947_v58, 0.0  ;;  %v3703_v62 = vmax.f32 %v3140_v45, 0.0  ;;  %3439 = vmatmul.mubr.bf16.gmra.mrb[152].mxu1 %v10311_v61  ;;  %v8454_v58 = vld [vmem:[#allocation12 + $0x60] sm:$0xff]  }
 0x582   : > { %v3708_v50 = vmax.f32 %v2949_v43, 0.0  ;;  %v3710_v9 = vmax.f32 %v3142_v29, 0.0  ;;  %v3709_v52 = vmax.f32 %v2951_v48, 0.0  ;;  %v3711_v12 = vmax.f32 %v3144_v34, 0.0  ;;  %3632 = vmatmul.mubr.bf16.gmra.mrb[184].mxu0 %v10311_v61  ;;  %7498 = vmatprep.mubr.msk.bf16.mxu1 %vm10005_vm6, %v10313_v47  ;;  %v8455_v29 = vld [vmem:[#allocation12 + $0x20] sm:$0xff]  }
 0x583   : > { %v3913_v19 = vmax.f32 %v3912_v57, %v3700_v5  ;;  %v4249_v49 = vadd.f32 %v4248_v22, %v3700_v5  ;;  %v3955_v13 = vmax.f32 %v3954_v8, %v3702_v41  ;;  %v4291_v6 = vadd.f32 %v4290_v31, %v3702_v41  ;;  %7546 = vmatprep.mubr.msk.bf16.mxu0 %vm10005_vm6, %v10313_v47  ;;  %v8453_v47 = vld [vmem:[#allocation12 + $0x18] sm:$0xff]  }
 0x584   : > { %v3934_v21 = vmax.f32 %v3933_v2, %v3701_v28  ;;  %v4270_v60 = vadd.f32 %v4269_v59, %v3701_v28  ;;  %v3976_v10 = vmax.f32 %v3975_v33, %v3703_v62  ;;  %v4312_v7 = vadd.f32 %v4311_v27, %v3703_v62  ;;  %v2954_v30 = vpop.f32.mrb[48].mxu1  ;;  %v3147_v11 = vpop.f32.mrb[80].mxu0  ;;  %7826 = vmatpush3.bf16.msra.mxu1 %v8453_v47 }
 0x585   : > { %v3914_v37 = vmax.f32 %v3913_v19, %v3708_v50  ;;  %v4250_v61 = vadd.f32 %v4249_v49, %v3708_v50  ;;  %v3956_v55 = vmax.f32 %v3955_v13, %v3710_v9  ;;  %v4292_v44 = vadd.f32 %v4291_v6, %v3710_v9  ;;  %v2956_v38 = vpop.f32.mrb[49].mxu1  ;;  %v3149_v53 = vpop.f32.mrb[81].mxu0  ;;  %7827 = vmatprep.subr.bf16.mxu1 %v8454_v58 }
 0x586   : > { %v3935_v46 = vmax.f32 %v3934_v21, %v3709_v52  ;;  %v4271_v20 = vadd.f32 %v4270_v60, %v3709_v52  ;;  %v3977_v0 = vmax.f32 %v3976_v10, %v3711_v12  ;;  %v4313_v25 = vadd.f32 %v4312_v7, %v3711_v12  ;;  %v2958_v35 = vpop.f32.mrb[50].mxu1  ;;  %v3151_v51 = vpop.f32.mrb[82].mxu0 }
 0x587   : > { %v2955_v57 = vadd.f32 %v2954_v30, %v10438_v16  ;;  %v3148_v22 = vadd.f32 %v3147_v11, %v10442_v54  ;;  %v2957_v8 = vadd.f32 %v2956_v38, %v10451_v15  ;;  %v3150_v31 = vadd.f32 %v3149_v53, %v10453_v42  ;;  %v2960_v36 = vpop.f32.mrb[51].mxu1  ;;  %v3153_v23 = vpop.f32.mrb[83].mxu0 }
 0x588   : > { %v2959_v2 = vadd.f32 %v2958_v35, %v10438_v16  ;;  %v3152_v59 = vadd.f32 %v3151_v51, %v10442_v54  ;;  %v2961_v33 = vadd.f32 %v2960_v36, %v10451_v15  ;;  %v3154_v27 = vadd.f32 %v3153_v23, %v10453_v42  ;;  %7828 = vmatpush3.bf16.msra.mxu1 %v8455_v29 }
 0x589   : > { %v3716_v18 = vmax.f32 %v2955_v57, 0.0  ;;  %v3718_v56 = vmax.f32 %v3148_v22, 0.0  ;;  %v3717_v63 = vmax.f32 %v2957_v8, 0.0  ;;  %v3719_v39 = vmax.f32 %v3150_v31, 0.0  ;;  %3449 = vmatmul.mubr.bf16.gmra.mrb[156].mxu1 %v10331_v40  ;;  %v8458_v31 = vld [vmem:[#allocation12 + $0x70] sm:$0xff]  }
 0x58a   : > { %v3724_v45 = vmax.f32 %v2959_v2, 0.0  ;;  %v3726_v14 = vmax.f32 %v3152_v59, 0.0  ;;  %v3725_v26 = vmax.f32 %v2961_v33, 0.0  ;;  %v3727_v43 = vmax.f32 %v3154_v27, 0.0  ;;  %3642 = vmatmul.mubr.bf16.gmra.mrb[188].mxu0 %v10331_v40  ;;  %v8456_v40 = vld [vmem:[#allocation12 + $0x68] sm:$0xff]   ;;  %v8459_v33 = vld [vmem:[#allocation12 + $0x30] sm:$0xff]  }
 0x58b   : > { %v3915_v48 = vmax.f32 %v3914_v37, %v3716_v18  ;;  %v4251_v34 = vadd.f32 %v4250_v61, %v3716_v18  ;;  %v3957_v5 = vmax.f32 %v3956_v55, %v3718_v56  ;;  %v4293_v41 = vadd.f32 %v4292_v44, %v3718_v56  ;;  %v8457_v55 = vld [vmem:[#allocation12 + $0x28] sm:$0xff]   ;;  %7829 = vmatprep.subr.bf16.mxu1 %v8456_v40 }
 0x58c   : > { %v3936_v28 = vmax.f32 %v3935_v46, %v3717_v63  ;;  %v4272_v62 = vadd.f32 %v4271_v20, %v3717_v63  ;;  %v3978_v50 = vmax.f32 %v3977_v0, %v3719_v39  ;;  %v4314_v9 = vadd.f32 %v4313_v25, %v3719_v39  ;;  %v2964_v52 = vpop.f32.mrb[52].mxu1  ;;  %v3157_v12 = vpop.f32.mrb[84].mxu0  ;;  %7830 = vmatpush3.bf16.msra.mxu1 %v8457_v55 }
 0x58d   : > { %v3916_v19 = vmax.f32 %v3915_v48, %v3724_v45  ;;  %v4252_v49 = vadd.f32 %v4251_v34, %v3724_v45  ;;  %v3958_v13 = vmax.f32 %v3957_v5, %v3726_v14  ;;  %v4294_v6 = vadd.f32 %v4293_v41, %v3726_v14  ;;  %v2966_v21 = vpop.f32.mrb[53].mxu1  ;;  %v3159_v60 = vpop.f32.mrb[85].mxu0  ;;  %7831 = vmatprep.subr.bf16.mxu1 %v8458_v31 }
 0x58e   : > { %v3937_v10 = vmax.f32 %v3936_v28, %v3725_v26  ;;  %v4273_v7 = vadd.f32 %v4272_v62, %v3725_v26  ;;  %v3979_v30 = vmax.f32 %v3978_v50, %v3727_v43  ;;  %v4315_v11 = vadd.f32 %v4314_v9, %v3727_v43  ;;  %v2968_v37 = vpop.f32.mrb[54].mxu1  ;;  %v3161_v61 = vpop.f32.mrb[86].mxu0  ;;  %v8460_v62 = vld [vmem:[#allocation12 + $0x78] sm:$0xff]  }
 0x58f   : > { %v2965_v44 = vadd.f32 %v2964_v52, %v10438_v16  ;;  %v3158_v38 = vadd.f32 %v3157_v12, %v10442_v54  ;;  %v2967_v53 = vadd.f32 %v2966_v21, %v10451_v15  ;;  %v3160_v17 = vadd.f32 %v3159_v60, %v10453_v42  ;;  %v2970_v46 = vpop.f32.mrb[55].mxu1  ;;  %v3163_v20 = vpop.f32.mrb[87].mxu0 }
 0x590   : > { %v2969_v0 = vadd.f32 %v2968_v37, %v10438_v16  ;;  %v3162_v25 = vadd.f32 %v3161_v61, %v10442_v54  ;;  %v2971_v35 = vadd.f32 %v2970_v46, %v10451_v15  ;;  %v3164_v51 = vadd.f32 %v3163_v20, %v10453_v42  ;;  %7832 = vmatpush3.bf16.msra.mxu1 %v8459_v33 }
 0x591   : > { %v3732_v47 = vmax.f32 %v2965_v44, 0.0  ;;  %v3734_v57 = vmax.f32 %v3158_v38, 0.0  ;;  %v3733_v22 = vmax.f32 %v2967_v53, 0.0  ;;  %v3735_v8 = vmax.f32 %v3160_v17, 0.0  ;;  %7833 = vmatprep.subr.bf16.mxu1 %v8460_v62 }
 0x592   : > { %v3740_v36 = vmax.f32 %v2969_v0, 0.0  ;;  %v3742_v23 = vmax.f32 %v3162_v25, 0.0  ;;  %v3741_v2 = vmax.f32 %v2971_v35, 0.0  ;;  %v3743_v59 = vmax.f32 %v3164_v51, 0.0 }
 0x593   : > { %v3917_v27 = vmax.f32 %v3916_v19, %v3732_v47  ;;  %v4253_v18 = vadd.f32 %v4252_v49, %v3732_v47  ;;  %v3959_v56 = vmax.f32 %v3958_v13, %v3734_v57  ;;  %v4295_v63 = vadd.f32 %v4294_v6, %v3734_v57  ;;  %v8461_v13 = vld [vmem:[#allocation12 + $0x38] sm:$0xff]  }
 0x594   : > { %v3938_v39 = vmax.f32 %v3937_v10, %v3733_v22  ;;  %v4274_v58 = vadd.f32 %v4273_v7, %v3733_v22  ;;  %v3980_v45 = vmax.f32 %v3979_v30, %v3735_v8  ;;  %v4316_v14 = vadd.f32 %v4315_v11, %v3735_v8  ;;  %v2974_v26 = vpop.f32.mrb[56].mxu1  ;;  %v3167_v43 = vpop.f32.mrb[88].mxu0  ;;  %7834 = vmatpush3.bf16.msra.mxu1 %v8461_v13  ;;  %v8462_v13 = vld [vmem:[#allocation12 + $0xc0] sm:$0xff]  }
 0x595   : > { %v3918_v29 = vmax.f32 %v3917_v27, %v3740_v36  ;;  %v4254_v48 = vadd.f32 %v4253_v18, %v3740_v36  ;;  %v3960_v34 = vmax.f32 %v3959_v56, %v3742_v23  ;;  %v4296_v5 = vadd.f32 %v4295_v63, %v3742_v23  ;;  %v2976_v41 = vpop.f32.mrb[57].mxu1  ;;  %v3169_v28 = vpop.f32.mrb[89].mxu0  ;;  %7841 = vmatprep.subr.bf16.mxu1 %v8462_v13 }
 0x596   : > { %v3939_v50 = vmax.f32 %v3938_v39, %v3741_v2  ;;  %v4275_v9 = vadd.f32 %v4274_v58, %v3741_v2  ;;  %v3981_v52 = vmax.f32 %v3980_v45, %v3743_v59  ;;  %v4317_v12 = vadd.f32 %v4316_v14, %v3743_v59  ;;  %v2978_v19 = vpop.f32.mrb[58].mxu1  ;;  %v3171_v49 = vpop.f32.mrb[90].mxu0 }
 0x597   : > { %v2975_v6 = vadd.f32 %v2974_v26, %v10438_v16  ;;  %v3168_v21 = vadd.f32 %v3167_v43, %v10442_v54  ;;  %v2977_v60 = vadd.f32 %v2976_v41, %v10451_v15  ;;  %v3170_v40 = vadd.f32 %v3169_v28, %v10453_v42  ;;  %v2980_v10 = vpop.f32.mrb[59].mxu1  ;;  %v3173_v7 = vpop.f32.mrb[91].mxu0 }
 0x598   : > { %v2979_v30 = vadd.f32 %v2978_v19, %v10438_v16  ;;  %v3172_v11 = vadd.f32 %v3171_v49, %v10442_v54  ;;  %v2981_v37 = vadd.f32 %v2980_v10, %v10451_v15  ;;  %v3174_v61 = vadd.f32 %v3173_v7, %v10453_v42 }
 0x599   : > { %v3748_v55 = vmax.f32 %v2975_v6, 0.0  ;;  %v3750_v44 = vmax.f32 %v3168_v21, 0.0  ;;  %v3749_v38 = vmax.f32 %v2977_v60, 0.0  ;;  %v3751_v53 = vmax.f32 %v3170_v40, 0.0  ;;  %v8463_v6 = vld [vmem:[#allocation12 + $0x140] sm:$0xff]  }
 0x59a   : > { %v3756_v17 = vmax.f32 %v2979_v30, 0.0  ;;  %v3758_v46 = vmax.f32 %v3172_v11, 0.0  ;;  %v3757_v20 = vmax.f32 %v2981_v37, 0.0  ;;  %v3759_v0 = vmax.f32 %v3174_v61, 0.0  ;;  %v8465_v61 = vld [vmem:[#allocation12 + $0x100] sm:$0xff]   ;;  %7863 = vmatprep.subr.bf16.mxu0 %v8463_v6 }
 0x59b   : > { %v3919_v25 = vmax.f32 %v3918_v29, %v3748_v55  ;;  %v4255_v35 = vadd.f32 %v4254_v48, %v3748_v55  ;;  %v3961_v51 = vmax.f32 %v3960_v34, %v3750_v44  ;;  %v4297_v47 = vadd.f32 %v4296_v5, %v3750_v44  ;;  %7864 = vmatpush3.bf16.msra.mxu0 %v8465_v61 }
 0x59c   : > { %v3940_v57 = vmax.f32 %v3939_v50, %v3749_v38  ;;  %v4276_v22 = vadd.f32 %v4275_v9, %v3749_v38  ;;  %v3982_v8 = vmax.f32 %v3981_v52, %v3751_v53  ;;  %v4318_v31 = vadd.f32 %v4317_v12, %v3751_v53  ;;  %v2984_v36 = vpop.f32.mrb[60].mxu1  ;;  %v3177_v23 = vpop.f32.mrb[92].mxu0 }
 0x59d   : > { %v3920_v2 = vmax.f32 %v3919_v25, %v3756_v17  ;;  %v4256_v59 = vadd.f32 %v4255_v35, %v3756_v17  ;;  %v3962_v33 = vmax.f32 %v3961_v51, %v3758_v46  ;;  %v4298_v27 = vadd.f32 %v4297_v47, %v3758_v46  ;;  %v2986_v18 = vpop.f32.mrb[61].mxu1  ;;  %v3179_v56 = vpop.f32.mrb[93].mxu0 }
 0x59e   : > { %v3941_v63 = vmax.f32 %v3940_v57, %v3757_v20  ;;  %v4277_v39 = vadd.f32 %v4276_v22, %v3757_v20  ;;  %v3983_v58 = vmax.f32 %v3982_v8, %v3759_v0  ;;  %v4319_v45 = vadd.f32 %v4318_v31, %v3759_v0  ;;  %v2988_v14 = vpop.f32.mrb[62].mxu1  ;;  %v3181_v26 = vpop.f32.mrb[94].mxu0 }
 0x59f   : > { %v2985_v43 = vadd.f32 %v2984_v36, %v10438_v16  ;;  %v3178_v29 = vadd.f32 %v3177_v23, %v10442_v54  ;;  %v2987_v48 = vadd.f32 %v2986_v18, %v10451_v15  ;;  %v3180_v34 = vadd.f32 %v3179_v56, %v10453_v42  ;;  %v2990_v5 = vpop.f32.mrb[63].mxu1  ;;  %v3183_v41 = vpop.f32.mrb[95].mxu0 }
 0x5a0   : > { %v2989_v28 = vadd.f32 %v2988_v14, %v10438_v16  ;;  %v3182_v62 = vadd.f32 %v3181_v26, %v10442_v54  ;;  %v2991_v50 = vadd.f32 %v2990_v5, %v10451_v15  ;;  %v3184_v9 = vadd.f32 %v3183_v41, %v10453_v42 }
 0x5a1   : > { %v3764_v52 = vmax.f32 %v2985_v43, 0.0  ;;  %v3766_v12 = vmax.f32 %v3178_v29, 0.0  ;;  %v3765_v19 = vmax.f32 %v2987_v48, 0.0  ;;  %v3767_v49 = vmax.f32 %v3180_v34, 0.0 }
 0x5a2   : > { %v3772_v21 = vmax.f32 %v2989_v28, 0.0  ;;  %v3774_v60 = vmax.f32 %v3182_v62, 0.0  ;;  %v3773_v40 = vmax.f32 %v2991_v50, 0.0  ;;  %v3775_v10 = vmax.f32 %v3184_v9, 0.0 }
 0x5a3   : > { %v3921_v7 = vmax.f32 %v3920_v2, %v3764_v52  ;;  %v4257_v30 = vadd.f32 %v4256_v59, %v3764_v52  ;;  %v3963_v11 = vmax.f32 %v3962_v33, %v3766_v12  ;;  %v4299_v37 = vadd.f32 %v4298_v27, %v3766_v12 }
 0x5a4   : > { %v3942_v55 = vmax.f32 %v3941_v63, %v3765_v19  ;;  %v4278_v44 = vadd.f32 %v4277_v39, %v3765_v19  ;;  %v3984_v38 = vmax.f32 %v3983_v58, %v3767_v49  ;;  %v4320_v53 = vadd.f32 %v4319_v45, %v3767_v49  ;;  %v10553_v17 = vpop.f32.mrb[64].mxu1  ;;  %v10555_v46 = vpop.f32.mrb[96].mxu0 }
 0x5a5   : > { %v3922_v20 = vmax.f32 %v3921_v7, %v3772_v21  ;;  %v4258_v0 = vadd.f32 %v4257_v30, %v3772_v21  ;;  %v3964_v25 = vmax.f32 %v3963_v11, %v3774_v60  ;;  %v4300_v35 = vadd.f32 %v4299_v37, %v3774_v60  ;;  %v10557_v51 = vpop.f32.mrb[65].mxu1  ;;  %v10559_v47 = vpop.f32.mrb[97].mxu0 }
 0x5a6   : > { %v3943_v57 = vmax.f32 %v3942_v55, %v3773_v40  ;;  %v4279_v22 = vadd.f32 %v4278_v44, %v3773_v40  ;;  %v3985_v8 = vmax.f32 %v3984_v38, %v3775_v10  ;;  %v4321_v31 = vadd.f32 %v4320_v53, %v3775_v10  ;;  %v10561_v36 = vpop.f32.mrb[66].mxu1  ;;  %v10563_v23 = vpop.f32.mrb[98].mxu0 }
 0x5a7   : > { %v3923_v2 = vrot.slane %v3922_v20, 4  ;;  %v4259_v59 = vrot.slane %v4258_v0, 4  ;;  %v3965_v33 = vrot.slane %v3964_v25, 4  ;;  %v4301_v27 = vrot.slane %v4300_v35, 4  ;;  %v10565_v18 = vpop.f32.mrb[67].mxu1  ;;  %v10567_v56 = vpop.f32.mrb[99].mxu0 }
 0x5a8   : > { %v3944_v63 = vrot.slane %v3943_v57, 4  ;;  %v4280_v39 = vrot.slane %v4279_v22, 4  ;;  %v3986_v58 = vrot.slane %v3985_v8, 4  ;;  %v4322_v45 = vrot.slane %v4321_v31, 4 }
 0x5a9   : > { %v3924_v14 = vmax.f32 %v3922_v20, %v3923_v2  ;;  %v4260_v26 = vadd.f32 %v4259_v59, %v4258_v0  ;;  %v3966_v43 = vmax.f32 %v3964_v25, %v3965_v33  ;;  %v4302_v29 = vadd.f32 %v4301_v27, %v4300_v35 }
 0x5aa   : > { %v3945_v48 = vmax.f32 %v3943_v57, %v3944_v63  ;;  %v4281_v34 = vadd.f32 %v4280_v39, %v4279_v22  ;;  %v3987_v5 = vmax.f32 %v3985_v8, %v3986_v58  ;;  %v4323_v41 = vadd.f32 %v4322_v45, %v4321_v31  ;;  %v8473_v39 = vld [vmem:[#allocation12 + $0x148] sm:$0xff]  }
 0x5ab   : > { %v3925_v28 = vrot.slane %v3924_v14, 2  ;;  %v4261_v62 = vrot.slane %v4260_v26, 2  ;;  %v3967_v50 = vrot.slane %v3966_v43, 2  ;;  %v4303_v9 = vrot.slane %v4302_v29, 2  ;;  %7865 = vmatprep.subr.bf16.mxu0 %v8473_v39 }
 0x5ac   : > { %v3946_v52 = vrot.slane %v3945_v48, 2  ;;  %v4282_v12 = vrot.slane %v4281_v34, 2  ;;  %v3988_v19 = vrot.slane %v3987_v5, 2  ;;  %v4324_v49 = vrot.slane %v4323_v41, 2  ;;  %v10569_v13 = vpop.f32.mrb[68].mxu1  ;;  %v10571_v6 = vpop.f32.mrb[100].mxu0 }
 0x5ad   : > { %v3926_v21 = vmax.f32 %v3924_v14, %v3925_v28  ;;  %v4262_v60 = vadd.f32 %v4261_v62, %v4260_v26  ;;  %v3968_v40 = vmax.f32 %v3966_v43, %v3967_v50  ;;  %v4304_v10 = vadd.f32 %v4303_v9, %v4302_v29  ;;  %v10573_v7 = vpop.f32.mrb[69].mxu1  ;;  %v10575_v30 = vpop.f32.mrb[101].mxu0  ;;  %v8475_v62 = vld [vmem:[#allocation12 + $0x108] sm:$0xff]  }
 0x5ae   : > { %v3947_v11 = vmax.f32 %v3945_v48, %v3946_v52  ;;  %v4283_v37 = vadd.f32 %v4282_v12, %v4281_v34  ;;  %v3989_v61 = vmax.f32 %v3987_v5, %v3988_v19  ;;  %v4325_v55 = vadd.f32 %v4324_v49, %v4323_v41  ;;  %v10577_v44 = vpop.f32.mrb[70].mxu1  ;;  %v10579_v38 = vpop.f32.mrb[102].mxu0  ;;  %7866 = vmatpush3.bf16.msra.mxu0 %v8475_v62 }
 0x5af   : > { %v3927_v53 = vrot.slane %v3926_v21, 1  ;;  %v4263_v20 = vrot.slane %v4262_v60, 1  ;;  %v3969_v0 = vrot.slane %v3968_v40, 1  ;;  %v4305_v25 = vrot.slane %v4304_v10, 1  ;;  %v10581_v35 = vpop.f32.mrb[71].mxu1  ;;  %v10583_v57 = vpop.f32.mrb[103].mxu0 }
 0x5b0   : > { %v3948_v22 = vrot.slane %v3947_v11, 1  ;;  %v4284_v8 = vrot.slane %v4283_v37, 1  ;;  %v3990_v31 = vrot.slane %v3989_v61, 1  ;;  %v4326_v2 = vrot.slane %v4325_v55, 1 }
 0x5b1   : > { %v3928_v59 = vmax.f32 %v3926_v21, %v3927_v53  ;;  %v4264_v33 = vadd.f32 %v4263_v20, %v4262_v60  ;;  %v10585_v27 = vmax.f32 %v3968_v40, %v3969_v0  ;;  %v4306_v63 = vadd.f32 %v4305_v25, %v4304_v10 }
 0x5b2   : > { %v4285_v58 = vadd.f32 %v4284_v8, %v4283_v37  ;;  %v4327_v45 = vadd.f32 %v4326_v2, %v4325_v55  ;;  %v2218_v43 = vsub.s32 4, %v10416_v32  ;;  %v10590_v29 = vmax.f32 %v3947_v11, %v3948_v22 }
 0x5b3   : > { %v10587_v14 = vmul.f32 0.0078125, %v4264_v33  ;;  %v4597_v26 = vpack.c.bf16 %v3928_v59, %v3928_v59  ;;  %v10592_v48 = vmax.f32 %v3989_v61, %v3990_v31  ;;  %v2995_v34 = vadd.f32 %v10553_v17, %v10438_v16 }
 0x5b4   : > { %11941 = vst [vmem:[#allocation32_spill] sm:$0xff] %v10590_v29  ;;  %v3188_v5 = vadd.f32 %v10555_v46, %v10442_v54  ;;  %v10598_v41 = vpop.f32.mrb[72].mxu1  ;;  %v10600_v28 = vpop.f32.mrb[104].mxu0  ;;  %v10602_v50 = vmul.f32 0.0078125, %v4306_v63  ;;  %v4599_v9 = vpack.c.bf16 %v10585_v27, %v10585_v27  ;;  %v10606_v52 = vmul.f32 0.0078125, %v4285_v58 }
 0x5b5   : > { %11942 = vst [vmem:[#allocation33_spill] sm:$0xff] %v10592_v48  ;;  %v10608_v12 = vmul.f32 0.0078125, %v4327_v45  ;;  %v10610_v19 = vpop.f32.mrb[73].mxu1  ;;  %v10612_v17 = vpop.f32.mrb[105].mxu0  ;;  %v10616_v49 = vunpack.c.l.b16 %v4597_v26  ;;  %v2997_v21 = vadd.f32 %v10557_v51, %v10451_v15  ;;  %v3190_v60 = vadd.f32 %v10559_v47, %v10453_v42 }
 0x5b6   : > { %v10622_v40 = vpop.f32.mrb[74].mxu1  ;;  %v10624_v10 = vpop.f32.mrb[106].mxu0  ;;  %v3780_v11 = vmax.f32 %v2995_v34, 0.0  ;;  %v3782_v37 = vmax.f32 %v3188_v5, 0.0  ;;  %v2999_v61 = vadd.f32 %v10561_v36, %v10438_v16  ;;  %v3192_v55 = vadd.f32 %v10563_v23, %v10442_v54 }
 0x5b7   : > { %11943 = vst [vmem:[#allocation31_spill] sm:$0xff] %v10608_v12  ;;  %11944 = vst [vmem:[#allocation35_spill] sm:$0xff] %v10616_v49  ;;  %v10630_v53 = vpop.f32.mrb[75].mxu1  ;;  %v10632_v20 = vpop.f32.mrb[107].mxu0  ;;  %v3781_v51 = vmax.f32 %v2997_v21, 0.0  ;;  %v3783_v0 = vmax.f32 %v3190_v60, 0.0  ;;  %v3001_v47 = vadd.f32 %v10565_v18, %v10451_v15  ;;  %v3194_v25 = vadd.f32 %v10567_v56, %v10453_v42 }
 0x5b8   : > { %v3788_v22 = vmax.f32 %v2999_v61, 0.0  ;;  %v3790_v8 = vmax.f32 %v3192_v55, 0.0  ;;  %v3005_v36 = vadd.f32 %v10569_v13, %v10438_v16  ;;  %v3198_v23 = vadd.f32 %v10571_v6, %v10442_v54 }
 0x5b9   : > { %v3789_v31 = vmax.f32 %v3001_v47, 0.0  ;;  %v3791_v2 = vmax.f32 %v3194_v25, 0.0  ;;  %v3007_v59 = vadd.f32 %v10573_v7, %v10451_v15  ;;  %v3200_v33 = vadd.f32 %v10575_v30, %v10453_v42 }
 0x5ba   : > { %v4076_v18 = vmax.f32 %v3780_v11, %v3788_v22  ;;  %v4412_v63 = vadd.f32 %v3788_v22, %v3780_v11  ;;  %v4118_v39 = vmax.f32 %v3782_v37, %v3790_v8  ;;  %v4454_v56 = vadd.f32 %v3790_v8, %v3782_v37 }
 0x5bb   : > { %v4097_v58 = vmax.f32 %v3781_v51, %v3789_v31  ;;  %v4433_v45 = vadd.f32 %v3789_v31, %v3781_v51  ;;  %v4139_v26 = vmax.f32 %v3783_v0, %v3791_v2  ;;  %v4475_v34 = vadd.f32 %v3791_v2, %v3783_v0 }
 0x5bc   : > { %v10646_v13 = vpop.f32.mrb[76].mxu1  ;;  %v10648_v5 = vpop.f32.mrb[108].mxu0  ;;  %v3796_v6 = vmax.f32 %v3005_v36, 0.0  ;;  %v3798_v62 = vmax.f32 %v3198_v23, 0.0  ;;  %v3797_v21 = vmax.f32 %v3007_v59, 0.0  ;;  %v3799_v60 = vmax.f32 %v3200_v33, 0.0 }
 0x5bd   : > { %v10650_v7 = vpop.f32.mrb[77].mxu1  ;;  %v10652_v61 = vpop.f32.mrb[109].mxu0  ;;  %v3009_v30 = vadd.f32 %v10577_v44, %v10438_v16  ;;  %v3202_v11 = vadd.f32 %v10579_v38, %v10442_v54  ;;  %v3011_v37 = vadd.f32 %v10581_v35, %v10451_v15  ;;  %v3204_v55 = vadd.f32 %v10583_v57, %v10453_v42 }
 0x5be   : > { %v10662_v51 = vpop.f32.mrb[78].mxu1  ;;  %v10664_v0 = vpop.f32.mrb[110].mxu0  ;;  %v4077_v47 = vmax.f32 %v4076_v18, %v3796_v6  ;;  %v4413_v25 = vadd.f32 %v4412_v63, %v3796_v6  ;;  %v4119_v22 = vmax.f32 %v4118_v39, %v3798_v62  ;;  %v4455_v8 = vadd.f32 %v4454_v56, %v3798_v62  ;;  %v8483_v6 = vld [vmem:[#allocation12 + $0x110] sm:$0xff]  }
 0x5bf   : > { %v10666_v36 = vpop.f32.mrb[79].mxu1  ;;  %v10668_v44 = vpop.f32.mrb[111].mxu0  ;;  %v4098_v23 = vmax.f32 %v4097_v58, %v3797_v21  ;;  %v4434_v38 = vadd.f32 %v4433_v45, %v3797_v21  ;;  %v4140_v31 = vmax.f32 %v4139_v26, %v3799_v60  ;;  %v4476_v2 = vadd.f32 %v4475_v34, %v3799_v60  ;;  %v8482_v34 = vld [vmem:[#allocation12 + $0x150] sm:$0xff]  }
 0x5c0   : > { %v3804_v35 = vmax.f32 %v3009_v30, 0.0  ;;  %v3806_v59 = vmax.f32 %v3202_v11, 0.0  ;;  %v3805_v33 = vmax.f32 %v3011_v37, 0.0  ;;  %v3807_v57 = vmax.f32 %v3204_v55, 0.0  ;;  %7867 = vmatprep.subr.bf16.mxu0 %v8482_v34 }
 0x5c1   : > { %v3015_v3 = vadd.f32 %v10598_v41, %v10438_v16  ;;  %v3208_v18 = vadd.f32 %v10600_v28, %v10442_v54  ;;  %v3017_v63 = vadd.f32 %v10610_v19, %v10451_v15  ;;  %v3210_v39 = vadd.f32 %v10612_v17, %v10453_v42  ;;  %7868 = vmatpush3.bf16.msra.mxu0 %v8483_v6 }
 0x5c2   : > { %v4078_v56 = vmax.f32 %v4077_v47, %v3804_v35  ;;  %v4414_v58 = vadd.f32 %v4413_v25, %v3804_v35  ;;  %v4120_v45 = vmax.f32 %v4119_v22, %v3806_v59  ;;  %v4456_v26 = vadd.f32 %v4455_v8, %v3806_v59 }
 0x5c3   : > { %v4099_v62 = vmax.f32 %v4098_v23, %v3805_v33  ;;  %v4435_v21 = vadd.f32 %v4434_v38, %v3805_v33  ;;  %v4141_v60 = vmax.f32 %v4140_v31, %v3807_v57  ;;  %v4477_v30 = vadd.f32 %v4476_v2, %v3807_v57 }
 0x5c4   : > { %v10678_v41 = vpop.f32.mrb[80].mxu1  ;;  %v10680_v11 = vpop.f32.mrb[112].mxu0  ;;  %v3812_v28 = vmax.f32 %v3015_v3, 0.0  ;;  %v3814_v37 = vmax.f32 %v3208_v18, 0.0  ;;  %v3813_v19 = vmax.f32 %v3017_v63, 0.0  ;;  %v3815_v55 = vmax.f32 %v3210_v39, 0.0 }
 0x5c5   : > { %v10682_v1 = vpop.f32.mrb[81].mxu1  ;;  %v10684_v17 = vpop.f32.mrb[113].mxu0  ;;  %v3019_v47 = vadd.f32 %v10622_v40, %v10438_v16  ;;  %v3212_v25 = vadd.f32 %v10624_v10, %v10442_v54  ;;  %v3021_v22 = vadd.f32 %v10630_v53, %v10451_v15  ;;  %v3214_v3 = vadd.f32 %v10632_v20, %v10453_v42 }
 0x5c6   : > { %v10694_v8 = vpop.f32.mrb[82].mxu1  ;;  %v10696_v23 = vpop.f32.mrb[114].mxu0  ;;  %v4079_v38 = vmax.f32 %v4078_v56, %v3812_v28  ;;  %v4415_v31 = vadd.f32 %v4414_v58, %v3812_v28  ;;  %v4121_v2 = vmax.f32 %v4120_v45, %v3814_v37  ;;  %v4457_v35 = vadd.f32 %v4456_v26, %v3814_v37 }
 0x5c7   : > { %v10698_v59 = vpop.f32.mrb[83].mxu1  ;;  %v10700_v40 = vpop.f32.mrb[115].mxu0  ;;  %v4100_v10 = vmax.f32 %v4099_v62, %v3813_v19  ;;  %v4436_v33 = vadd.f32 %v4435_v21, %v3813_v19  ;;  %v4142_v57 = vmax.f32 %v4141_v60, %v3815_v55  ;;  %v4478_v53 = vadd.f32 %v4477_v30, %v3815_v55 }
 0x5c8   : > { %v3820_v18 = vmax.f32 %v3019_v47, 0.0  ;;  %v3822_v63 = vmax.f32 %v3212_v25, 0.0  ;;  %v3821_v20 = vmax.f32 %v3021_v22, 0.0  ;;  %v3823_v39 = vmax.f32 %v3214_v3, 0.0 }
 0x5c9   : > { %v3025_v34 = vadd.f32 %v10646_v13, %v10438_v16  ;;  %v3218_v56 = vadd.f32 %v10648_v5, %v10442_v54  ;;  %v3027_v58 = vadd.f32 %v10650_v7, %v10451_v15  ;;  %v3220_v45 = vadd.f32 %v10652_v61, %v10453_v42 }
 0x5ca   : > { %v4080_v26 = vmax.f32 %v4079_v38, %v3820_v18  ;;  %v4416_v6 = vadd.f32 %v4415_v31, %v3820_v18  ;;  %v4122_v62 = vmax.f32 %v4121_v2, %v3822_v63  ;;  %v4458_v21 = vadd.f32 %v4457_v35, %v3822_v63 }
 0x5cb   : > { %v4101_v60 = vmax.f32 %v4100_v10, %v3821_v20  ;;  %v4437_v30 = vadd.f32 %v4436_v33, %v3821_v20  ;;  %v4143_v28 = vmax.f32 %v4142_v57, %v3823_v39  ;;  %v4479_v37 = vadd.f32 %v4478_v53, %v3823_v39 }
 0x5cc   : > { %v10710_v19 = vpop.f32.mrb[84].mxu1  ;;  %v10712_v13 = vpop.f32.mrb[116].mxu0  ;;  %v3828_v55 = vmax.f32 %v3025_v34, 0.0  ;;  %v3830_v5 = vmax.f32 %v3218_v56, 0.0  ;;  %v3829_v47 = vmax.f32 %v3027_v58, 0.0  ;;  %v3831_v25 = vmax.f32 %v3220_v45, 0.0 }
 0x5cd   : > { %v10714_v7 = vpop.f32.mrb[85].mxu1  ;;  %v10716_v22 = vpop.f32.mrb[117].mxu0  ;;  %v3029_v61 = vadd.f32 %v10662_v51, %v10438_v16  ;;  %v3222_v3 = vadd.f32 %v10664_v0, %v10442_v54  ;;  %v3031_v38 = vadd.f32 %v10666_v36, %v10451_v15  ;;  %v3224_v31 = vadd.f32 %v10668_v44, %v10453_v42 }
 0x5ce   : > { %v10726_v2 = vpop.f32.mrb[86].mxu1  ;;  %v10728_v35 = vpop.f32.mrb[118].mxu0  ;;  %v4081_v10 = vmax.f32 %v4080_v26, %v3828_v55  ;;  %v4417_v33 = vadd.f32 %v4416_v6, %v3828_v55  ;;  %v4123_v57 = vmax.f32 %v4122_v62, %v3830_v5  ;;  %v4459_v53 = vadd.f32 %v4458_v21, %v3830_v5 }
 0x5cf   : > { %v10730_v18 = vpop.f32.mrb[87].mxu1  ;;  %v10732_v51 = vpop.f32.mrb[119].mxu0  ;;  %v4102_v63 = vmax.f32 %v4101_v60, %v3829_v47  ;;  %v4438_v0 = vadd.f32 %v4437_v30, %v3829_v47  ;;  %v4144_v20 = vmax.f32 %v4143_v28, %v3831_v25  ;;  %v4480_v39 = vadd.f32 %v4479_v37, %v3831_v25 }
 0x5d0   : > { %v3836_v36 = vmax.f32 %v3029_v61, 0.0  ;;  %v3838_v34 = vmax.f32 %v3222_v3, 0.0  ;;  %v3837_v56 = vmax.f32 %v3031_v38, 0.0  ;;  %v3839_v44 = vmax.f32 %v3224_v31, 0.0 }
 0x5d1   : > { %v3035_v58 = vadd.f32 %v10678_v41, %v10438_v16  ;;  %v3228_v45 = vadd.f32 %v10680_v11, %v10442_v54  ;;  %v3037_v26 = vadd.f32 %v10682_v1, %v10451_v15  ;;  %v3230_v6 = vadd.f32 %v10684_v17, %v10453_v42 }
 0x5d2   : > { %v4082_v62 = vmax.f32 %v4081_v10, %v3836_v36  ;;  %v4418_v21 = vadd.f32 %v4417_v33, %v3836_v36  ;;  %v4124_v60 = vmax.f32 %v4123_v57, %v3838_v34  ;;  %v4460_v30 = vadd.f32 %v4459_v53, %v3838_v34 }
 0x5d3   : > { %v4103_v28 = vmax.f32 %v4102_v63, %v3837_v56  ;;  %v4439_v37 = vadd.f32 %v4438_v0, %v3837_v56  ;;  %v4145_v55 = vmax.f32 %v4144_v20, %v3839_v44  ;;  %v4481_v5 = vadd.f32 %v4480_v39, %v3839_v44 }
 0x5d4   : > { %v10742_v47 = vpop.f32.mrb[88].mxu1  ;;  %v10744_v41 = vpop.f32.mrb[120].mxu0  ;;  %v3844_v25 = vmax.f32 %v3035_v58, 0.0  ;;  %v3846_v11 = vmax.f32 %v3228_v45, 0.0  ;;  %v3845_v61 = vmax.f32 %v3037_v26, 0.0  ;;  %v3847_v3 = vmax.f32 %v3230_v6, 0.0 }
 0x5d5   : > { %v10746_v1 = vpop.f32.mrb[89].mxu1  ;;  %v10748_v38 = vpop.f32.mrb[121].mxu0  ;;  %v3039_v17 = vadd.f32 %v10694_v8, %v10438_v16  ;;  %v3232_v31 = vadd.f32 %v10696_v23, %v10442_v54  ;;  %v3041_v10 = vadd.f32 %v10698_v59, %v10451_v15  ;;  %v3234_v33 = vadd.f32 %v10700_v40, %v10453_v42 }
 0x5d6   : > { %v10758_v57 = vpop.f32.mrb[90].mxu1  ;;  %v10760_v53 = vpop.f32.mrb[122].mxu0  ;;  %v4083_v63 = vmax.f32 %v4082_v62, %v3844_v25  ;;  %v4419_v0 = vadd.f32 %v4418_v21, %v3844_v25  ;;  %v4125_v20 = vmax.f32 %v4124_v60, %v3846_v11  ;;  %v4461_v39 = vadd.f32 %v4460_v30, %v3846_v11 }
 0x5d7   : > { %v10762_v36 = vpop.f32.mrb[91].mxu1  ;;  %v10764_v8 = vpop.f32.mrb[123].mxu0  ;;  %v4104_v34 = vmax.f32 %v4103_v28, %v3845_v61  ;;  %v4440_v23 = vadd.f32 %v4439_v37, %v3845_v61  ;;  %v4146_v56 = vmax.f32 %v4145_v55, %v3847_v3  ;;  %v4482_v44 = vadd.f32 %v4481_v5, %v3847_v3  ;;  %v8484_v3 = vld [vmem:[#allocation12 + $0x158] sm:$0xff]  }
 0x5d8   : > { %v3852_v59 = vmax.f32 %v3039_v17, 0.0  ;;  %v3854_v58 = vmax.f32 %v3232_v31, 0.0  ;;  %v3853_v45 = vmax.f32 %v3041_v10, 0.0  ;;  %v3855_v40 = vmax.f32 %v3234_v33, 0.0  ;;  %7869 = vmatprep.subr.bf16.mxu0 %v8484_v3 }
 0x5d9   : > { %v3045_v26 = vadd.f32 %v10710_v19, %v10438_v16  ;;  %v3238_v6 = vadd.f32 %v10712_v13, %v10442_v54  ;;  %v3047_v62 = vadd.f32 %v10714_v7, %v10451_v15  ;;  %v3240_v21 = vadd.f32 %v10716_v22, %v10453_v42 }
 0x5da   : > { %v4084_v60 = vmax.f32 %v4083_v63, %v3852_v59  ;;  %v4420_v30 = vadd.f32 %v4419_v0, %v3852_v59  ;;  %v4126_v28 = vmax.f32 %v4125_v20, %v3854_v58  ;;  %v4462_v37 = vadd.f32 %v4461_v39, %v3854_v58 }
 0x5db   : > { %v4105_v55 = vmax.f32 %v4104_v34, %v3853_v45  ;;  %v4441_v5 = vadd.f32 %v4440_v23, %v3853_v45  ;;  %v4147_v25 = vmax.f32 %v4146_v56, %v3855_v40  ;;  %v4483_v11 = vadd.f32 %v4482_v44, %v3855_v40 }
 0x5dc   : > { %v10774_v61 = vpop.f32.mrb[92].mxu1  ;;  %v10776_v19 = vpop.f32.mrb[124].mxu0  ;;  %v3860_v13 = vmax.f32 %v3045_v26, 0.0  ;;  %v3862_v17 = vmax.f32 %v3238_v6, 0.0  ;;  %v3861_v31 = vmax.f32 %v3047_v62, 0.0  ;;  %v3863_v7 = vmax.f32 %v3240_v21, 0.0 }
 0x5dd   : > { %v10778_v10 = vpop.f32.mrb[93].mxu1  ;;  %v10780_v22 = vpop.f32.mrb[125].mxu0  ;;  %v3049_v33 = vadd.f32 %v10726_v2, %v10438_v16  ;;  %v3242_v63 = vadd.f32 %v10728_v35, %v10442_v54  ;;  %v3051_v0 = vadd.f32 %v10730_v18, %v10451_v15  ;;  %v3244_v20 = vadd.f32 %v10732_v51, %v10453_v42  ;;  %v8485_v35 = vld [vmem:[#allocation12 + $0x118] sm:$0xff]  }
 0x5de   : > { %v10790_v39 = vpop.f32.mrb[94].mxu1  ;;  %v10792_v34 = vpop.f32.mrb[126].mxu0  ;;  %v4085_v23 = vmax.f32 %v4084_v60, %v3860_v13  ;;  %v4421_v56 = vadd.f32 %v4420_v30, %v3860_v13  ;;  %v4127_v44 = vmax.f32 %v4126_v28, %v3862_v17  ;;  %v4463_v59 = vadd.f32 %v4462_v37, %v3862_v17  ;;  %7870 = vmatpush3.bf16.msra.mxu0 %v8485_v35 }
 0x5df   : > { %v10794_v58 = vpop.f32.mrb[95].mxu1  ;;  %v10796_v2 = vpop.f32.mrb[127].mxu0  ;;  %v4106_v45 = vmax.f32 %v4105_v55, %v3861_v31  ;;  %v4442_v40 = vadd.f32 %v4441_v5, %v3861_v31  ;;  %v4148_v18 = vmax.f32 %v4147_v25, %v3863_v7  ;;  %v4484_v26 = vadd.f32 %v4483_v11, %v3863_v7 }
 0x5e0   : > { %v3868_v6 = vmax.f32 %v3049_v33, 0.0  ;;  %v3870_v51 = vmax.f32 %v3242_v63, 0.0  ;;  %v3869_v62 = vmax.f32 %v3051_v0, 0.0  ;;  %v3871_v21 = vmax.f32 %v3244_v20, 0.0 }
 0x5e1   : > { %v3055_v60 = vadd.f32 %v10742_v47, %v10438_v16  ;;  %v3248_v30 = vadd.f32 %v10744_v41, %v10442_v54  ;;  %v3057_v28 = vadd.f32 %v10746_v1, %v10451_v15  ;;  %v3250_v37 = vadd.f32 %v10748_v38, %v10453_v42 }
 0x5e2   : > { %v4086_v55 = vmax.f32 %v4085_v23, %v3868_v6  ;;  %v4422_v5 = vadd.f32 %v4421_v56, %v3868_v6  ;;  %v4128_v25 = vmax.f32 %v4127_v44, %v3870_v51  ;;  %v4464_v11 = vadd.f32 %v4463_v59, %v3870_v51 }
 0x5e3   : > { %v4107_v3 = vmax.f32 %v4106_v45, %v3869_v62  ;;  %v4443_v13 = vadd.f32 %v4442_v40, %v3869_v62  ;;  %v4149_v17 = vmax.f32 %v4148_v18, %v3871_v21  ;;  %v4485_v31 = vadd.f32 %v4484_v26, %v3871_v21 }
 0x5e4   : > { %v10806_v7 = vpop.f32.mrb[96].mxu1  ;;  %v10808_v47 = vpop.f32.mrb[128].mxu0  ;;  %v3876_v33 = vmax.f32 %v3055_v60, 0.0  ;;  %v3878_v41 = vmax.f32 %v3248_v30, 0.0  ;;  %v3877_v63 = vmax.f32 %v3057_v28, 0.0  ;;  %v3879_v0 = vmax.f32 %v3250_v37, 0.0 }
 0x5e5   : > { %v10810_v1 = vpop.f32.mrb[97].mxu1  ;;  %v10812_v20 = vpop.f32.mrb[129].mxu0  ;;  %v3059_v38 = vadd.f32 %v10758_v57, %v10438_v16  ;;  %v3252_v23 = vadd.f32 %v10760_v53, %v10442_v54  ;;  %v3061_v56 = vadd.f32 %v10762_v36, %v10451_v15  ;;  %v3254_v44 = vadd.f32 %v10764_v8, %v10453_v42 }
 0x5e6   : > { %v10822_v59 = vpop.f32.mrb[98].mxu1  ;;  %v10824_v35 = vpop.f32.mrb[130].mxu0  ;;  %v4087_v45 = vmax.f32 %v4086_v55, %v3876_v33  ;;  %v4423_v40 = vadd.f32 %v4422_v5, %v3876_v33  ;;  %v4129_v18 = vmax.f32 %v4128_v25, %v3878_v41  ;;  %v4465_v26 = vadd.f32 %v4464_v11, %v3878_v41 }
 0x5e7   : > { %v10826_v6 = vpop.f32.mrb[99].mxu1  ;;  %v10828_v57 = vpop.f32.mrb[131].mxu0  ;;  %v4108_v51 = vmax.f32 %v4107_v3, %v3877_v63  ;;  %v4444_v53 = vadd.f32 %v4443_v13, %v3877_v63  ;;  %v4150_v62 = vmax.f32 %v4149_v17, %v3879_v0  ;;  %v4486_v21 = vadd.f32 %v4485_v31, %v3879_v0  ;;  %v8486_v0 = vld [vmem:[#allocation12 + $0x160] sm:$0xff]  }
 0x5e8   : > { %v3884_v36 = vmax.f32 %v3059_v38, 0.0  ;;  %v3886_v60 = vmax.f32 %v3252_v23, 0.0  ;;  %v3885_v30 = vmax.f32 %v3061_v56, 0.0  ;;  %v3887_v8 = vmax.f32 %v3254_v44, 0.0  ;;  %7871 = vmatprep.subr.bf16.mxu0 %v8486_v0 }
 0x5e9   : > { %v3065_v28 = vadd.f32 %v10774_v61, %v10438_v16  ;;  %v3258_v37 = vadd.f32 %v10776_v19, %v10442_v54  ;;  %v3067_v55 = vadd.f32 %v10778_v10, %v10451_v15  ;;  %v3260_v5 = vadd.f32 %v10780_v22, %v10453_v42 }
 0x5ea   : > { %v4088_v25 = vmax.f32 %v4087_v45, %v3884_v36  ;;  %v4424_v11 = vadd.f32 %v4423_v40, %v3884_v36  ;;  %v4130_v3 = vmax.f32 %v4129_v18, %v3886_v60  ;;  %v4466_v13 = vadd.f32 %v4465_v26, %v3886_v60 }
 0x5eb   : > { %v4109_v17 = vmax.f32 %v4108_v51, %v3885_v30  ;;  %v4445_v31 = vadd.f32 %v4444_v53, %v3885_v30  ;;  %v4151_v33 = vmax.f32 %v4150_v62, %v3887_v8  ;;  %v4487_v41 = vadd.f32 %v4486_v21, %v3887_v8 }
 0x5ec   : > { %v10838_v63 = vpop.f32.mrb[100].mxu1  ;;  %v10840_v61 = vpop.f32.mrb[132].mxu0  ;;  %v3892_v19 = vmax.f32 %v3065_v28, 0.0  ;;  %v3894_v38 = vmax.f32 %v3258_v37, 0.0  ;;  %v3893_v23 = vmax.f32 %v3067_v55, 0.0  ;;  %v3895_v10 = vmax.f32 %v3260_v5, 0.0 }
 0x5ed   : > { %v10842_v56 = vpop.f32.mrb[101].mxu1  ;;  %v10844_v22 = vpop.f32.mrb[133].mxu0  ;;  %v3069_v44 = vadd.f32 %v10790_v39, %v10438_v16  ;;  %v3262_v45 = vadd.f32 %v10792_v34, %v10442_v54  ;;  %v3071_v40 = vadd.f32 %v10794_v58, %v10451_v15  ;;  %v3264_v18 = vadd.f32 %v10796_v2, %v10453_v42  ;;  %v8487_v54 = vld [vmem:[#allocation12 + $0x120] sm:$0xff]   ;;  %v10872_v55 = vld [vmem:[%s11939_s5] sm:$0xff] }
 0x5ee   : > { %v10854_v26 = vpop.f32.mrb[102].mxu1  ;;  %v10856_v51 = vpop.f32.mrb[134].mxu0  ;;  %v4089_v53 = vmax.f32 %v4088_v25, %v3892_v19  ;;  %v4425_v62 = vadd.f32 %v4424_v11, %v3892_v19  ;;  %v4131_v21 = vmax.f32 %v4130_v3, %v3894_v38  ;;  %v4467_v36 = vadd.f32 %v4466_v13, %v3894_v38  ;;  %7872 = vmatpush3.bf16.msra.mxu0 %v8487_v54 }
 0x5ef   : > { %v10858_v60 = vpop.f32.mrb[103].mxu1  ;;  %v10860_v16 = vpop.f32.mrb[135].mxu0  ;;  %v4110_v39 = vmax.f32 %v4109_v17, %v3893_v23  ;;  %v4446_v34 = vadd.f32 %v4445_v31, %v3893_v23  ;;  %v4152_v15 = vmax.f32 %v4151_v33, %v3895_v10  ;;  %v4488_v58 = vadd.f32 %v4487_v41, %v3895_v10 }
 0x5f0   : > { %v3900_v30 = vmax.f32 %v3069_v44, 0.0  ;;  %v3902_v42 = vmax.f32 %v3262_v45, 0.0  ;;  %v3901_v2 = vmax.f32 %v3071_v40, 0.0  ;;  %v3903_v8 = vmax.f32 %v3264_v18, 0.0 }
 0x5f1   : > { %v10867_v37 = vunpack.c.l.b16 %v4599_v9  ;;  %v10877_v5 = vrot.slane %v10872_v55, %v2218_v43 }
 0x5f2   : > { %v4090_v11 = vmax.f32 %v4089_v53, %v3900_v30  ;;  %v4426_v3 = vadd.f32 %v4425_v62, %v3900_v30  ;;  %v4132_v13 = vmax.f32 %v4131_v21, %v3902_v42  ;;  %v4468_v17 = vadd.f32 %v4467_v36, %v3902_v42 }
 0x5f3   : > { %11945 = vst [vmem:[#allocation36_spill] sm:$0xff] %v10867_v37  ;;  %v4111_v31 = vmax.f32 %v4110_v39, %v3901_v2  ;;  %v4447_v27 = vadd.f32 %v4446_v34, %v3901_v2  ;;  %v4153_v9 = vmax.f32 %v4152_v15, %v3903_v8  ;;  %v4489_v33 = vadd.f32 %v4488_v58, %v3903_v8 }
 0x5f4   : > { %v10880_v41 = vpop.f32.mrb[104].mxu1  ;;  %v10882_v0 = vpop.f32.mrb[136].mxu0  ;;  %v4091_v19 = vrot.slane %v4090_v11, 4  ;;  %v4427_v38 = vrot.slane %v4426_v3, 4  ;;  %v4133_v23 = vrot.slane %v4132_v13, 4  ;;  %v4469_v10 = vrot.slane %v4468_v17, 4 }
 0x5f5   : > { %v10884_v43 = vpop.f32.mrb[105].mxu1  ;;  %v10886_v44 = vpop.f32.mrb[137].mxu0  ;;  %v4112_v45 = vrot.slane %v4111_v31, 4  ;;  %v4448_v40 = vrot.slane %v4447_v27, 4  ;;  %v4154_v18 = vrot.slane %v4153_v9, 4  ;;  %v4490_v53 = vrot.slane %v4489_v33, 4 }
 0x5f6   : > { %v10888_v62 = vpop.f32.mrb[106].mxu1  ;;  %v10890_v21 = vpop.f32.mrb[138].mxu0  ;;  %v4092_v36 = vmax.f32 %v4090_v11, %v4091_v19  ;;  %v4428_v54 = vadd.f32 %v4427_v38, %v4426_v3  ;;  %v4134_v39 = vmax.f32 %v4132_v13, %v4133_v23  ;;  %v4470_v34 = vadd.f32 %v4469_v10, %v4468_v17 }
 0x5f7   : > { %v10892_v15 = vpop.f32.mrb[107].mxu1  ;;  %v10894_v58 = vpop.f32.mrb[139].mxu0  ;;  %v4113_v30 = vmax.f32 %v4111_v31, %v4112_v45  ;;  %v4449_v42 = vadd.f32 %v4448_v40, %v4447_v27  ;;  %v4155_v2 = vmax.f32 %v4153_v9, %v4154_v18  ;;  %v4491_v8 = vadd.f32 %v4490_v53, %v4489_v33  ;;  %v8488_v9 = vld [vmem:[#allocation12 + $0x168] sm:$0xff]  }
 0x5f8   : > { %v4093_v25 = vrot.slane %v4092_v36, 2  ;;  %v4429_v28 = vrot.slane %v4428_v54, 2  ;;  %v4135_v46 = vrot.slane %v4134_v39, 2  ;;  %v4471_v24 = vrot.slane %v4470_v34, 2  ;;  %7873 = vmatprep.subr.bf16.mxu0 %v8488_v9 }
 0x5f9   : > { %v4114_v4 = vrot.slane %v4113_v30, 2  ;;  %v4450_v37 = vrot.slane %v4449_v42, 2  ;;  %v4156_v49 = vrot.slane %v4155_v2, 2  ;;  %v4492_v48 = vrot.slane %v4491_v8, 2 }
 0x5fa   : > { %v4094_v11 = vmax.f32 %v4092_v36, %v4093_v25  ;;  %v4430_v3 = vadd.f32 %v4429_v28, %v4428_v54  ;;  %v4136_v13 = vmax.f32 %v4134_v39, %v4135_v46  ;;  %v4472_v17 = vadd.f32 %v4471_v24, %v4470_v34 }
 0x5fb   : > { %v4115_v19 = vmax.f32 %v4113_v30, %v4114_v4  ;;  %v4451_v38 = vadd.f32 %v4450_v37, %v4449_v42  ;;  %v4157_v23 = vmax.f32 %v4155_v2, %v4156_v49  ;;  %v4493_v10 = vadd.f32 %v4492_v48, %v4491_v8  ;;  %v8489_v2 = vld [vmem:[#allocation12 + $0x128] sm:$0xff]  }
 0x5fc   : > { %v10896_v31 = vpop.f32.mrb[108].mxu1  ;;  %v10898_v27 = vpop.f32.mrb[140].mxu0  ;;  %v4095_v33 = vrot.slane %v4094_v11, 1  ;;  %v4431_v45 = vrot.slane %v4430_v3, 1  ;;  %v4137_v40 = vrot.slane %v4136_v13, 1  ;;  %v4473_v18 = vrot.slane %v4472_v17, 1  ;;  %7874 = vmatpush3.bf16.msra.mxu0 %v8489_v2 }
 0x5fd   : > { %v10900_v53 = vpop.f32.mrb[109].mxu1  ;;  %v10902_v29 = vpop.f32.mrb[141].mxu0  ;;  %v4116_v28 = vrot.slane %v4115_v19, 1  ;;  %v4452_v46 = vrot.slane %v4451_v38, 1  ;;  %v4158_v24 = vrot.slane %v4157_v23, 1  ;;  %v4494_v4 = vrot.slane %v4493_v10, 1 }
 0x5fe   : > { %v10904_v37 = vpop.f32.mrb[110].mxu1  ;;  %v10906_v48 = vpop.f32.mrb[142].mxu0  ;;  %v11948_v49 = vpack.c.bf16 %v10587_v14, %v10587_v14  ;;  %v11949_v36 = vpack.c.bf16 %v10602_v50, %v10602_v50  ;;  %v4432_v39 = vadd.f32 %v4431_v45, %v4430_v3  ;;  %v4474_v34 = vadd.f32 %v4473_v18, %v4472_v17 }
 0x5ff   : > { %11946 = vst [vmem:[#allocation37_spill] sm:$0xff] %v10904_v37  ;;  %11947 = vst [vmem:[#allocation38_spill] sm:$0xff] %v10906_v48  ;;  %v10918_v30 = vpop.f32.mrb[111].mxu1  ;;  %v10920_v42 = vpop.f32.mrb[143].mxu0  ;;  %v4453_v8 = vadd.f32 %v4452_v46, %v4451_v38  ;;  %v4495_v48 = vadd.f32 %v4494_v4, %v4493_v10  ;;  %v2222_v9 = vsub.s32 5, %v10416_v32  ;;  %v2230_v14 = vsub.s32 7, %v10416_v32 }
 0x600   : > { %v10911_v25 = vunpack.c.l.b16 %v11948_v49  ;;  %v10916_v54 = vunpack.c.l.b16 %v11949_v36  ;;  %v10924_v49 = vmax.f32 %v4094_v11, %v4095_v33  ;;  %v4589_v37 = vmul.f32 0.0078125, %v4432_v39 }
 0x601   : > { %v10926_v12 = vmax.f32 %v4136_v13, %v4137_v40  ;;  %v4591_v50 = vmul.f32 0.0078125, %v4474_v34  ;;  %v10928_v3 = vmax.f32 %v4115_v19, %v4116_v28  ;;  %v10930_v17 = vmax.f32 %v4157_v23, %v4158_v24 }
 0x602   : > { %11950 = vst [vmem:[#allocation39_spill] sm:$0xff] %v10916_v54  ;;  %11951 = vst [vmem:[#allocation40_spill] sm:$0xff] %v10924_v49  ;;  %v3301_v45 = vadd.f32 %v10806_v7, %v10877_v5  ;;  %v11955_v38 = vsub.s32 6, %v10416_v32  ;;  %v4749_v18 = vpack.c.bf16 %v4589_v37, %v4589_v37  ;;  %v10939_v33 = vmul.f32 0.0078125, %v4453_v8 }
 0x603   : > { %11952 = vst [vmem:[#allocation41_spill] sm:$0xff] %v10926_v12  ;;  %11953 = vst [vmem:[#allocation42_spill] sm:$0xff] %v10928_v3  ;;  %v4751_v11 = vpack.c.bf16 %v4591_v50, %v4591_v50  ;;  %v10941_v13 = vmul.f32 0.0078125, %v4495_v48  ;;  %v10946_v23 = vrot.slane %v10872_v55, %v2222_v9  ;;  %v10949_v7 = vrot.slane %v10872_v55, %v2230_v14 }
 0x604   : > { %11954 = vst [vmem:[#allocation43_spill] sm:$0xff] %v10930_v17  ;;  %v10937_v10 = vrot.slane %v10872_v55, %v11955_v38  ;;  %v3656_v40 = vmax.f32 %v3301_v45, 0.0  ;;  %v10951_v28 = vpop.f32.mrb[112].mxu1  ;;  %v10953_v46 = vpop.f32.mrb[144].mxu0  ;;  %v10955_v24 = vunpack.c.l.b16 %v4749_v18  ;;  %v3305_v37 = vadd.f32 %v10822_v59, %v10877_v5 }
 0x605   : > { %v10957_v4 = vunpack.c.l.b16 %v4751_v11  ;;  %v10963_v48 = vpop.f32.mrb[113].mxu1  ;;  %v10965_v36 = vpop.f32.mrb[145].mxu0  ;;  %v3303_v39 = vadd.f32 %v10810_v1, %v10946_v23  ;;  %v3496_v34 = vadd.f32 %v10812_v20, %v10949_v7  ;;  %v3307_v2 = vadd.f32 %v10826_v6, %v10946_v23 }
 0x606   : > { %v3494_v19 = vadd.f32 %v10808_v47, %v10937_v10  ;;  %v3498_v47 = vadd.f32 %v10824_v35, %v10937_v10  ;;  %v10973_v8 = vpop.f32.mrb[114].mxu1  ;;  %v10975_v59 = vpop.f32.mrb[146].mxu0  ;;  %v3664_v9 = vmax.f32 %v3305_v37, 0.0  ;;  %v3500_v14 = vadd.f32 %v10828_v57, %v10949_v7 }
 0x607   : > { %11956 = vst [vmem:[#allocation44_spill] sm:$0xff] %v10957_v4  ;;  %v3311_v50 = vadd.f32 %v10838_v63, %v10877_v5  ;;  %v10981_v45 = vpop.f32.mrb[115].mxu1  ;;  %v10983_v1 = vpop.f32.mrb[147].mxu0  ;;  %v3657_v20 = vmax.f32 %v3303_v39, 0.0  ;;  %v3659_v38 = vmax.f32 %v3496_v34, 0.0  ;;  %v3665_v18 = vmax.f32 %v3307_v2, 0.0 }
 0x608   : > { %v3658_v55 = vmax.f32 %v3494_v19, 0.0  ;;  %v3666_v35 = vmax.f32 %v3498_v47, 0.0  ;;  %v3504_v6 = vadd.f32 %v10840_v61, %v10937_v10  ;;  %v3992_v11 = vmax.f32 %v3656_v40, %v3664_v9 }
 0x609   : > { %v4328_v19 = vadd.f32 %v3664_v9, %v3656_v40  ;;  %v4013_v32 = vmax.f32 %v3657_v20, %v3665_v18  ;;  %v4349_v17 = vadd.f32 %v3665_v18, %v3657_v20  ;;  %v3667_v57 = vmax.f32 %v3500_v14, 0.0 }
 0x60a   : > { %v4034_v37 = vmax.f32 %v3658_v55, %v3666_v35  ;;  %v4370_v47 = vadd.f32 %v3666_v35, %v3658_v55  ;;  %v3672_v3 = vmax.f32 %v3311_v50, 0.0  ;;  %v3674_v12 = vmax.f32 %v3504_v6, 0.0  ;;  %v8490_v35 = vld [vmem:[#allocation12 + $0x170] sm:$0xff]  }
 0x60b   : > { %v3313_v63 = vadd.f32 %v10842_v56, %v10946_v23  ;;  %v3506_v39 = vadd.f32 %v10844_v22, %v10949_v7  ;;  %v3315_v34 = vadd.f32 %v10854_v26, %v10877_v5  ;;  %v4055_v2 = vmax.f32 %v3659_v38, %v3667_v57  ;;  %7875 = vmatprep.subr.bf16.mxu0 %v8490_v35 }
 0x60c   : > { %v4391_v61 = vadd.f32 %v3667_v57, %v3659_v38  ;;  %v3993_v49 = vmax.f32 %v3992_v11, %v3672_v3  ;;  %v4329_v40 = vadd.f32 %v4328_v19, %v3672_v3  ;;  %v10993_v9 = vpop.f32.mrb[116].mxu1  ;;  %v10995_v55 = vpop.f32.mrb[148].mxu0  ;;  %v4035_v14 = vmax.f32 %v4034_v37, %v3674_v12 }
 0x60d   : > { %v4371_v50 = vadd.f32 %v4370_v47, %v3674_v12  ;;  %v3673_v20 = vmax.f32 %v3313_v63, 0.0  ;;  %v3675_v18 = vmax.f32 %v3506_v39, 0.0  ;;  %v10997_v56 = vpop.f32.mrb[117].mxu1  ;;  %v10999_v6 = vpop.f32.mrb[149].mxu0  ;;  %v3680_v22 = vmax.f32 %v3315_v34, 0.0 }
 0x60e   : > { %11957 = vst [vmem:[#allocation45_spill] sm:$0xff] %v10999_v6  ;;  %v3508_v26 = vadd.f32 %v10856_v51, %v10937_v10  ;;  %v3317_v3 = vadd.f32 %v10858_v60, %v10946_v23  ;;  %v3510_v38 = vadd.f32 %v10860_v16, %v10949_v7  ;;  %v11007_v11 = vpop.f32.mrb[118].mxu1  ;;  %v11009_v19 = vpop.f32.mrb[150].mxu0  ;;  %v8492_v51 = vld [vmem:[#allocation12 + $0x130] sm:$0xff]   ;;  %v3321_v16 = vadd.f32 %v10880_v41, %v10877_v5 }
 0x60f   : > { %v4014_v12 = vmax.f32 %v4013_v32, %v3673_v20  ;;  %v4350_v37 = vadd.f32 %v4349_v17, %v3673_v20  ;;  %v4056_v47 = vmax.f32 %v4055_v2, %v3675_v18  ;;  %v4392_v57 = vadd.f32 %v4391_v61, %v3675_v18  ;;  %v11011_v63 = vpop.f32.mrb[119].mxu1  ;;  %v11013_v39 = vpop.f32.mrb[151].mxu0  ;;  %7876 = vmatpush3.bf16.msra.mxu0 %v8492_v51 }
 0x610   : > { %v3994_v34 = vmax.f32 %v3993_v49, %v3680_v22  ;;  %v4330_v4 = vadd.f32 %v4329_v40, %v3680_v22  ;;  %v3682_v60 = vmax.f32 %v3508_v26, 0.0  ;;  %v3681_v54 = vmax.f32 %v3317_v3, 0.0 }
 0x611   : > { %v3683_v6 = vmax.f32 %v3510_v38, 0.0  ;;  %v3514_v35 = vadd.f32 %v10882_v0, %v10937_v10  ;;  %v3323_v32 = vadd.f32 %v10884_v43, %v10946_v23  ;;  %v3688_v40 = vmax.f32 %v3321_v16, 0.0 }
 0x612   : > { %v4036_v17 = vmax.f32 %v4035_v14, %v3682_v60  ;;  %v4372_v2 = vadd.f32 %v4371_v50, %v3682_v60  ;;  %v4015_v61 = vmax.f32 %v4014_v12, %v3681_v54  ;;  %v4351_v20 = vadd.f32 %v4350_v37, %v3681_v54 }
 0x613   : > { %v4057_v18 = vmax.f32 %v4056_v47, %v3683_v6  ;;  %v4393_v49 = vadd.f32 %v4392_v57, %v3683_v6  ;;  %v3690_v22 = vmax.f32 %v3514_v35, 0.0  ;;  %v3689_v26 = vmax.f32 %v3323_v32, 0.0 }
 0x614   : > { %v3516_v3 = vadd.f32 %v10886_v44, %v10949_v7  ;;  %v3325_v41 = vadd.f32 %v10888_v62, %v10877_v5  ;;  %v3518_v0 = vadd.f32 %v10890_v21, %v10937_v10  ;;  %v11027_v43 = vpop.f32.mrb[120].mxu1  ;;  %v11029_v14 = vpop.f32.mrb[152].mxu0  ;;  %v3995_v50 = vmax.f32 %v3994_v34, %v3688_v40 }
 0x615   : > { %v4331_v54 = vadd.f32 %v4330_v4, %v3688_v40  ;;  %v4037_v38 = vmax.f32 %v4036_v17, %v3690_v22  ;;  %v4373_v6 = vadd.f32 %v4372_v2, %v3690_v22  ;;  %v11031_v12 = vpop.f32.mrb[121].mxu1  ;;  %v11033_v37 = vpop.f32.mrb[153].mxu0  ;;  %v4016_v47 = vmax.f32 %v4015_v61, %v3689_v26 }
 0x616   : > { %v4352_v44 = vadd.f32 %v4351_v20, %v3689_v26  ;;  %v3691_v57 = vmax.f32 %v3516_v3, 0.0  ;;  %v3696_v51 = vmax.f32 %v3325_v41, 0.0  ;;  %v11035_v62 = vpop.f32.mrb[122].mxu1  ;;  %v11037_v60 = vpop.f32.mrb[154].mxu0  ;;  %v3698_v21 = vmax.f32 %v3518_v0, 0.0 }
 0x617   : > { %v3327_v16 = vadd.f32 %v10892_v15, %v10946_v23  ;;  %v3520_v4 = vadd.f32 %v10894_v58, %v10949_v7  ;;  %v4742_v34 = vpack.c.bf16 %v10606_v52, %v10606_v52  ;;  %v11045_v35 = vpop.f32.mrb[123].mxu1  ;;  %v11047_v32 = vpop.f32.mrb[155].mxu0  ;;  %v4750_v15 = vpack.c.bf16 %v10939_v33, %v10939_v33 }
 0x618   : > { %11958 = vst [vmem:[#allocation46_spill] sm:$0xff] %v11045_v35  ;;  %11959 = vst [vmem:[#allocation47_spill] sm:$0xff] %v11047_v32  ;;  %v4058_v17 = vmax.f32 %v4057_v18, %v3691_v57  ;;  %v4394_v2 = vadd.f32 %v4393_v49, %v3691_v57  ;;  %v3996_v61 = vmax.f32 %v3995_v50, %v3696_v51 }
 0x619   : > { %v4332_v20 = vadd.f32 %v4331_v54, %v3696_v51  ;;  %v4038_v40 = vmax.f32 %v4037_v38, %v3698_v21  ;;  %v4374_v22 = vadd.f32 %v4373_v6, %v3698_v21  ;;  %v3697_v26 = vmax.f32 %v3327_v16, 0.0 }
 0x61a   : > { %v3699_v3 = vmax.f32 %v3520_v4, 0.0  ;;  %v4902_v41 = vunpack.c.l.b16 %v4742_v34  ;;  %v3331_v52 = vadd.f32 %v10896_v31, %v10877_v5  ;;  %v4910_v18 = vunpack.c.l.b16 %v4750_v15 }
 0x61b   : > { %v4017_v58 = vmax.f32 %v4016_v47, %v3697_v26  ;;  %v4353_v0 = vadd.f32 %v4352_v44, %v3697_v26  ;;  %v3524_v50 = vadd.f32 %v10898_v27, %v10937_v10  ;;  %v4918_v54 = vsel %vm4917_vm7, %v10955_v24, %v10911_v25  ;;  %v11960_v44 = vld [vmem:[#allocation31_spill] sm:$0xff] }
 0x61c   : > { %v4059_v35 = vmax.f32 %v4058_v17, %v3699_v3  ;;  %v4395_v32 = vadd.f32 %v4394_v2, %v3699_v3  ;;  %v3704_v49 = vmax.f32 %v3331_v52, 0.0  ;;  %v11058_v38 = vpop.f32.mrb[124].mxu1  ;;  %v11060_v33 = vpop.f32.mrb[156].mxu0  ;;  %v4926_v6 = vpack.c.b16 %v4918_v54, %v4918_v54  ;;  %v8464_v17 = vld [vmem:[#allocation12 + $0x80] sm:$0xff]  }
 0x61d   : > { %v3333_v31 = vadd.f32 %v10900_v53, %v10946_v23  ;;  %v3526_v47 = vadd.f32 %v10902_v29, %v10949_v7  ;;  %v4744_v57 = vpack.c.bf16 %v11960_v44, %v11960_v44  ;;  %v11068_v51 = vpop.f32.mrb[125].mxu1  ;;  %v11070_v27 = vpop.f32.mrb[157].mxu0  ;;  %v4919_v25 = vsel %vm4917_vm7, %v4910_v18, %v4902_v41 }
 0x61e   : > { %v3997_v24 = vmax.f32 %v3996_v61, %v3704_v49  ;;  %v4333_v21 = vadd.f32 %v4332_v20, %v3704_v49  ;;  %v3706_v16 = vmax.f32 %v3524_v50, 0.0  ;;  %v11073_v4 = vpop.f32.mrb[126].mxu1  ;;  %v11075_v34 = vpop.f32.mrb[158].mxu0  ;;  %v4927_v53 = vpack.c.b16 %v4919_v25, %v4919_v25  ;;  %v11962_v20 = vld [vmem:[#allocation37_spill] sm:$0xff] }
 0x61f   : > { %v3705_v2 = vmax.f32 %v3333_v31, 0.0  ;;  %v3707_v29 = vmax.f32 %v3526_v47, 0.0  ;;  %v4752_v26 = vpack.c.bf16 %v10941_v13, %v10941_v13  ;;  %v11079_v3 = vpop.f32.mrb[127].mxu1  ;;  %v11081_v15 = vpop.f32.mrb[159].mxu0  ;;  %v4904_v61 = vunpack.c.l.b16 %v4744_v57  ;;  %v8466_v49 = vld [vmem:[#allocation12 + $0xc8] sm:$0xff]   ;;  %v11963_v13 = vld [vmem:[#allocation38_spill] sm:$0xff] }
 0x620   : > { %11961 = vst [vmem:[#allocation31_spill] sm:$0xff] %v11079_v3  ;;  %v4039_v52 = vmax.f32 %v4038_v40, %v3706_v16  ;;  %v4375_v41 = vadd.f32 %v4374_v22, %v3706_v16  ;;  %v3335_v18 = vadd.f32 %v11962_v20, %v10877_v5  ;;  %5358 = vmatprep.mubr.bf16.mxu1 %v4927_v53 }
 0x621   : > { %v4018_v50 = vmax.f32 %v4017_v58, %v3705_v2  ;;  %v4354_v54 = vadd.f32 %v4353_v0, %v3705_v2  ;;  %v4060_v44 = vmax.f32 %v4059_v35, %v3707_v29  ;;  %v4396_v31 = vadd.f32 %v4395_v32, %v3707_v29  ;;  %5359 = vmatmul.mubr.bf16.vlgmr.msra.gmra.mrb[160].mxu1 %v4926_v6  ;;  %v8468_v29 = vld [vmem:[#allocation12 + $0xd0] sm:$0xff]  }
 0x622   : > { %v4912_v47 = vunpack.c.l.b16 %v4752_v26  ;;  %v3712_v25 = vmax.f32 %v3335_v18, 0.0  ;;  %v3528_v3 = vadd.f32 %v11963_v13, %v10937_v10  ;;  %v3337_v40 = vadd.f32 %v10918_v30, %v10946_v23  ;;  %7842 = vmatpush3.bf16.msra.mxu1 %v8464_v17  ;;  %v8467_v30 = vld [vmem:[#allocation12 + $0x88] sm:$0xff]  }
 0x623   : > { %v3530_v22 = vadd.f32 %v10920_v42, %v10949_v7  ;;  %v3341_v57 = vadd.f32 %v10951_v28, %v10877_v5  ;;  %v3534_v35 = vadd.f32 %v10953_v46, %v10937_v10  ;;  %v3343_v32 = vadd.f32 %v10963_v48, %v10946_v23  ;;  %7843 = vmatprep.subr.bf16.mxu1 %v8466_v49 }
 0x624   : > { %v4921_v58 = vsel %vm4917_vm7, %v4912_v47, %v4904_v61  ;;  %v3998_v0 = vmax.f32 %v3997_v24, %v3712_v25  ;;  %v4334_v6 = vadd.f32 %v4333_v21, %v3712_v25  ;;  %v3714_v16 = vmax.f32 %v3528_v3, 0.0  ;;  %v11098_v53 = vpop.f32.mrb[128].mxu1  ;;  %v11100_v17 = vpop.f32.mrb[160].mxu0 }
 0x625   : > { %v4929_v42 = vpack.c.b16 %v4921_v58, %v4921_v58  ;;  %v3713_v2 = vmax.f32 %v3337_v40, 0.0  ;;  %v3715_v28 = vmax.f32 %v3530_v22, 0.0  ;;  %v3720_v26 = vmax.f32 %v3341_v57, 0.0  ;;  %v11102_v46 = vpop.f32.mrb[129].mxu1  ;;  %v11104_v20 = vpop.f32.mrb[161].mxu0 }
 0x626   : > { %v4040_v48 = vmax.f32 %v4039_v52, %v3714_v16  ;;  %v4376_v61 = vadd.f32 %v4375_v41, %v3714_v16  ;;  %v3722_v24 = vmax.f32 %v3534_v35, 0.0  ;;  %v3721_v21 = vmax.f32 %v3343_v32, 0.0  ;;  %v11106_v3 = vpop.f32.mrb[130].mxu1  ;;  %v11108_v18 = vpop.f32.mrb[162].mxu0  ;;  %7844 = vmatpush3.bf16.msra.mxu1 %v8467_v30  ;;  %v8469_v35 = vld [vmem:[#allocation12 + $0x90] sm:$0xff]   ;;  %v8500_v32 = vld [vmem:[#allocation12 + $0x178] sm:$0xff]  }
 0x627   : > { %11964 = vst [vmem:[#allocation37_spill] sm:$0xff] %v11106_v3  ;;  %11965 = vst [vmem:[#allocation38_spill] sm:$0xff] %v11108_v18  ;;  %5398 = vmatprep.mubr.bf16.mxu1 %v4929_v42  ;;  %v4019_v49 = vmax.f32 %v4018_v50, %v3713_v2  ;;  %v4355_v47 = vadd.f32 %v4354_v54, %v3713_v2  ;;  %v4061_v25 = vmax.f32 %v4060_v44, %v3715_v28  ;;  %v11110_v40 = vpop.f32.mrb[131].mxu1  ;;  %v11112_v22 = vpop.f32.mrb[163].mxu0  ;;  %v8502_v16 = vld [vmem:[#allocation12 + $0x138] sm:$0xff]  }
 0x628   : > { %v4397_v13 = vadd.f32 %v4396_v31, %v3715_v28  ;;  %v3999_v57 = vmax.f32 %v3998_v0, %v3720_v26  ;;  %v4335_v58 = vadd.f32 %v4334_v6, %v3720_v26  ;;  %v4041_v52 = vmax.f32 %v4040_v48, %v3722_v24  ;;  %7845 = vmatprep.subr.bf16.mxu1 %v8468_v29  ;;  %v8470_v44 = vld [vmem:[#allocation12 + $0xd8] sm:$0xff]  }
 0x629   : > { %v4377_v41 = vadd.f32 %v4376_v61, %v3722_v24  ;;  %v4020_v3 = vmax.f32 %v4019_v49, %v3721_v21  ;;  %v4356_v18 = vadd.f32 %v4355_v47, %v3721_v21  ;;  %v3536_v50 = vadd.f32 %v10965_v36, %v10949_v7  ;;  %7877 = vmatprep.subr.bf16.mxu0 %v8500_v32  ;;  %v8471_v36 = vld [vmem:[#allocation12 + $0x98] sm:$0xff]  }
 0x62a   : > { %v3345_v54 = vadd.f32 %v10973_v8, %v10877_v5  ;;  %v3538_v31 = vadd.f32 %v10975_v59, %v10937_v10  ;;  %v3347_v0 = vadd.f32 %v10981_v45, %v10946_v23  ;;  %v3540_v6 = vadd.f32 %v10983_v1, %v10949_v7  ;;  %7878 = vmatpush3.bf16.msra.mxu0 %v8502_v16  ;;  %v8510_v59 = vld [vmem:[%s11966_s28 + $0x40] sm:$0xff]  }
 0x62b   : > { %v3351_v30 = vadd.f32 %v10993_v9, %v10877_v5  ;;  %v3723_v42 = vmax.f32 %v3536_v50, 0.0  ;;  %v3544_v8 = vadd.f32 %v10995_v55, %v10937_v10  ;;  %v3353_v28 = vadd.f32 %v10997_v56, %v10946_v23  ;;  %7846 = vmatpush3.bf16.msra.mxu1 %v8469_v35  ;;  %v8472_v56 = vld [vmem:[#allocation12 + $0xe0] sm:$0xff]   ;;  %7907 = vmatprep.subr.bf16.mxu0 %v8510_v59 }
 0x62c   : > { %v3728_v2 = vmax.f32 %v3345_v54, 0.0  ;;  %v3730_v45 = vmax.f32 %v3538_v31, 0.0  ;;  %v3729_v1 = vmax.f32 %v3347_v0, 0.0  ;;  %v3731_v29 = vmax.f32 %v3540_v6, 0.0  ;;  %v11133_v26 = vpop.f32.mrb[132].mxu1  ;;  %v11135_v48 = vpop.f32.mrb[164].mxu0  ;;  %7847 = vmatprep.subr.bf16.mxu1 %v8470_v44 }
 0x62d   : > { %v3736_v9 = vmax.f32 %v3351_v30, 0.0  ;;  %v4062_v61 = vmax.f32 %v4061_v25, %v3723_v42  ;;  %v4398_v24 = vadd.f32 %v4397_v13, %v3723_v42  ;;  %v11137_v49 = vpop.f32.mrb[133].mxu1  ;;  %v11139_v47 = vpop.f32.mrb[165].mxu0  ;;  %v3738_v6 = vmax.f32 %v3544_v8, 0.0  ;;  %v8474_v30 = vld [vmem:[#allocation12 + $0xa0] sm:$0xff]  }
 0x62e   : > { %v4000_v55 = vmax.f32 %v3999_v57, %v3728_v2  ;;  %v4336_v21 = vadd.f32 %v4335_v58, %v3728_v2  ;;  %v4042_v32 = vmax.f32 %v4041_v52, %v3730_v45  ;;  %v4378_v35 = vadd.f32 %v4377_v41, %v3730_v45  ;;  %v11141_v54 = vpop.f32.mrb[134].mxu1  ;;  %v11143_v31 = vpop.f32.mrb[166].mxu0 }
 0x62f   : > { %v4021_v16 = vmax.f32 %v4020_v3, %v3729_v1  ;;  %v4357_v50 = vadd.f32 %v4356_v18, %v3729_v1  ;;  %v4063_v0 = vmax.f32 %v4062_v61, %v3731_v29  ;;  %v4399_v25 = vadd.f32 %v4398_v24, %v3731_v29  ;;  %v11145_v58 = vpop.f32.mrb[135].mxu1  ;;  %v11147_v44 = vpop.f32.mrb[167].mxu0  ;;  %7848 = vmatpush3.bf16.msra.mxu1 %v8471_v36  ;;  %v11967_v3 = vld [vmem:[#allocation45_spill] sm:$0xff] }
 0x630   : > { %v4001_v13 = vmax.f32 %v4000_v55, %v3736_v9  ;;  %v4337_v57 = vadd.f32 %v4336_v21, %v3736_v9  ;;  %v3737_v52 = vmax.f32 %v3353_v28, 0.0  ;;  %v3546_v18 = vadd.f32 %v11967_v3, %v10949_v7  ;;  %7849 = vmatprep.subr.bf16.mxu1 %v8472_v56  ;;  %v8476_v36 = vld [vmem:[#allocation12 + $0xe8] sm:$0xff]  }
 0x631   : > { %v3355_v41 = vadd.f32 %v11007_v11, %v10877_v5  ;;  %v3548_v42 = vadd.f32 %v11009_v19, %v10937_v10  ;;  %v3357_v2 = vadd.f32 %v11011_v63, %v10946_v23  ;;  %v3550_v59 = vadd.f32 %v11013_v39, %v10949_v7  ;;  %v8477_v55 = vld [vmem:[#allocation12 + $0xa8] sm:$0xff]  }
 0x632   : > { %v3361_v8 = vadd.f32 %v11027_v43, %v10877_v5  ;;  %v4043_v28 = vmax.f32 %v4042_v32, %v3738_v6  ;;  %v4379_v45 = vadd.f32 %v4378_v35, %v3738_v6  ;;  %v4022_v1 = vmax.f32 %v4021_v16, %v3737_v52  ;;  %v8478_v6 = vld [vmem:[#allocation12 + $0xf0] sm:$0xff]  }
 0x633   : > { %v4358_v29 = vadd.f32 %v4357_v50, %v3737_v52  ;;  %v3739_v9 = vmax.f32 %v3546_v18, 0.0  ;;  %v3744_v11 = vmax.f32 %v3355_v41, 0.0  ;;  %v3746_v61 = vmax.f32 %v3548_v42, 0.0  ;;  %7850 = vmatpush3.bf16.msra.mxu1 %v8474_v30 }
 0x634   : > { %v3745_v24 = vmax.f32 %v3357_v2, 0.0  ;;  %v3747_v19 = vmax.f32 %v3550_v59, 0.0  ;;  %v3752_v21 = vmax.f32 %v3361_v8, 0.0  ;;  %v3554_v63 = vadd.f32 %v11029_v14, %v10937_v10  ;;  %v11165_v56 = vpop.f32.mrb[136].mxu1  ;;  %v11167_v43 = vpop.f32.mrb[168].mxu0  ;;  %7851 = vmatprep.subr.bf16.mxu1 %v8476_v36  ;;  %v8479_v8 = vld [vmem:[#allocation12 + $0xb0] sm:$0xff]  }
 0x635   : > { %v3363_v39 = vadd.f32 %v11031_v12, %v10946_v23  ;;  %v4064_v32 = vmax.f32 %v4063_v0, %v3739_v9  ;;  %v4400_v35 = vadd.f32 %v4399_v25, %v3739_v9  ;;  %v4002_v16 = vmax.f32 %v4001_v13, %v3744_v11  ;;  %v11169_v30 = vpop.f32.mrb[137].mxu1  ;;  %v11171_v52 = vpop.f32.mrb[169].mxu0 }
 0x636   : > { %v4338_v50 = vadd.f32 %v4337_v57, %v3744_v11  ;;  %v4044_v3 = vmax.f32 %v4043_v28, %v3746_v61  ;;  %v4380_v18 = vadd.f32 %v4379_v45, %v3746_v61  ;;  %v4023_v14 = vmax.f32 %v4022_v1, %v3745_v24  ;;  %v11173_v42 = vpop.f32.mrb[138].mxu1  ;;  %v11175_v12 = vpop.f32.mrb[170].mxu0  ;;  %v11972_v61 = vld [vmem:[#allocation47_spill] sm:$0xff] }
 0x637   : > { %v4359_v41 = vadd.f32 %v4358_v29, %v3745_v24  ;;  %11968 = vst [vmem:[#allocation45_spill] sm:$0xff] %v11175_v12  ;;  %v4065_v2 = vmax.f32 %v4064_v32, %v3747_v19  ;;  %v4401_v59 = vadd.f32 %v4400_v35, %v3747_v19  ;;  %v4003_v0 = vmax.f32 %v4002_v16, %v3752_v21  ;;  %v11177_v13 = vpop.f32.mrb[139].mxu1  ;;  %v11179_v57 = vpop.f32.mrb[171].mxu0  ;;  %v11971_v29 = vld [vmem:[#allocation46_spill] sm:$0xff] }
 0x638   : > { %v4339_v25 = vadd.f32 %v4338_v50, %v3752_v21  ;;  %11969 = vst [vmem:[#allocation48_spill] sm:$0xff] %v11177_v13  ;;  %11970 = vst [vmem:[#allocation49_spill] sm:$0xff] %v11179_v57  ;;  %7852 = vmatpush3.bf16.msra.mxu1 %v8477_v55  ;;  %v3754_v36 = vmax.f32 %v3554_v63, 0.0  ;;  %v3753_v9 = vmax.f32 %v3363_v39, 0.0  ;;  %v3556_v28 = vadd.f32 %v11033_v37, %v10949_v7  ;;  %v8480_v19 = vld [vmem:[#allocation12 + $0xf8] sm:$0xff]   ;;  %v11974_v21 = vld [vmem:[#allocation44_spill] sm:$0xff] }
 0x639   : > { %v3365_v45 = vadd.f32 %v11035_v62, %v10877_v5  ;;  %7853 = vmatprep.subr.bf16.mxu1 %v8478_v6  ;;  %v3558_v1 = vadd.f32 %v11037_v60, %v10937_v10  ;;  %v3367_v11 = vadd.f32 %v11971_v29, %v10946_v23  ;;  %v3560_v24 = vadd.f32 %v11972_v61, %v10949_v7  ;;  %v11973_v55 = vld [vmem:[#allocation39_spill] sm:$0xff] }
 0x63a   : > { %v4920_v63 = vsel %vm4917_vm7, %v11974_v21, %v11973_v55  ;;  %v4045_v39 = vmax.f32 %v4044_v3, %v3754_v36  ;;  %v4381_v37 = vadd.f32 %v4380_v18, %v3754_v36  ;;  %v4024_v32 = vmax.f32 %v4023_v14, %v3753_v9  ;;  %v8481_v57 = vld [vmem:[#allocation12 + $0xb8] sm:$0xff]  }
 0x63b   : > { %v4360_v35 = vadd.f32 %v4359_v41, %v3753_v9  ;;  %v3755_v62 = vmax.f32 %v3556_v28, 0.0  ;;  %v3760_v16 = vmax.f32 %v3365_v45, 0.0  ;;  %v3762_v50 = vmax.f32 %v3558_v1, 0.0  ;;  %v8491_v28 = vld [vmem:[#allocation12 + $0x1c0] sm:$0xff]  }
 0x63c   : > { %v3761_v6 = vmax.f32 %v3367_v11, 0.0  ;;  %7854 = vmatpush3.bf16.msra.mxu1 %v8479_v8  ;;  %v3763_v60 = vmax.f32 %v3560_v24, 0.0  ;;  %v4928_v29 = vpack.c.b16 %v4920_v63, %v4920_v63  ;;  %v3371_v61 = vadd.f32 %v11058_v38, %v10877_v5  ;;  %v11198_v12 = vpop.f32.mrb[140].mxu1  ;;  %v11200_v3 = vpop.f32.mrb[172].mxu0 }
 0x63d   : > { %v3564_v13 = vadd.f32 %v11060_v33, %v10937_v10  ;;  %v4066_v18 = vmax.f32 %v4065_v2, %v3755_v62  ;;  %v4402_v14 = vadd.f32 %v4401_v59, %v3755_v62  ;;  %v4004_v41 = vmax.f32 %v4003_v0, %v3760_v16  ;;  %7855 = vmatprep.subr.bf16.mxu1 %v8480_v19  ;;  %v11202_v9 = vpop.f32.mrb[141].mxu1  ;;  %v11204_v8 = vpop.f32.mrb[173].mxu0 }
 0x63e   : > { %v4340_v36 = vadd.f32 %v4339_v25, %v3760_v16  ;;  %v4046_v45 = vmax.f32 %v4045_v39, %v3762_v50  ;;  %v4382_v1 = vadd.f32 %v4381_v37, %v3762_v50  ;;  %v4025_v38 = vmax.f32 %v4024_v32, %v3761_v6  ;;  %v11206_v24 = vpop.f32.mrb[142].mxu1  ;;  %v11208_v33 = vpop.f32.mrb[174].mxu0  ;;  %v8493_v32 = vld [vmem:[#allocation12 + $0x180] sm:$0xff]   ;;  %v8494_v50 = vld [vmem:[#allocation12 + $0x1c8] sm:$0xff]  }
 0x63f   : > { %v4361_v11 = vadd.f32 %v4360_v35, %v3761_v6  ;;  %v4067_v55 = vmax.f32 %v4066_v18, %v3763_v60  ;;  %v4403_v21 = vadd.f32 %v4402_v14, %v3763_v60  ;;  %v3768_v2 = vmax.f32 %v3371_v61, 0.0  ;;  %v11210_v0 = vpop.f32.mrb[143].mxu1  ;;  %v11212_v25 = vpop.f32.mrb[175].mxu0  ;;  %v11977_v61 = vld [vmem:[#allocation40_spill] sm:$0xff]  ;;  %v11978_v18 = vld [vmem:[#allocation41_spill] sm:$0xff] }
 0x640   : > { %v3770_v59 = vmax.f32 %v3564_v13, 0.0  ;;  %11975 = vst [vmem:[#allocation46_spill] sm:$0xff] %v11210_v0  ;;  %11976 = vst [vmem:[#allocation47_spill] sm:$0xff] %v11212_v25  ;;  %7856 = vmatpush3.bf16.msra.mxu1 %v8481_v57  ;;  %v3373_v19 = vadd.f32 %v11068_v51, %v10946_v23  ;;  %v3566_v63 = vadd.f32 %v11070_v27, %v10949_v7 }
 0x641   : > { %v3375_v39 = vadd.f32 %v11073_v4, %v10877_v5  ;;  %v3568_v37 = vadd.f32 %v11075_v34, %v10937_v10  ;;  %v4005_v35 = vmax.f32 %v4004_v41, %v3768_v2  ;;  %v4341_v13 = vadd.f32 %v4340_v36, %v3768_v2  ;;  %7885 = vmatprep.subr.bf16.mxu1 %v8491_v28  ;;  %v11979_v34 = vld [vmem:[#allocation31_spill] sm:$0xff] }
 0x642   : > { %v4047_v62 = vmax.f32 %v4046_v45, %v3770_v59  ;;  %v4383_v16 = vadd.f32 %v4382_v1, %v3770_v59  ;;  %v3769_v57 = vmax.f32 %v3373_v19, 0.0  ;;  %v3771_v6 = vmax.f32 %v3566_v63, 0.0  ;;  %v8495_v59 = vld [vmem:[#allocation12 + $0x188] sm:$0xff]  }
 0x643   : > { %v3776_v60 = vmax.f32 %v3375_v39, 0.0  ;;  %v3778_v51 = vmax.f32 %v3568_v37, 0.0  ;;  %5399 = vmatmul.mubr.bf16.vlgmr.msra.gmra.mrb[164].mxu1 %v4928_v29  ;;  %v3377_v14 = vadd.f32 %v11979_v34, %v10946_v23  ;;  %v3570_v41 = vadd.f32 %v11081_v15, %v10949_v7  ;;  %v8496_v34 = vld [vmem:[#allocation12 + $0x1d0] sm:$0xff]  }
 0x644   : > { %v4026_v36 = vmax.f32 %v4025_v38, %v3769_v57  ;;  %v4362_v28 = vadd.f32 %v4361_v11, %v3769_v57  ;;  %v4068_v45 = vmax.f32 %v4067_v55, %v3771_v6  ;;  %v4404_v1 = vadd.f32 %v4403_v21, %v3771_v6  ;;  %v11230_v2 = vpop.f32.mrb[144].mxu1  ;;  %7886 = vmatpush3.bf16.msra.mxu1 %v8493_v32 }
 0x645   : > { %11980 = vst [vmem:[#allocation39_spill] sm:$0xff] %v11230_v2  ;;  %v4006_v19 = vmax.f32 %v4005_v35, %v3776_v60  ;;  %v4342_v63 = vadd.f32 %v4341_v13, %v3776_v60  ;;  %v4048_v39 = vmax.f32 %v4047_v62, %v3778_v51  ;;  %v4384_v37 = vadd.f32 %v4383_v16, %v3778_v51  ;;  %v11232_v4 = vpop.f32.mrb[176].mxu0  ;;  %v11234_v29 = vpop.f32.mrb[145].mxu1 }
 0x646   : > { %11981 = vst [vmem:[#allocation44_spill] sm:$0xff] %v11232_v4  ;;  %11982 = vst [vmem:[#allocation40_spill] sm:$0xff] %v11234_v29  ;;  %7887 = vmatprep.subr.bf16.mxu1 %v8494_v50  ;;  %v3777_v27 = vmax.f32 %v3377_v14, 0.0  ;;  %v3779_v15 = vmax.f32 %v3570_v41, 0.0  ;;  %v11238_v38 = vadd.f32 %v11098_v53, %v10877_v5  ;;  %v11242_v11 = vadd.f32 %v11100_v17, %v10937_v10  ;;  %v11244_v55 = vpop.f32.mrb[177].mxu0  ;;  %v11246_v21 = vpop.f32.mrb[146].mxu1 }
 0x647   : > { %11983 = vst [vmem:[#allocation41_spill] sm:$0xff] %v11244_v55  ;;  %11984 = vst [vmem:[#allocation31_spill] sm:$0xff] %v11246_v21  ;;  %v4007_v32 = vrot.slane %v4006_v19, 4  ;;  %v4343_v35 = vrot.slane %v4342_v63, 4  ;;  %v4049_v13 = vrot.slane %v4048_v39, 4  ;;  %v4385_v62 = vrot.slane %v4384_v37, 4 }
 0x648   : > { %v11248_v16 = vpop.f32.mrb[178].mxu0  ;;  %v11250_v50 = vpop.f32.mrb[147].mxu1  ;;  %v4027_v57 = vmax.f32 %v4026_v36, %v3777_v27  ;;  %v4363_v6 = vadd.f32 %v4362_v28, %v3777_v27  ;;  %v4069_v53 = vmax.f32 %v4068_v45, %v3779_v15  ;;  %v4405_v60 = vadd.f32 %v4404_v1, %v3779_v15  ;;  %7888 = vmatpush3.bf16.msra.mxu1 %v8495_v59  ;;  %v8497_v17 = vld [vmem:[#allocation12 + $0x190] sm:$0xff]   ;;  %v8498_v29 = vld [vmem:[#allocation12 + $0x1d8] sm:$0xff]  }
 0x649   : > { %11985 = vst [vmem:[#allocation50_spill] sm:$0xff] %v11248_v16  ;;  %11986 = vst [vmem:[#allocation51_spill] sm:$0xff] %v11250_v50  ;;  %v11252_v51 = vpop.f32.mrb[179].mxu0  ;;  %v4008_v14 = vmax.f32 %v4006_v19, %v4007_v32  ;;  %v4344_v41 = vadd.f32 %v4343_v35, %v4342_v63  ;;  %v4050_v55 = vmax.f32 %v4048_v39, %v4049_v13  ;;  %7889 = vmatprep.subr.bf16.mxu1 %v8496_v34  ;;  %v8499_v19 = vld [vmem:[#allocation12 + $0x198] sm:$0xff]   ;;  %v8501_v13 = vld [vmem:[#allocation12 + $0x1e0] sm:$0xff]  }
 0x64a   : > { %11987 = vst [vmem:[#allocation52_spill] sm:$0xff] %v11252_v51  ;;  %v4386_v21 = vadd.f32 %v4385_v62, %v4384_v37  ;;  %v4028_v4 = vrot.slane %v4027_v57, 4  ;;  %v4364_v2 = vrot.slane %v4363_v6, 4  ;;  %v4070_v25 = vrot.slane %v4069_v53, 4 }
 0x64b   : > { %v4406_v16 = vrot.slane %v4405_v60, 4  ;;  %v4009_v0 = vrot.slane %v4008_v14, 2  ;;  %v4345_v50 = vrot.slane %v4344_v41, 2  ;;  %v4051_v36 = vrot.slane %v4050_v55, 2 }
 0x64c   : > { %v4387_v27 = vrot.slane %v4386_v21, 2  ;;  %v4029_v28 = vmax.f32 %v4027_v57, %v4028_v4  ;;  %v4365_v45 = vadd.f32 %v4364_v2, %v4363_v6  ;;  %v4071_v1 = vmax.f32 %v4069_v53, %v4070_v25  ;;  %v11254_v59 = vpop.f32.mrb[148].mxu1  ;;  %7890 = vmatpush3.bf16.msra.mxu1 %v8497_v17 }
 0x64d   : > { %v4407_v15 = vadd.f32 %v4406_v16, %v4405_v60  ;;  %11988 = vst [vmem:[#allocation53_spill] sm:$0xff] %v11254_v59  ;;  %v4010_v63 = vmax.f32 %v4008_v14, %v4009_v0  ;;  %v4346_v39 = vadd.f32 %v4345_v50, %v4344_v41  ;;  %v4052_v37 = vmax.f32 %v4050_v55, %v4051_v36  ;;  %v11256_v32 = vpop.f32.mrb[180].mxu0  ;;  %v11258_v35 = vpop.f32.mrb[149].mxu1  ;;  %v8503_v41 = vld [vmem:[#allocation12 + $0x1a0] sm:$0xff]  }
 0x64e   : > { %v4388_v34 = vadd.f32 %v4387_v27, %v4386_v21  ;;  %11989 = vst [vmem:[#allocation54_spill] sm:$0xff] %v11256_v32  ;;  %11990 = vst [vmem:[#allocation55_spill] sm:$0xff] %v11258_v35  ;;  %7891 = vmatprep.subr.bf16.mxu1 %v8498_v29  ;;  %v4030_v62 = vrot.slane %v4029_v28, 2  ;;  %v4366_v51 = vrot.slane %v4365_v45, 2  ;;  %v4072_v4 = vrot.slane %v4071_v1, 2  ;;  %v11260_v25 = vpop.f32.mrb[181].mxu0 }
 0x64f   : > { %v4408_v2 = vrot.slane %v4407_v15, 2  ;;  %11991 = vst [vmem:[#allocation56_spill] sm:$0xff] %v11260_v25  ;;  %v11262_v16 = vpop.f32.mrb[150].mxu1  ;;  %v4011_v57 = vrot.slane %v4010_v63, 1  ;;  %v4347_v6 = vrot.slane %v4346_v39, 1  ;;  %v4053_v0 = vrot.slane %v4052_v37, 1 }
 0x650   : > { %11992 = vst [vmem:[#allocation57_spill] sm:$0xff] %v11262_v16  ;;  %v4389_v50 = vrot.slane %v4388_v34, 1  ;;  %v11264_v55 = vpop.f32.mrb[182].mxu0  ;;  %v11266_v21 = vpop.f32.mrb[151].mxu1  ;;  %v4031_v53 = vmax.f32 %v4029_v28, %v4030_v62  ;;  %v4367_v60 = vadd.f32 %v4366_v51, %v4365_v45  ;;  %v4073_v29 = vmax.f32 %v4071_v1, %v4072_v4  ;;  %7892 = vmatpush3.bf16.msra.mxu1 %v8499_v19  ;;  %v8504_v35 = vld [vmem:[#allocation12 + $0x1e8] sm:$0xff]  }
 0x651   : > { %11993 = vst [vmem:[#allocation58_spill] sm:$0xff] %v11264_v55  ;;  %11994 = vst [vmem:[#allocation59_spill] sm:$0xff] %v11266_v21  ;;  %v4409_v17 = vadd.f32 %v4408_v2, %v4407_v15  ;;  %v11268_v14 = vpop.f32.mrb[183].mxu0  ;;  %v11270_v36 = vmax.f32 %v4010_v63, %v4011_v57  ;;  %v4348_v27 = vadd.f32 %v4347_v6, %v4346_v39  ;;  %7893 = vmatprep.subr.bf16.mxu1 %v8501_v13 }
 0x652   : > { %v11272_v16 = vmax.f32 %v4052_v37, %v4053_v0  ;;  %v4390_v25 = vadd.f32 %v4389_v50, %v4388_v34  ;;  %v4032_v32 = vrot.slane %v4031_v53, 1  ;;  %v4368_v55 = vrot.slane %v4367_v60, 1 }
 0x653   : > { %11995 = vst [vmem:[#allocation60_spill] sm:$0xff] %v11270_v36  ;;  %v4074_v59 = vrot.slane %v4073_v29, 1  ;;  %v4410_v21 = vrot.slane %v4409_v17, 1  ;;  %v11997_v51 = vpack.c.bf16 %v11977_v61, %v11977_v61  ;;  %v11999_v45 = vpack.c.bf16 %v11978_v18, %v11978_v18  ;;  %v8505_v61 = vld [vmem:[#allocation12 + $0x1a8] sm:$0xff]  }
 0x654   : > { %11996 = vst [vmem:[#allocation61_spill] sm:$0xff] %v11272_v16  ;;  %v11284_v15 = vmul.f32 0.0078125, %v4348_v27  ;;  %v11286_v19 = vmul.f32 0.0078125, %v4390_v25  ;;  %v4369_v63 = vadd.f32 %v4368_v55, %v4367_v60  ;;  %v3784_v37 = vmax.f32 %v11238_v38, 0.0  ;;  %v11290_v13 = vpop.f32.mrb[152].mxu1  ;;  %7894 = vmatpush3.bf16.msra.mxu1 %v8503_v41  ;;  %v8506_v38 = vld [vmem:[#allocation12 + $0x1f0] sm:$0xff]  }
 0x655   : > { %v11277_v28 = vunpack.c.l.b16 %v11997_v51  ;;  %v11282_v1 = vunpack.c.l.b16 %v11999_v45  ;;  %v4411_v39 = vadd.f32 %v4410_v21, %v4409_v17  ;;  %v3786_v34 = vmax.f32 %v11242_v11, 0.0  ;;  %v11300_v25 = vpop.f32.mrb[184].mxu0  ;;  %v11302_v57 = vpop.f32.mrb[153].mxu1  ;;  %7895 = vmatprep.subr.bf16.mxu1 %v8504_v35  ;;  %v12005_v21 = vld [vmem:[#allocation37_spill] sm:$0xff]  ;;  %v12006_v60 = vld [vmem:[#allocation38_spill] sm:$0xff] }
 0x656   : > { %v11296_v4 = vmax.f32 %v4031_v53, %v4032_v32  ;;  %v11298_v2 = vmax.f32 %v4073_v29, %v4074_v59  ;;  %v3383_v0 = vadd.f32 %v11102_v46, %v10946_v23  ;;  %v3576_v32 = vadd.f32 %v11104_v20, %v10949_v7  ;;  %v11312_v59 = vpop.f32.mrb[185].mxu0  ;;  %v11314_v50 = vpop.f32.mrb[154].mxu1 }
 0x657   : > { %11998 = vst [vmem:[#allocation62_spill] sm:$0xff] %v11277_v28  ;;  %12000 = vst [vmem:[#allocation63_spill] sm:$0xff] %v11282_v1  ;;  %v11316_v55 = vmul.f32 0.0078125, %v4369_v63  ;;  %v11318_v35 = vmul.f32 0.0078125, %v4411_v39  ;;  %v3385_v53 = vadd.f32 %v12005_v21, %v10877_v5  ;;  %v3578_v29 = vadd.f32 %v12006_v60, %v10937_v10  ;;  %v11324_v17 = vpop.f32.mrb[186].mxu0  ;;  %v11326_v46 = vpop.f32.mrb[155].mxu1 }
 0x658   : > { %12001 = vst [vmem:[#allocation64_spill] sm:$0xff] %v11296_v4  ;;  %12002 = vst [vmem:[#allocation65_spill] sm:$0xff] %v11298_v2  ;;  %v3785_v41 = vmax.f32 %v3383_v0, 0.0  ;;  %v3787_v20 = vmax.f32 %v3576_v32, 0.0  ;;  %v3387_v27 = vadd.f32 %v11110_v40, %v10946_v23  ;;  %v3580_v51 = vadd.f32 %v11112_v22, %v10949_v7  ;;  %v11332_v45 = vpop.f32.mrb[187].mxu0  ;;  %7896 = vmatpush3.bf16.msra.mxu1 %v8505_v61  ;;  %v8507_v63 = vld [vmem:[#allocation12 + $0x1b0] sm:$0xff]  }
 0x659   : > { %12003 = vst [vmem:[#allocation66_spill] sm:$0xff] %v11316_v55  ;;  %12004 = vst [vmem:[#allocation67_spill] sm:$0xff] %v11318_v35  ;;  %v3792_v39 = vmax.f32 %v3385_v53, 0.0  ;;  %v3794_v21 = vmax.f32 %v3578_v29, 0.0  ;;  %v3391_v60 = vadd.f32 %v11133_v26, %v10877_v5  ;;  %v3584_v18 = vadd.f32 %v11135_v48, %v10937_v10  ;;  %7897 = vmatprep.subr.bf16.mxu1 %v8506_v38  ;;  %v8508_v0 = vld [vmem:[#allocation12 + $0x1f8] sm:$0xff]   ;;  %v8511_v38 = vld [vmem:[%s11966_s28 + $0xc0] sm:$0xff]  }
 0x65a   : > { %v3793_v32 = vmax.f32 %v3387_v27, 0.0  ;;  %v3795_v62 = vmax.f32 %v3580_v51, 0.0  ;;  %v3393_v40 = vadd.f32 %v11137_v49, %v10946_v23  ;;  %v3586_v22 = vadd.f32 %v11139_v47, %v10949_v7  ;;  %v8509_v48 = vld [vmem:[#allocation12 + $0x1b8] sm:$0xff]  }
 0x65b   : > { %v4160_v61 = vmax.f32 %v3784_v37, %v3792_v39  ;;  %v4496_v6 = vadd.f32 %v3792_v39, %v3784_v37  ;;  %v4202_v53 = vmax.f32 %v3786_v34, %v3794_v21  ;;  %v4538_v29 = vadd.f32 %v3794_v21, %v3786_v34 }
 0x65c   : > { %v4181_v11 = vmax.f32 %v3785_v41, %v3793_v32  ;;  %v4517_v16 = vadd.f32 %v3793_v32, %v3785_v41  ;;  %v4223_v26 = vmax.f32 %v3787_v20, %v3795_v62  ;;  %v4559_v36 = vadd.f32 %v3795_v62, %v3787_v20  ;;  %v11342_v2 = vpop.f32.mrb[156].mxu1  ;;  %7898 = vmatpush3.bf16.msra.mxu1 %v8507_v63 }
 0x65d   : > { %v3800_v49 = vmax.f32 %v3391_v60, 0.0  ;;  %v3802_v27 = vmax.f32 %v3584_v18, 0.0  ;;  %v3801_v51 = vmax.f32 %v3393_v40, 0.0  ;;  %v3803_v47 = vmax.f32 %v3586_v22, 0.0  ;;  %v11347_v4 = vpop.f32.mrb[188].mxu0  ;;  %v11349_v37 = vpop.f32.mrb[157].mxu1  ;;  %7899 = vmatprep.subr.bf16.mxu1 %v8508_v0 }
 0x65e   : > { %v3395_v34 = vadd.f32 %v11141_v54, %v10877_v5  ;;  %v3588_v62 = vadd.f32 %v11143_v31, %v10937_v10  ;;  %v3397_v41 = vadd.f32 %v11145_v58, %v10946_v23  ;;  %v3590_v20 = vadd.f32 %v11147_v44, %v10949_v7  ;;  %v11359_v18 = vpop.f32.mrb[189].mxu0  ;;  %v11361_v63 = vpop.f32.mrb[158].mxu1 }
 0x65f   : > { %v4161_v39 = vmax.f32 %v4160_v61, %v3800_v49  ;;  %v4497_v21 = vadd.f32 %v4496_v6, %v3800_v49  ;;  %v4203_v60 = vmax.f32 %v4202_v53, %v3802_v27  ;;  %v4539_v0 = vadd.f32 %v4538_v29, %v3802_v27  ;;  %v11363_v32 = vpop.f32.mrb[190].mxu0  ;;  %v11365_v54 = vpop.f32.mrb[159].mxu1 }
 0x660   : > { %v4182_v40 = vmax.f32 %v4181_v11, %v3801_v51  ;;  %v4518_v31 = vadd.f32 %v4517_v16, %v3801_v51  ;;  %v4224_v22 = vmax.f32 %v4223_v26, %v3803_v47  ;;  %v4560_v1 = vadd.f32 %v4559_v36, %v3803_v47  ;;  %v11367_v58 = vpop.f32.mrb[191].mxu0  ;;  %7900 = vmatpush3.bf16.msra.mxu1 %v8509_v48 }
 0x661   : > { %v3808_v44 = vmax.f32 %v3395_v34, 0.0  ;;  %v3810_v28 = vmax.f32 %v3588_v62, 0.0  ;;  %v3809_v35 = vmax.f32 %v3397_v41, 0.0  ;;  %v3811_v55 = vmax.f32 %v3590_v20, 0.0  ;;  %7929 = vmatprep.subr.bf16.mxu1 %v8511_v38  ;;  %v12009_v20 = vld [vmem:[#allocation49_spill] sm:$0xff] }
 0x662   : > { %v3401_v6 = vadd.f32 %v11165_v56, %v10877_v5  ;;  %v3594_v61 = vadd.f32 %v11167_v43, %v10937_v10  ;;  %v3403_v11 = vadd.f32 %v11169_v30, %v10946_v23  ;;  %v3596_v16 = vadd.f32 %v11171_v52, %v10949_v7  ;;  %v12007_v30 = vld [vmem:[#allocation45_spill] sm:$0xff]  ;;  %v12008_v52 = vld [vmem:[#allocation48_spill] sm:$0xff] }
 0x663   : > { %v4162_v36 = vmax.f32 %v4161_v39, %v3808_v44  ;;  %v4498_v53 = vadd.f32 %v4497_v21, %v3808_v44  ;;  %v4204_v29 = vmax.f32 %v4203_v60, %v3810_v28  ;;  %v4540_v26 = vadd.f32 %v4539_v0, %v3810_v28 }
 0x664   : > { %v4183_v48 = vmax.f32 %v4182_v40, %v3809_v35  ;;  %v4519_v49 = vadd.f32 %v4518_v31, %v3809_v35  ;;  %v4225_v27 = vmax.f32 %v4224_v22, %v3811_v55  ;;  %v4561_v38 = vadd.f32 %v4560_v1, %v3811_v55 }
 0x665   : > { %v3816_v51 = vmax.f32 %v3401_v6, 0.0  ;;  %v3818_v47 = vmax.f32 %v3594_v61, 0.0  ;;  %v3817_v56 = vmax.f32 %v3403_v11, 0.0  ;;  %v3819_v34 = vmax.f32 %v3596_v16, 0.0 }
 0x666   : > { %v3405_v43 = vadd.f32 %v11173_v42, %v10877_v5  ;;  %v3598_v62 = vadd.f32 %v12007_v30, %v10937_v10  ;;  %v3407_v41 = vadd.f32 %v12008_v52, %v10946_v23  ;;  %v3600_v28 = vadd.f32 %v12009_v20, %v10949_v7 }
 0x667   : > { %v4163_v39 = vmax.f32 %v4162_v36, %v3816_v51  ;;  %v4499_v35 = vadd.f32 %v4498_v53, %v3816_v51  ;;  %v4205_v21 = vmax.f32 %v4204_v29, %v3818_v47  ;;  %v4541_v1 = vadd.f32 %v4540_v26, %v3818_v47 }
 0x668   : > { %v4184_v55 = vmax.f32 %v4183_v48, %v3817_v56  ;;  %v4520_v60 = vadd.f32 %v4519_v49, %v3817_v56  ;;  %v4226_v0 = vmax.f32 %v4225_v27, %v3819_v34  ;;  %v4562_v40 = vadd.f32 %v4561_v38, %v3819_v34 }
 0x669   : > { %v3824_v31 = vmax.f32 %v3405_v43, 0.0  ;;  %v3826_v22 = vmax.f32 %v3598_v62, 0.0  ;;  %v3825_v42 = vmax.f32 %v3407_v41, 0.0  ;;  %v3827_v44 = vmax.f32 %v3600_v28, 0.0  ;;  %v12011_v43 = vld [vmem:[#allocation47_spill] sm:$0xff] }
 0x66a   : > { %v3411_v6 = vadd.f32 %v11198_v12, %v10877_v5  ;;  %v3604_v61 = vadd.f32 %v11200_v3, %v10937_v10  ;;  %v3413_v11 = vadd.f32 %v11202_v9, %v10946_v23  ;;  %v3606_v16 = vadd.f32 %v11204_v8, %v10949_v7  ;;  %v12010_v8 = vld [vmem:[#allocation46_spill] sm:$0xff] }
 0x66b   : > { %v4164_v36 = vmax.f32 %v4163_v39, %v3824_v31  ;;  %v4500_v53 = vadd.f32 %v4499_v35, %v3824_v31  ;;  %v4206_v29 = vmax.f32 %v4205_v21, %v3826_v22  ;;  %v4542_v26 = vadd.f32 %v4541_v1, %v3826_v22  ;;  %v12014_v22 = vld [vmem:[#allocation40_spill] sm:$0xff] }
 0x66c   : > { %v4185_v48 = vmax.f32 %v4184_v55, %v3825_v42  ;;  %v4521_v49 = vadd.f32 %v4520_v60, %v3825_v42  ;;  %v4227_v27 = vmax.f32 %v4226_v0, %v3827_v44  ;;  %v4563_v38 = vadd.f32 %v4562_v40, %v3827_v44  ;;  %v12013_v40 = vld [vmem:[#allocation44_spill] sm:$0xff]  ;;  %v12015_v44 = vld [vmem:[#allocation41_spill] sm:$0xff] }
 0x66d   : > { %v3832_v51 = vmax.f32 %v3411_v6, 0.0  ;;  %v3834_v47 = vmax.f32 %v3604_v61, 0.0  ;;  %v3833_v12 = vmax.f32 %v3413_v11, 0.0  ;;  %v3835_v56 = vmax.f32 %v3606_v16, 0.0 }
 0x66e   : > { %v3415_v3 = vadd.f32 %v11206_v24, %v10877_v5  ;;  %v3608_v9 = vadd.f32 %v11208_v33, %v10937_v10  ;;  %v3417_v34 = vadd.f32 %v12010_v8, %v10946_v23  ;;  %v3610_v30 = vadd.f32 %v12011_v43, %v10949_v7  ;;  %v12012_v33 = vld [vmem:[#allocation39_spill] sm:$0xff] }
 0x66f   : > { %v4165_v62 = vmax.f32 %v4164_v36, %v3832_v51  ;;  %v4501_v52 = vadd.f32 %v4500_v53, %v3832_v51  ;;  %v4207_v41 = vmax.f32 %v4206_v29, %v3834_v47  ;;  %v4543_v20 = vadd.f32 %v4542_v26, %v3834_v47  ;;  %v12016_v47 = vld [vmem:[#allocation31_spill] sm:$0xff] }
 0x670   : > { %v4186_v28 = vmax.f32 %v4185_v48, %v3833_v12  ;;  %v4522_v39 = vadd.f32 %v4521_v49, %v3833_v12  ;;  %v4228_v35 = vmax.f32 %v4227_v27, %v3835_v56  ;;  %v4564_v21 = vadd.f32 %v4563_v38, %v3835_v56  ;;  %v12017_v56 = vld [vmem:[#allocation50_spill] sm:$0xff] }
 0x671   : > { %v3840_v1 = vmax.f32 %v3415_v3, 0.0  ;;  %v3842_v55 = vmax.f32 %v3608_v9, 0.0  ;;  %v3841_v24 = vmax.f32 %v3417_v34, 0.0  ;;  %v3843_v60 = vmax.f32 %v3610_v30, 0.0  ;;  %v12018_v9 = vld [vmem:[#allocation51_spill] sm:$0xff]  ;;  %v12019_v34 = vld [vmem:[#allocation52_spill] sm:$0xff] }
 0x672   : > { %v3421_v0 = vadd.f32 %v12012_v33, %v10877_v5  ;;  %v3614_v31 = vadd.f32 %v12013_v40, %v10937_v10  ;;  %v3423_v42 = vadd.f32 %v12014_v22, %v10946_v23  ;;  %v3616_v6 = vadd.f32 %v12015_v44, %v10949_v7 }
 0x673   : > { %v4166_v61 = vmax.f32 %v4165_v62, %v3840_v1  ;;  %v4502_v11 = vadd.f32 %v4501_v52, %v3840_v1  ;;  %v4208_v16 = vmax.f32 %v4207_v41, %v3842_v55  ;;  %v4544_v36 = vadd.f32 %v4543_v20, %v3842_v55 }
 0x674   : > { %v4187_v53 = vmax.f32 %v4186_v28, %v3841_v24  ;;  %v4523_v29 = vadd.f32 %v4522_v39, %v3841_v24  ;;  %v4229_v26 = vmax.f32 %v4228_v35, %v3843_v60  ;;  %v4565_v48 = vadd.f32 %v4564_v21, %v3843_v60  ;;  %v12020_v60 = vld [vmem:[#allocation53_spill] sm:$0xff] }
 0x675   : > { %v3848_v49 = vmax.f32 %v3421_v0, 0.0  ;;  %v3850_v27 = vmax.f32 %v3614_v31, 0.0  ;;  %v3849_v38 = vmax.f32 %v3423_v42, 0.0  ;;  %v3851_v51 = vmax.f32 %v3616_v6, 0.0  ;;  %v12021_v0 = vld [vmem:[#allocation54_spill] sm:$0xff]  ;;  %v12022_v31 = vld [vmem:[#allocation55_spill] sm:$0xff] }
 0x676   : > { %v3425_v12 = vadd.f32 %v12016_v47, %v10877_v5  ;;  %v3618_v3 = vadd.f32 %v12017_v56, %v10937_v10  ;;  %v3427_v8 = vadd.f32 %v12018_v9, %v10946_v23  ;;  %v3620_v43 = vadd.f32 %v12019_v34, %v10949_v7  ;;  %v12023_v42 = vld [vmem:[#allocation56_spill] sm:$0xff] }
 0x677   : > { %v4167_v30 = vmax.f32 %v4166_v61, %v3848_v49  ;;  %v4503_v62 = vadd.f32 %v4502_v11, %v3848_v49  ;;  %v4209_v52 = vmax.f32 %v4208_v16, %v3850_v27  ;;  %v4545_v41 = vadd.f32 %v4544_v36, %v3850_v27 }
 0x678   : > { %v4188_v20 = vmax.f32 %v4187_v53, %v3849_v38  ;;  %v4524_v28 = vadd.f32 %v4523_v29, %v3849_v38  ;;  %v4230_v39 = vmax.f32 %v4229_v26, %v3851_v51  ;;  %v4566_v35 = vadd.f32 %v4565_v48, %v3851_v51  ;;  %v12024_v51 = vld [vmem:[#allocation57_spill] sm:$0xff] }
 0x679   : > { %v3856_v21 = vmax.f32 %v3425_v12, 0.0  ;;  %v3858_v1 = vmax.f32 %v3618_v3, 0.0  ;;  %v3857_v55 = vmax.f32 %v3427_v8, 0.0  ;;  %v3859_v24 = vmax.f32 %v3620_v43, 0.0  ;;  %v12025_v12 = vld [vmem:[#allocation58_spill] sm:$0xff]  ;;  %v12026_v3 = vld [vmem:[#allocation59_spill] sm:$0xff] }
 0x67a   : > { %v3431_v33 = vadd.f32 %v12020_v60, %v10877_v5  ;;  %v3624_v40 = vadd.f32 %v12021_v0, %v10937_v10  ;;  %v3433_v22 = vadd.f32 %v12022_v31, %v10946_v23  ;;  %v3626_v44 = vadd.f32 %v12023_v42, %v10949_v7 }
 0x67b   : > { %v4168_v6 = vmax.f32 %v4167_v30, %v3856_v21  ;;  %v4504_v61 = vadd.f32 %v4503_v62, %v3856_v21  ;;  %v4210_v11 = vmax.f32 %v4209_v52, %v3858_v1  ;;  %v4546_v16 = vadd.f32 %v4545_v41, %v3858_v1 }
 0x67c   : > { %v4189_v36 = vmax.f32 %v4188_v20, %v3857_v55  ;;  %v4525_v53 = vadd.f32 %v4524_v28, %v3857_v55  ;;  %v4231_v29 = vmax.f32 %v4230_v39, %v3859_v24  ;;  %v4567_v26 = vadd.f32 %v4566_v35, %v3859_v24 }
 0x67d   : > { %v3864_v48 = vmax.f32 %v3431_v33, 0.0  ;;  %v3866_v49 = vmax.f32 %v3624_v40, 0.0  ;;  %v3865_v27 = vmax.f32 %v3433_v22, 0.0  ;;  %v3867_v38 = vmax.f32 %v3626_v44, 0.0 }
 0x67e   : > { %v3435_v47 = vadd.f32 %v12024_v51, %v10877_v5  ;;  %v3628_v56 = vadd.f32 %v12025_v12, %v10937_v10  ;;  %v3437_v9 = vadd.f32 %v12026_v3, %v10946_v23  ;;  %v3630_v8 = vadd.f32 %v11268_v14, %v10949_v7 }
 0x67f   : > { %v4169_v34 = vmax.f32 %v4168_v6, %v3864_v48  ;;  %v4505_v43 = vadd.f32 %v4504_v61, %v3864_v48  ;;  %v4211_v30 = vmax.f32 %v4210_v11, %v3866_v49  ;;  %v4547_v62 = vadd.f32 %v4546_v16, %v3866_v49 }
 0x680   : > { %v4190_v52 = vmax.f32 %v4189_v36, %v3865_v27  ;;  %v4526_v41 = vadd.f32 %v4525_v53, %v3865_v27  ;;  %v4232_v20 = vmax.f32 %v4231_v29, %v3867_v38  ;;  %v4568_v28 = vadd.f32 %v4567_v26, %v3867_v38 }
 0x681   : > { %v3872_v39 = vmax.f32 %v3435_v47, 0.0  ;;  %v3874_v35 = vmax.f32 %v3628_v56, 0.0  ;;  %v3873_v21 = vmax.f32 %v3437_v9, 0.0  ;;  %v3875_v1 = vmax.f32 %v3630_v8, 0.0 }
 0x682   : > { %v3441_v55 = vadd.f32 %v11290_v13, %v10877_v5  ;;  %v3634_v24 = vadd.f32 %v11300_v25, %v10937_v10  ;;  %v3443_v14 = vadd.f32 %v11302_v57, %v10946_v23  ;;  %v3636_v60 = vadd.f32 %v11312_v59, %v10949_v7 }
 0x683   : > { %v4170_v33 = vmax.f32 %v4169_v34, %v3872_v39  ;;  %v4506_v0 = vadd.f32 %v4505_v43, %v3872_v39  ;;  %v4212_v40 = vmax.f32 %v4211_v30, %v3874_v35  ;;  %v4548_v31 = vadd.f32 %v4547_v62, %v3874_v35 }
 0x684   : > { %v4191_v22 = vmax.f32 %v4190_v52, %v3873_v21  ;;  %v4527_v42 = vadd.f32 %v4526_v41, %v3873_v21  ;;  %v4233_v44 = vmax.f32 %v4232_v20, %v3875_v1  ;;  %v4569_v6 = vadd.f32 %v4568_v28, %v3875_v1 }
 0x685   : > { %v3880_v61 = vmax.f32 %v3441_v55, 0.0  ;;  %v3882_v11 = vmax.f32 %v3634_v24, 0.0  ;;  %v3881_v13 = vmax.f32 %v3443_v14, 0.0  ;;  %v3883_v16 = vmax.f32 %v3636_v60, 0.0 }
 0x686   : > { %v3445_v25 = vadd.f32 %v11314_v50, %v10877_v5  ;;  %v3638_v57 = vadd.f32 %v11324_v17, %v10937_v10  ;;  %v3447_v59 = vadd.f32 %v11326_v46, %v10946_v23  ;;  %v3640_v36 = vadd.f32 %v11332_v45, %v10949_v7 }
 0x687   : > { %v4171_v53 = vmax.f32 %v4170_v33, %v3880_v61  ;;  %v4507_v29 = vadd.f32 %v4506_v0, %v3880_v61  ;;  %v4213_v26 = vmax.f32 %v4212_v40, %v3882_v11  ;;  %v4549_v48 = vadd.f32 %v4548_v31, %v3882_v11 }
 0x688   : > { %v4192_v49 = vmax.f32 %v4191_v22, %v3881_v13  ;;  %v4528_v27 = vadd.f32 %v4527_v42, %v3881_v13  ;;  %v4234_v38 = vmax.f32 %v4233_v44, %v3883_v16  ;;  %v4570_v51 = vadd.f32 %v4569_v6, %v3883_v16  ;;  %v12030_v22 = vld [vmem:[#allocation67_spill] sm:$0xff] }
 0x689   : > { %v3888_v47 = vmax.f32 %v3445_v25, 0.0  ;;  %v3890_v12 = vmax.f32 %v3638_v57, 0.0  ;;  %v3889_v50 = vmax.f32 %v3447_v59, 0.0  ;;  %v3891_v56 = vmax.f32 %v3640_v36, 0.0 }
 0x68a   : > { %v3451_v17 = vadd.f32 %v11342_v2, %v10877_v5  ;;  %v3644_v46 = vadd.f32 %v11347_v4, %v10937_v10  ;;  %v3453_v45 = vadd.f32 %v11349_v37, %v10946_v23  ;;  %v3646_v3 = vadd.f32 %v11359_v18, %v10949_v7 }
 0x68b   : > { %v4172_v9 = vmax.f32 %v4171_v53, %v3888_v47  ;;  %v4508_v8 = vadd.f32 %v4507_v29, %v3888_v47  ;;  %v4214_v34 = vmax.f32 %v4213_v26, %v3890_v12  ;;  %v4550_v43 = vadd.f32 %v4549_v48, %v3890_v12 }
 0x68c   : > { %v4193_v30 = vmax.f32 %v4192_v49, %v3889_v50  ;;  %v4529_v62 = vadd.f32 %v4528_v27, %v3889_v50  ;;  %v4235_v52 = vmax.f32 %v4234_v38, %v3891_v56  ;;  %v4571_v41 = vadd.f32 %v4570_v51, %v3891_v56 }
 0x68d   : > { %v3896_v20 = vmax.f32 %v3451_v17, 0.0  ;;  %v3898_v28 = vmax.f32 %v3644_v46, 0.0  ;;  %v3897_v2 = vmax.f32 %v3453_v45, 0.0  ;;  %v3899_v39 = vmax.f32 %v3646_v3, 0.0 }
 0x68e   : > { %v3455_v4 = vadd.f32 %v11361_v63, %v10877_v5  ;;  %v3648_v37 = vadd.f32 %v11363_v32, %v10937_v10  ;;  %v3457_v18 = vadd.f32 %v11365_v54, %v10946_v23  ;;  %v3650_v35 = vadd.f32 %v11367_v58, %v10949_v7  ;;  %v12029_v54 = vld [vmem:[#allocation66_spill] sm:$0xff] }
 0x68f   : > { %v4173_v21 = vmax.f32 %v4172_v9, %v3896_v20  ;;  %v4509_v1 = vadd.f32 %v4508_v8, %v3896_v20  ;;  %v4215_v55 = vmax.f32 %v4214_v34, %v3898_v28  ;;  %v4551_v24 = vadd.f32 %v4550_v43, %v3898_v28 }
 0x690   : > { %v4194_v14 = vmax.f32 %v4193_v30, %v3897_v2  ;;  %v4530_v60 = vadd.f32 %v4529_v62, %v3897_v2  ;;  %v4236_v33 = vmax.f32 %v4235_v52, %v3899_v39  ;;  %v4572_v0 = vadd.f32 %v4571_v41, %v3899_v39 }
 0x691   : > { %v3904_v40 = vmax.f32 %v3455_v4, 0.0  ;;  %v3906_v31 = vmax.f32 %v3648_v37, 0.0  ;;  %v3905_v5 = vmax.f32 %v3457_v18, 0.0  ;;  %v3907_v63 = vmax.f32 %v3650_v35, 0.0 }
 0x692   : > { %v12027_v10 = vpack.c.bf16 %v11284_v15, %v11284_v15  ;;  %v12028_v23 = vpack.c.bf16 %v11286_v19, %v11286_v19  ;;  %v4746_v58 = vpack.c.bf16 %v12029_v54, %v12029_v54  ;;  %v4748_v42 = vpack.c.bf16 %v12030_v22, %v12030_v22 }
 0x693   : > { %v4174_v44 = vmax.f32 %v4173_v21, %v3904_v40  ;;  %v4510_v6 = vadd.f32 %v4509_v1, %v3904_v40  ;;  %v4216_v61 = vmax.f32 %v4215_v55, %v3906_v31  ;;  %v4552_v11 = vadd.f32 %v4551_v24, %v3906_v31 }
 0x694   : > { %v11468_v32 = vunpack.c.l.b16 %v12027_v10  ;;  %v11473_v7 = vunpack.c.l.b16 %v12028_v23  ;;  %v4195_v13 = vmax.f32 %v4194_v14, %v3905_v5  ;;  %v4531_v16 = vadd.f32 %v4530_v60, %v3905_v5  ;;  %v12031_v5 = vld [vmem:[#allocation32_spill] sm:$0xff]  ;;  %v12032_v10 = vld [vmem:[#allocation42_spill] sm:$0xff] }
 0x695   : > { %v4237_v15 = vmax.f32 %v4236_v33, %v3907_v63  ;;  %v4573_v25 = vadd.f32 %v4572_v0, %v3907_v63  ;;  %v4175_v57 = vrot.slane %v4174_v44, 4  ;;  %v4511_v59 = vrot.slane %v4510_v6, 4 }
 0x696   : > { %v4217_v36 = vrot.slane %v4216_v61, 4  ;;  %v4553_v19 = vrot.slane %v4552_v11, 4  ;;  %v4196_v53 = vrot.slane %v4195_v13, 4  ;;  %v4532_v29 = vrot.slane %v4531_v16, 4 }
 0x697   : > { %v4238_v26 = vrot.slane %v4237_v15, 4  ;;  %v4574_v48 = vrot.slane %v4573_v25, 4  ;;  %v4176_v49 = vmax.f32 %v4174_v44, %v4175_v57  ;;  %v4512_v27 = vadd.f32 %v4511_v59, %v4510_v6 }
 0x698   : > { %v4218_v38 = vmax.f32 %v4216_v61, %v4217_v36  ;;  %v4554_v51 = vadd.f32 %v4553_v19, %v4552_v11  ;;  %v4197_v47 = vmax.f32 %v4195_v13, %v4196_v53  ;;  %v4533_v12 = vadd.f32 %v4532_v29, %v4531_v16 }
 0x699   : > { %v4239_v50 = vmax.f32 %v4237_v15, %v4238_v26  ;;  %v4575_v56 = vadd.f32 %v4574_v48, %v4573_v25  ;;  %v4177_v17 = vrot.slane %v4176_v49, 2  ;;  %v4513_v46 = vrot.slane %v4512_v27, 2 }
 0x69a   : > { %v4219_v45 = vrot.slane %v4218_v38, 2  ;;  %v4555_v3 = vrot.slane %v4554_v51, 2  ;;  %v4198_v9 = vrot.slane %v4197_v47, 2  ;;  %v4534_v8 = vrot.slane %v4533_v12, 2 }
 0x69b   : > { %v4240_v34 = vrot.slane %v4239_v50, 2  ;;  %v4576_v43 = vrot.slane %v4575_v56, 2  ;;  %v4178_v30 = vmax.f32 %v4176_v49, %v4177_v17  ;;  %v4514_v62 = vadd.f32 %v4513_v46, %v4512_v27  ;;  %v12036_v17 = vld [vmem:[#allocation62_spill] sm:$0xff] }
 0x69c   : > { %v4220_v52 = vmax.f32 %v4218_v38, %v4219_v45  ;;  %v4556_v41 = vadd.f32 %v4555_v3, %v4554_v51  ;;  %v4199_v20 = vmax.f32 %v4197_v47, %v4198_v9  ;;  %v4535_v28 = vadd.f32 %v4534_v8, %v4533_v12  ;;  %v12033_v38 = vld [vmem:[#allocation33_spill] sm:$0xff]  ;;  %v12034_v47 = vld [vmem:[#allocation43_spill] sm:$0xff] }
 0x69d   : > { %v4241_v2 = vmax.f32 %v4239_v50, %v4240_v34  ;;  %v4577_v39 = vadd.f32 %v4576_v43, %v4575_v56  ;;  %v4179_v4 = vrot.slane %v4178_v30, 1  ;;  %v4515_v37 = vrot.slane %v4514_v62, 1 }
 0x69e   : > { %v4221_v18 = vrot.slane %v4220_v52, 1  ;;  %v4557_v35 = vrot.slane %v4556_v41, 1  ;;  %v4200_v21 = vrot.slane %v4199_v20, 1  ;;  %v4536_v1 = vrot.slane %v4535_v28, 1 }
 0x69f   : > { %v4242_v55 = vrot.slane %v4241_v2, 1  ;;  %v4578_v24 = vrot.slane %v4577_v39, 1  ;;  %v4180_v14 = vmax.f32 %v4178_v30, %v4179_v4  ;;  %v4516_v60 = vadd.f32 %v4515_v37, %v4514_v62 }
 0x6a0   : > { %v4222_v33 = vmax.f32 %v4220_v52, %v4221_v18  ;;  %v4558_v0 = vadd.f32 %v4557_v35, %v4556_v41  ;;  %v4537_v40 = vadd.f32 %v4536_v1, %v4535_v28  ;;  %v4598_v63 = vpack.c.bf16 %v12031_v5, %v12031_v5  ;;  %v8512_v41 = vld [vmem:[%s11966_s28] sm:$0xff]  }
 0x6a1   : > { %v4579_v31 = vadd.f32 %v4578_v24, %v4577_v39  ;;  %v4606_v23 = vpack.c.bf16 %v12032_v10, %v12032_v10  ;;  %v4593_v44 = vmul.f32 0.0078125, %v4516_v60  ;;  %v4201_v61 = vmax.f32 %v4199_v20, %v4200_v21  ;;  %v12037_v28 = vld [vmem:[#allocation36_spill] sm:$0xff]  ;;  %v12040_v18 = vld [vmem:[#allocation65_spill] sm:$0xff] }
 0x6a2   : > { %v4595_v6 = vmul.f32 0.0078125, %v4558_v0  ;;  %v4243_v11 = vmax.f32 %v4241_v2, %v4242_v55  ;;  %v4609_v13 = vpack.c.bf16 %v4180_v14, %v4180_v14  ;;  %v4611_v16 = vpack.c.bf16 %v4222_v33, %v4222_v33  ;;  %v12039_v39 = vld [vmem:[#allocation64_spill] sm:$0xff]  ;;  %v12043_v24 = vld [vmem:[#allocation61_spill] sm:$0xff] }
 0x6a3   : > { %v4594_v15 = vmul.f32 0.0078125, %v4537_v40  ;;  %v4596_v25 = vmul.f32 0.0078125, %v4579_v31  ;;  %v4753_v57 = vpack.c.bf16 %v4593_v44, %v4593_v44  ;;  %v4906_v36 = vunpack.c.l.b16 %v4746_v58  ;;  %v12035_v58 = vld [vmem:[#allocation35_spill] sm:$0xff]  ;;  %v12041_v21 = vld [vmem:[#allocation60_spill] sm:$0xff]  ;;  %v8514_v0 = vld [vmem:[%s11966_s28 + $0x48] sm:$0xff]  }
 0x6a4   : > { %v4755_v59 = vpack.c.bf16 %v4595_v6, %v4595_v6  ;;  %v4908_v19 = vunpack.c.l.b16 %v4748_v42  ;;  %v5503_v26 = vunpack.c.l.b16 %v4598_v63  ;;  %v5511_v48 = vunpack.c.l.b16 %v4606_v23  ;;  %v8515_v40 = vld [vmem:[%s11966_s28 + $0xc8] sm:$0xff]  }
 0x6a5   : > { %v4754_v53 = vpack.c.bf16 %v4594_v15, %v4594_v15  ;;  %v4756_v29 = vpack.c.bf16 %v4596_v25, %v4596_v25  ;;  %v4913_v49 = vunpack.c.l.b16 %v4753_v57  ;;  %v4600_v51 = vpack.c.bf16 %v12033_v38, %v12033_v38  ;;  %v8516_v44 = vld [vmem:[%s11966_s28 + $0x8] sm:$0xff]   ;;  %v8518_v15 = vld [vmem:[%s11966_s28 + $0x50] sm:$0xff]   ;;  %v8528_v38 = vld [vmem:[%s11966_s28 + $0x20] sm:$0xff]  }
 0x6a6   : > { %v4915_v27 = vunpack.c.l.b16 %v4755_v59  ;;  %v4608_v12 = vpack.c.bf16 %v12034_v47, %v12034_v47  ;;  %v5519_v54 = vsel %vm4917_vm7, %v5511_v48, %v5503_v26  ;;  %v11497_v22 = vsel %vm4917_vm7, %v12036_v17, %v12035_v58  ;;  %v8517_v6 = vld [vmem:[%s11966_s28 + $0x88] sm:$0xff]   ;;  %v8519_v25 = vld [vmem:[%s11966_s28 + $0xd0] sm:$0xff]   ;;  %v8524_v26 = vld [vmem:[%s11966_s28 + $0x18] sm:$0xff]  }
 0x6a7   : > { %v4914_v50 = vunpack.c.l.b16 %v4754_v53  ;;  %v4916_v56 = vunpack.c.l.b16 %v4756_v29  ;;  %v5514_v42 = vunpack.c.l.b16 %v4609_v13  ;;  %v5516_v46 = vunpack.c.l.b16 %v4611_v16  ;;  %v8522_v53 = vld [vmem:[%s11966_s28 + $0x58] sm:$0xff]   ;;  %v8530_v47 = vld [vmem:[%s11966_s28 + $0x68] sm:$0xff]   ;;  %v8535_v58 = vld [vmem:[%s11966_s28 + $0xf0] sm:$0xff]  }
 0x6a8   : > { %v4922_v45 = vsel %vm4917_vm7, %v4913_v49, %v11468_v32  ;;  %v4924_v3 = vsel %vm4917_vm7, %v4915_v27, %v11473_v7  ;;  %v5505_v43 = vunpack.c.l.b16 %v4600_v51  ;;  %v8513_v32 = vld [vmem:[%s11966_s28 + $0x80] sm:$0xff]   ;;  %v5513_v20 = vunpack.c.l.b16 %v4608_v12  ;;  %v12038_v7 = vld [vmem:[#allocation63_spill] sm:$0xff]  ;;  %v8531_v12 = vld [vmem:[%s11966_s28 + $0xe8] sm:$0xff]  }
 0x6a9   : > { %v4923_v9 = vsel %vm4917_vm7, %v4914_v50, %v4906_v36  ;;  %v4925_v8 = vsel %vm4917_vm7, %v4916_v56, %v4908_v19  ;;  %v4930_v34 = vpack.c.b16 %v4922_v45, %v4922_v45  ;;  %v4932_v52 = vpack.c.b16 %v4924_v3, %v4924_v3  ;;  %v8520_v36 = vld [vmem:[%s11966_s28 + $0x10] sm:$0xff]   ;;  %v8523_v29 = vld [vmem:[%s11966_s28 + $0xd8] sm:$0xff]   ;;  %v8526_v49 = vld [vmem:[%s11966_s28 + $0x60] sm:$0xff]  }
 0x6aa   : > { %v4931_v30 = vpack.c.b16 %v4923_v9, %v4923_v9  ;;  %v4933_v62 = vpack.c.b16 %v4925_v8, %v4925_v8  ;;  %v11514_v2 = vsel %vm4917_vm7, %v12038_v7, %v12037_v28  ;;  %v4602_v4 = vpack.c.bf16 %v12039_v39, %v12039_v39  ;;  %v8521_v19 = vld [vmem:[%s11966_s28 + $0x90] sm:$0xff]   ;;  %v8525_v48 = vld [vmem:[%s11966_s28 + $0x98] sm:$0xff]   ;;  %v8527_v27 = vld [vmem:[%s11966_s28 + $0xe0] sm:$0xff]  }
 0x6ab   : > { %v4610_v37 = vpack.c.bf16 %v4201_v61, %v4201_v61  ;;  %v4604_v35 = vpack.c.bf16 %v12040_v18, %v12040_v18  ;;  %v12042_v1 = vpack.c.bf16 %v12041_v21, %v12041_v21  ;;  %v12044_v14 = vpack.c.bf16 %v12043_v24, %v12043_v24  ;;  %v8529_v51 = vld [vmem:[%s11966_s28 + $0xa0] sm:$0xff]   ;;  %v8532_v50 = vld [vmem:[%s11966_s28 + $0x28] sm:$0xff]   ;;  %v8536_v17 = vld [vmem:[%s11966_s28 + $0x30] sm:$0xff]  }
 0x6ac   : > { %5438 = vmatprep.mubr.bf16.mxu0 %v4931_v30  ;;  %5478 = vmatprep.mubr.bf16.mxu1 %v4933_v62  ;;  %v5521_v33 = vsel %vm4917_vm7, %v5513_v20, %v5505_v43  ;;  %v4612_v31 = vpack.c.bf16 %v4243_v11, %v4243_v11  ;;  %v5527_v5 = vpack.c.b16 %v5519_v54, %v5519_v54  ;;  %v5507_v10 = vunpack.c.l.b16 %v4602_v4  ;;  %v8533_v56 = vld [vmem:[%s11966_s28 + $0xa8] sm:$0xff]   ;;  %v8534_v54 = vld [vmem:[%s11966_s28 + $0x70] sm:$0xff]   ;;  %v8539_v45 = vld [vmem:[%s11966_s28 + $0xf8] sm:$0xff]  }
 0x6ad   : > { %v5506_v55 = vunpack.c.l.b16 %v12042_v1  ;;  %v5508_v60 = vunpack.c.l.b16 %v12044_v14  ;;  %5439 = vmatmul.mubr.bf16.vlgmr.msra.gmra.mrb[192].mxu0 %v4930_v34  ;;  %5479 = vmatmul.mubr.bf16.vlgmr.msra.gmra.mrb[168].mxu1 %v4932_v52  ;;  %v5529_v63 = vpack.c.b16 %v5521_v33, %v5521_v33  ;;  %v5515_v23 = vunpack.c.l.b16 %v4610_v37  ;;  %v8540_v3 = vld [vmem:[%s11966_s28 + $0x38] sm:$0xff]   ;;  %v8542_v8 = vld [vmem:[%s11966_s28 + $0x140] sm:$0xff]   ;;  %v8548_v28 = vld [vmem:[%s11966_s28 + $0x108] sm:$0xff]  }
 0x6ae   : > { %7908 = vmatpush3.bf16.msra.mxu0 %v8512_v41  ;;  %7930 = vmatpush3.bf16.msra.mxu1 %v8513_v32  ;;  %v5509_v61 = vunpack.c.l.b16 %v4604_v35  ;;  %v5517_v13 = vunpack.c.l.b16 %v4612_v31  ;;  %v8541_v9 = vld [vmem:[%s11966_s28 + $0xb8] sm:$0xff]   ;;  %v8543_v34 = vld [vmem:[%s11966_s28 + $0x1c0] sm:$0xff]   ;;  %v5526_v30 = vpack.c.b16 %v11497_v22, %v11497_v22  ;;  %v5528_v62 = vpack.c.b16 %v11514_v2, %v11514_v2  ;;  %v8546_v32 = vld [vmem:[%s11966_s28 + $0x148] sm:$0xff]  }
 0x6af   : > { %v11540_v11 = vsel %vm4917_vm7, %v5514_v42, %v5506_v55  ;;  %v11543_v16 = vsel %vm4917_vm7, %v5516_v46, %v5508_v60  ;;  %5958 = vmatprep.mubr.bf16.mxu0 %v5527_v5  ;;  %5998 = vmatprep.mubr.bf16.mxu1 %v5529_v63  ;;  %v11552_v57 = vsel %vm4917_vm7, %v5515_v23, %v5507_v10  ;;  %v8537_v42 = vld [vmem:[%s11966_s28 + $0xb0] sm:$0xff]   ;;  %v8538_v46 = vld [vmem:[%s11966_s28 + $0x78] sm:$0xff]   ;;  %v8544_v43 = vld [vmem:[%s11966_s28 + $0x100] sm:$0xff]  }
 0x6b0   : > { %7909 = vmatprep.subr.bf16.mxu0 %v8514_v0  ;;  %7931 = vmatprep.subr.bf16.mxu1 %v8515_v40  ;;  %v11555_v59 = vsel %vm4917_vm7, %v5517_v13, %v5509_v61  ;;  %v8545_v52 = vld [vmem:[%s11966_s28 + $0x180] sm:$0xff]   ;;  %v5531_v41 = vpack.c.b16 %v11552_v57, %v11552_v57  ;;  %v8547_v22 = vld [vmem:[%s11966_s28 + $0x1c8] sm:$0xff]   ;;  %v8550_v2 = vld [vmem:[%s11966_s28 + $0x150] sm:$0xff]  }
 0x6b1   : > { %v5533_v20 = vpack.c.b16 %v11555_v59, %v11555_v59  ;;  %v8549_v7 = vld [vmem:[%s11966_s28 + $0x188] sm:$0xff]   ;;  %v8551_v39 = vld [vmem:[%s11966_s28 + $0x1d0] sm:$0xff]   ;;  %v8554_v18 = vld [vmem:[%s11966_s28 + $0x158] sm:$0xff]  }
 0x6b2   : > { %7910 = vmatpush3.bf16.msra.mxu0 %v8516_v44  ;;  %7932 = vmatpush3.bf16.msra.mxu1 %v8517_v6  ;;  %v8552_v4 = vld [vmem:[%s11966_s28 + $0x110] sm:$0xff]   ;;  %v8555_v35 = vld [vmem:[%s11966_s28 + $0x1d8] sm:$0xff]   ;;  %v8558_v55 = vld [vmem:[%s11966_s28 + $0x160] sm:$0xff]  }
 0x6b3   : > { %7911 = vmatprep.subr.bf16.mxu0 %v8518_v15  ;;  %7933 = vmatprep.subr.bf16.mxu1 %v8519_v25  ;;  %v8553_v37 = vld [vmem:[%s11966_s28 + $0x190] sm:$0xff]   ;;  %v8556_v21 = vld [vmem:[%s11966_s28 + $0x118] sm:$0xff]   ;;  %v8559_v24 = vld [vmem:[%s11966_s28 + $0x1e0] sm:$0xff]   ;;  %v5530_v15 = vpack.c.b16 %v11540_v11, %v11540_v11  ;;  %v5532_v25 = vpack.c.b16 %v11543_v16, %v11543_v16 }
 0x6b4   : > { %v8557_v1 = vld [vmem:[%s11966_s28 + $0x198] sm:$0xff]   ;;  %v8560_v14 = vld [vmem:[%s11966_s28 + $0x120] sm:$0xff]   ;;  %v8562_v33 = vld [vmem:[%s11966_s28 + $0x168] sm:$0xff]  }
 0x6b5   : > { %v8561_v60 = vld [vmem:[%s11966_s28 + $0x1a0] sm:$0xff]   ;;  %v8563_v0 = vld [vmem:[%s11966_s28 + $0x1e8] sm:$0xff]   ;;  %v8566_v5 = vld [vmem:[%s11966_s28 + $0x170] sm:$0xff]  }
 0x6b6   : > { %7912 = vmatpush3.bf16.msra.mxu0 %v8520_v36  ;;  %7934 = vmatpush3.bf16.msra.mxu1 %v8521_v19  ;;  %v8564_v40 = vld [vmem:[%s11966_s28 + $0x128] sm:$0xff]   ;;  %v8567_v63 = vld [vmem:[%s11966_s28 + $0x1f0] sm:$0xff]   ;;  %v8570_v44 = vld [vmem:[%s11966_s28 + $0x178] sm:$0xff]  }
 0x6b7   : > { %7913 = vmatprep.subr.bf16.mxu0 %v8522_v53  ;;  %7935 = vmatprep.subr.bf16.mxu1 %v8523_v29  ;;  %v8565_v31 = vld [vmem:[%s11966_s28 + $0x1a8] sm:$0xff]   ;;  %v8568_v10 = vld [vmem:[%s11966_s28 + $0x130] sm:$0xff]   ;;  %v8571_v6 = vld [vmem:[%s11966_s28 + $0x1f8] sm:$0xff]  }
 0x6b8   : > { %v8569_v23 = vld [vmem:[%s11966_s28 + $0x1b0] sm:$0xff]   ;;  %v8572_v61 = vld [vmem:[%s11966_s28 + $0x138] sm:$0xff]  }
 0x6b9   : > { %v8573_v13 = vld [vmem:[%s11966_s28 + $0x1b8] sm:$0xff]  }
 0x6ba   : > { %7914 = vmatpush3.bf16.msra.mxu0 %v8524_v26  ;;  %7936 = vmatpush3.bf16.msra.mxu1 %v8525_v48 }
 0x6bb   : > { %7915 = vmatprep.subr.bf16.mxu0 %v8526_v49  ;;  %7937 = vmatprep.subr.bf16.mxu1 %v8527_v27 }
 0x6be   : > { %7916 = vmatpush3.bf16.msra.mxu0 %v8528_v38  ;;  %7938 = vmatpush3.bf16.msra.mxu1 %v8529_v51 }
 0x6bf   : > { %7917 = vmatprep.subr.bf16.mxu0 %v8530_v47  ;;  %7939 = vmatprep.subr.bf16.mxu1 %v8531_v12 }
 0x6c2   : > { %7918 = vmatpush3.bf16.msra.mxu0 %v8532_v50  ;;  %7940 = vmatpush3.bf16.msra.mxu1 %v8533_v56 }
 0x6c3   : > { %7919 = vmatprep.subr.bf16.mxu0 %v8534_v54  ;;  %7941 = vmatprep.subr.bf16.mxu1 %v8535_v58 }
 0x6c6   : > { %7920 = vmatpush3.bf16.msra.mxu0 %v8536_v17  ;;  %7942 = vmatpush3.bf16.msra.mxu1 %v8537_v42 }
 0x6c7   : > { %7921 = vmatprep.subr.bf16.mxu0 %v8538_v46  ;;  %7943 = vmatprep.subr.bf16.mxu1 %v8539_v45 }
 0x6ca   : > { %7922 = vmatpush3.bf16.msra.mxu0 %v8540_v3  ;;  %7944 = vmatpush3.bf16.msra.mxu1 %v8541_v9 }
 0x6cb   : > { %7951 = vmatprep.subr.bf16.mxu0 %v8542_v8  ;;  %7973 = vmatprep.subr.bf16.mxu1 %v8543_v34 }
 0x6cd   : > { %5959 = vmatmul.mubr.bf16.vlgmr.msra.gmra.mrb[196].mxu0 %v5526_v30  ;;  %5999 = vmatmul.mubr.bf16.vlgmr.msra.gmra.mrb[172].mxu1 %v5528_v62 }
 0x6ce   : > { %7952 = vmatpush3.bf16.msra.mxu0 %v8544_v43  ;;  %6038 = vmatprep.mubr.bf16.mxu0 %v5531_v41 }
 0x6cf   : > { %7974 = vmatpush3.bf16.msra.mxu1 %v8545_v52  ;;  %6078 = vmatprep.mubr.bf16.mxu1 %v5533_v20 }
 0x6d0   : > { %7953 = vmatprep.subr.bf16.mxu0 %v8546_v32  ;;  %7975 = vmatprep.subr.bf16.mxu1 %v8547_v22 }
 0x6d2   : > { %7954 = vmatpush3.bf16.msra.mxu0 %v8548_v28 }
 0x6d3   : > { %7976 = vmatpush3.bf16.msra.mxu1 %v8549_v7  ;;  %7955 = vmatprep.subr.bf16.mxu0 %v8550_v2 }
 0x6d4   : > { %7977 = vmatprep.subr.bf16.mxu1 %v8551_v39 }
 0x6d6   : > { %7956 = vmatpush3.bf16.msra.mxu0 %v8552_v4 }
 0x6d7   : > { %7978 = vmatpush3.bf16.msra.mxu1 %v8553_v37  ;;  %7957 = vmatprep.subr.bf16.mxu0 %v8554_v18 }
 0x6d8   : > { %7979 = vmatprep.subr.bf16.mxu1 %v8555_v35 }
 0x6da   : > { %7958 = vmatpush3.bf16.msra.mxu0 %v8556_v21 }
 0x6db   : > { %7980 = vmatpush3.bf16.msra.mxu1 %v8557_v1  ;;  %7959 = vmatprep.subr.bf16.mxu0 %v8558_v55  ;;  %v7675_v55 = vld [vmem:[#allocation13] ss:$0 sm:$0xff] }
 0x6dc   : > { %7981 = vmatprep.subr.bf16.mxu1 %v8559_v24 }
 0x6de   : > { %7960 = vmatpush3.bf16.msra.mxu0 %v8560_v14 }
 0x6df   : > { %7982 = vmatpush3.bf16.msra.mxu1 %v8561_v60  ;;  %7961 = vmatprep.subr.bf16.mxu0 %v8562_v33 }
 0x6e0   : > { %7983 = vmatprep.subr.bf16.mxu1 %v8563_v0  ;;  %v9119_v0 = vmov 1966171168  }
 0x6e2   : > { %7962 = vmatpush3.bf16.msra.mxu0 %v8564_v40  ;;  %v6101_v40 = vunpack.c.l.s4 %v9119_v0  ;;  %v8634_v0 = vld [vmem:[#allocation19 + $0x30] ss:$12 sps:$4 sm:$0xff]  }
 0x6e3   : > { %7984 = vmatpush3.bf16.msra.mxu1 %v8565_v31  ;;  %7963 = vmatprep.subr.bf16.mxu0 %v8566_v5  ;;  %v12045_v5 = vld [vmem:[#allocation30_spill] sm:$0xff] }
 0x6e4   : > { %7985 = vmatprep.subr.bf16.mxu1 %v8567_v63  ;;  %v6102_v31 = vunpack.c.0.s8 %v6101_v40  ;;  %v8639_v40 = vld [vmem:[#allocation19 + $0x4c] ss:$12 sps:$4 sm:$0xff]  }
 0x6e6   : > { %7964 = vmatpush3.bf16.msra.mxu0 %v8568_v10  ;;  %v11735_v63 = vsub.s32 %v6102_v31, %v12045_v5  ;;  %v8637_v31 = vld [vmem:[#allocation19 + $0x48] ss:$12 sps:$4 sm:$0xff]  }
 0x6e7   : > { %7986 = vmatpush3.bf16.msra.mxu1 %v8569_v23  ;;  %7965 = vmatprep.subr.bf16.mxu0 %v8570_v44 }
 0x6e8   : > { %7987 = vmatprep.subr.bf16.mxu1 %v8571_v6 }
 0x6ea   : > { %7966 = vmatpush3.bf16.msra.mxu0 %v8572_v61  ;;  %v8574_v61 = vld [vmem:[%s12046_s19] ss:$8 sps:$4 sm:$0xff]  }
 0x6eb   : > { %7988 = vmatpush3.bf16.msra.mxu1 %v8573_v13  ;;  %v8576_v13 = vld [vmem:[%s12046_s19 + $0x4] ss:$8 sps:$4 sm:$0xff]  }
 0x6ec   : > { %6189 = vmatprep.subr.bf16.mxu0 %v8576_v13  ;;  %v8646_v13 = vld [vmem:[#allocation19 + $0x90] ss:$12 sps:$4 sm:$0xff]  }
 0x6ed   : > { %6039 = vmatmul.mubr.bf16.vlgmr.msra.gmra.mrb[200].mxu0 %v5530_v15 }
 0x6ee   : > { %6079 = vmatmul.mubr.bf16.vlgmr.msra.gmra.mrb[176].mxu1 %v5532_v25  ;;  %v8579_v25 = vld [vmem:[%s12046_s19 + $0x14] ss:$8 sps:$4 sm:$0xff]   ;;  %6190 = vmatpush1.bf16.msra.mxu0 %v8574_v61 }
 0x6ef   : > { %6191 = vmatprep.subr.bf16.mxu0 %v8579_v25  ;;  %v8648_v61 = vld [vmem:[#allocation19 + $0x94] ss:$12 sps:$4 sm:$0xff]  }
 0x6f0   : > { %v8649_v25 = vld [vmem:[#allocation19 + $0xa8] ss:$12 sps:$4 sm:$0xff]  }
 0x6f4   : > { %v7835_v57 = vpop.f32.mrb[160].mxu1 }
 0x6f5   : > { %v7836_v59 = vpop.f32.mrb[161].mxu1 }
 0x6f6   : > { %v7837_v36 = vadd.f32 %v7836_v59, %v7835_v57  ;;  %v7838_v19 = vpop.f32.mrb[162].mxu1  ;;  %v9120_v57 = vmov 0   ;;  %v8580_v59 = vld [vmem:[#allocation16] ss:$8 sps:$4 sm:$0xff]  }
 0x6f7   : > { %v7839_v53 = vpop.f32.mrb[163].mxu1  ;;  %6221 = vmatprep.mubr.bf16.mxu0 %v9120_v57  ;;  %v8577_v19 = vld [vmem:[%s12046_s19 + $0x10] ss:$8 sps:$4 sm:$0xff]  }
 0x6f8   : > { %v8585_v53 = vld [vmem:[#allocation16 + $0x14] ss:$8 sps:$4 sm:$0xff]   ;;  %6192 = vmatpush1.bf16.msra.mxu0 %v8577_v19 }
 0x6f9   : > { %v8654_v57 = vld [vmem:[#allocation19 + $0xc4] ss:$12 sps:$4 sm:$0xff]  }
 0x6fa   : > { %v8657_v19 = vld [vmem:[#allocation19 + $0xd8] ss:$12 sps:$4 sm:$0xff]  }
 0x716   : > { %v7857_v29 = vpop.f32.mrb[164].mxu1 }
 0x717   : > { %v7858_v26 = vpop.f32.mrb[165].mxu1 }
 0x718   : > { %v7859_v48 = vadd.f32 %v7858_v26, %v7857_v29  ;;  %v7860_v49 = vpop.f32.mrb[166].mxu1  ;;  %v8583_v29 = vld [vmem:[#allocation16 + $0x10] ss:$8 sps:$4 sm:$0xff]   ;;  %v8588_v26 = vld [vmem:[#allocation16 + $0x24] ss:$8 sps:$4 sm:$0xff]  }
 0x719   : > { %v7861_v27 = vpop.f32.mrb[167].mxu1  ;;  %v8591_v49 = vld [vmem:[#allocation16 + $0x34] ss:$8 sps:$4 sm:$0xff]  }
 0x71a   : > { %v5401_v38 = vadd.f32 %v7859_v48, %v7837_v36  ;;  %v8582_v36 = vld [vmem:[#allocation16 + $0x4] ss:$8 sps:$4 sm:$0xff]   ;;  %v8586_v48 = vld [vmem:[#allocation16 + $0x20] ss:$8 sps:$4 sm:$0xff]   ;;  %v8589_v27 = vld [vmem:[#allocation16 + $0x30] ss:$8 sps:$4 sm:$0xff]  }
 0x71b   : > { %6438 = vmatprep.subr.bf16.mxu1 %v8582_v36  ;;  %v8659_v36 = vld [vmem:[#allocation19 + $0xdc] ss:$12 sps:$4 sm:$0xff]  }
 0x71c   : > { %6439 = vmatpush1.bf16.msra.mxu1 %v8580_v59  ;;  %v8652_v59 = vld [vmem:[#allocation19 + $0xc0] ss:$12 sps:$4 sm:$0xff]  }
 0x71d   : > { %6440 = vmatprep.subr.bf16.mxu1 %v8585_v53  ;;  %v8664_v53 = vld [vmem:[#allocation19 + $0xf4] ss:$12 sps:$4 sm:$0xff]  }
 0x720   : > { %6441 = vmatpush1.bf16.msra.mxu1 %v8583_v29  ;;  %v8662_v29 = vld [vmem:[#allocation19 + $0xf0] ss:$12 sps:$4 sm:$0xff]  }
 0x721   : > { %6442 = vmatprep.subr.bf16.mxu1 %v8588_v26  ;;  %v8669_v26 = vld [vmem:[#allocation19 + $0x10c] ss:$12 sps:$4 sm:$0xff]  }
 0x724   : > { %6443 = vmatpush1.bf16.msra.mxu1 %v8586_v48  ;;  %v8667_v48 = vld [vmem:[#allocation19 + $0x108] ss:$12 sps:$4 sm:$0xff]  }
 0x725   : > { %6444 = vmatprep.subr.bf16.mxu1 %v8591_v49  ;;  %v8674_v49 = vld [vmem:[#allocation19 + $0x124] ss:$12 sps:$4 sm:$0xff]  }
 0x728   : > { %6445 = vmatpush1.bf16.msra.mxu1 %v8589_v27  ;;  %v8672_v27 = vld [vmem:[#allocation19 + $0x120] ss:$12 sps:$4 sm:$0xff]  }
 0x780   : > { %v7879_v51 = vpop.f32.mrb[192].mxu0  ;;  %v7901_v47 = vpop.f32.mrb[168].mxu1 }
 0x781   : > { %v7880_v12 = vpop.f32.mrb[193].mxu0  ;;  %v7902_v11 = vpop.f32.mrb[169].mxu1 }
 0x782   : > { %v7881_v50 = vadd.f32 %v7880_v12, %v7879_v51  ;;  %v7903_v56 = vadd.f32 %v7902_v11, %v7901_v47  ;;  %v7882_v16 = vpop.f32.mrb[194].mxu0  ;;  %v7904_v54 = vpop.f32.mrb[170].mxu1  ;;  %v8592_v51 = vld [vmem:[#allocation16 + $0x40] ss:$8 sps:$4 sm:$0xff]   ;;  %v8597_v47 = vld [vmem:[#allocation16 + $0x54] ss:$8 sps:$4 sm:$0xff]  }
 0x783   : > { %v7883_v58 = vpop.f32.mrb[195].mxu0  ;;  %v7905_v17 = vpop.f32.mrb[171].mxu1  ;;  %v8595_v12 = vld [vmem:[#allocation16 + $0x50] ss:$8 sps:$4 sm:$0xff]   ;;  %v8600_v11 = vld [vmem:[#allocation16 + $0x64] ss:$8 sps:$4 sm:$0xff]  }
 0x784   : > { %v5441_v42 = vadd.f32 %v7881_v50, %v5401_v38  ;;  %v8594_v38 = vld [vmem:[#allocation16 + $0x44] ss:$8 sps:$4 sm:$0xff]   ;;  %v8598_v50 = vld [vmem:[#allocation16 + $0x60] ss:$8 sps:$4 sm:$0xff]   ;;  %v8601_v16 = vld [vmem:[#allocation16 + $0x70] ss:$8 sps:$4 sm:$0xff]  }
 0x785   : > { %6446 = vmatprep.subr.bf16.mxu1 %v8594_v38  ;;  %v8606_v54 = vld [vmem:[#allocation16 + $0x84] ss:$8 sps:$4 sm:$0xff]   ;;  %v8604_v58 = vld [vmem:[#allocation16 + $0x80] ss:$8 sps:$4 sm:$0xff]   ;;  %v8609_v17 = vld [vmem:[#allocation16 + $0x94] ss:$8 sps:$4 sm:$0xff]  }
 0x786   : > { %v5481_v46 = vadd.f32 %v7903_v56, %v5441_v42  ;;  %6447 = vmatpush1.bf16.msra.mxu1 %v8592_v51  ;;  %v8603_v56 = vld [vmem:[#allocation16 + $0x74] ss:$8 sps:$4 sm:$0xff]   ;;  %v8607_v42 = vld [vmem:[#allocation16 + $0x90] ss:$8 sps:$4 sm:$0xff]  }
 0x787   : > { %6448 = vmatprep.subr.bf16.mxu1 %v8597_v47  ;;  %v8679_v38 = vld [vmem:[#allocation19 + $0x13c] ss:$12 sps:$4 sm:$0xff]   ;;  %v8677_v51 = vld [vmem:[#allocation19 + $0x138] ss:$12 sps:$4 sm:$0xff]  }
 0x788   : > { %v6154_v47 = vld [vmem:[#allocation15] sm:$0x3] }
 0x78a   : > { %6449 = vmatpush1.bf16.msra.mxu1 %v8595_v12  ;;  %v12048_v12 = vld [vmem:[#allocation29_spill] sm:$0xff] }
 0x78b   : > { %6450 = vmatprep.subr.bf16.mxu1 %v8600_v11  ;;  %v6159_v11 = vrot.slane %v6154_v47, %v12048_v12 }
 0x78e   : > { %6451 = vmatpush1.bf16.msra.mxu1 %v8598_v50  ;;  %v12049_v50 = vld [vmem:[#allocation34_spill] sm:$0xff] }
 0x78f   : > { %6452 = vmatprep.subr.bf16.mxu1 %v8603_v56  ;;  %v6163_v56 = vrot.slane %v6154_v47, %v12049_v50 }
 0x792   : > { %6453 = vmatpush1.bf16.msra.mxu1 %v8601_v16 }
 0x793   : > { %6454 = vmatprep.subr.bf16.mxu1 %v8606_v54 }
 0x796   : > { %6455 = vmatpush1.bf16.msra.mxu1 %v8604_v58 }
 0x797   : > { %6456 = vmatprep.subr.bf16.mxu1 %v8609_v17 }
 0x79a   : > { %6457 = vmatpush1.bf16.msra.mxu1 %v8607_v42 }
 0x7a0   : > { %v7923_v45 = vpop.f32.mrb[196].mxu0  ;;  %v7945_v3 = vpop.f32.mrb[172].mxu1 }
 0x7a1   : > { %v7924_v9 = vpop.f32.mrb[197].mxu0  ;;  %v7946_v8 = vpop.f32.mrb[173].mxu1 }
 0x7a2   : > { %v7925_v34 = vadd.f32 %v7924_v9, %v7923_v45  ;;  %v7947_v43 = vadd.f32 %v7946_v8, %v7945_v3  ;;  %v7926_v30 = vpop.f32.mrb[198].mxu0  ;;  %v7948_v62 = vpop.f32.mrb[174].mxu1  ;;  %v8610_v45 = vld [vmem:[#allocation16 + $0xa0] ss:$8 sps:$4 sm:$0xff]   ;;  %v8615_v3 = vld [vmem:[#allocation16 + $0xb4] ss:$8 sps:$4 sm:$0xff]  }
 0x7a3   : > { %v7927_v52 = vpop.f32.mrb[199].mxu0  ;;  %v7949_v41 = vpop.f32.mrb[175].mxu1  ;;  %v8613_v9 = vld [vmem:[#allocation16 + $0xb0] ss:$8 sps:$4 sm:$0xff]   ;;  %v8618_v8 = vld [vmem:[#allocation16 + $0xc4] ss:$8 sps:$4 sm:$0xff]  }
 0x7a4   : > { %v5961_v32 = vadd.f32 %v7925_v34, %v5481_v46  ;;  %v8612_v46 = vld [vmem:[#allocation16 + $0xa4] ss:$8 sps:$4 sm:$0xff]   ;;  %v8616_v34 = vld [vmem:[#allocation16 + $0xc0] ss:$8 sps:$4 sm:$0xff]   ;;  %v8619_v30 = vld [vmem:[#allocation16 + $0xd0] ss:$8 sps:$4 sm:$0xff]  }
 0x7a5   : > { %6458 = vmatprep.subr.bf16.mxu1 %v8612_v46  ;;  %v6094_v62 = vld [vmem:[%s793_s26] sm:$0x1]  ;;  %v6095_v41 = vld [vmem:[%s793_s26 + $0x1] sm:$0x1] }
 0x7a6   : > { %v6001_v22 = vadd.f32 %v7947_v43, %v5961_v32  ;;  %6459 = vmatpush1.bf16.msra.mxu1 %v8610_v45  ;;  %v8621_v43 = vld [vmem:[#allocation16 + $0xd4] ss:$8 sps:$4 sm:$0xff]  }
 0x7a7   : > { %6460 = vmatprep.subr.bf16.mxu1 %v8615_v3 }
 0x7aa   : > { %6461 = vmatpush1.bf16.msra.mxu1 %v8613_v9 }
 0x7ab   : > { %6462 = vmatprep.subr.bf16.mxu1 %v8618_v8  ;;  %v8656_v8 = vld [vmem:[#allocation19 + $0x8] ss:$12 sps:$4 sm:$0xff]  }
 0x7ae   : > { %6463 = vmatpush1.bf16.msra.mxu1 %v8616_v34 }
 0x7af   : > { %6464 = vmatprep.subr.bf16.mxu1 %v8621_v43  ;;  %v8660_v43 = vld [vmem:[#allocation19 + $0xe0] ss:$12 sps:$4 sm:$0xff]  }
 0x7b2   : > { %6465 = vmatpush1.bf16.msra.mxu1 %v8619_v30  ;;  %v8661_v30 = vld [vmem:[#allocation19 + $0x20] ss:$12 sps:$4 sm:$0xff]  }
 0x7c0   : > { %v7967_v20 = vpop.f32.mrb[200].mxu0 }
 0x7c1   : > { %v7989_v28 = vpop.f32.mrb[176].mxu1  ;;  %v7968_v7 = vpop.f32.mrb[201].mxu0 }
 0x7c2   : > { %v7969_v2 = vadd.f32 %v7968_v7, %v7967_v20  ;;  %v7990_v39 = vpop.f32.mrb[177].mxu1  ;;  %v7970_v4 = vpop.f32.mrb[202].mxu0 }
 0x7c3   : > { %v7991_v37 = vadd.f32 %v7990_v39, %v7989_v28  ;;  %v7992_v18 = vpop.f32.mrb[178].mxu1  ;;  %v7971_v35 = vpop.f32.mrb[203].mxu0 }
 0x7c4   : > { %v6041_v21 = vadd.f32 %v7969_v2, %v6001_v22  ;;  %v7993_v1 = vpop.f32.mrb[179].mxu1  ;;  %v8624_v18 = vld [vmem:[#allocation16 + $0xe4] ss:$8 sps:$4 sm:$0xff]   ;;  %v8627_v35 = vld [vmem:[#allocation16 + $0xf4] ss:$8 sps:$4 sm:$0xff]  }
 0x7c5   : > { %6466 = vmatprep.subr.bf16.mxu1 %v8624_v18  ;;  %v8628_v1 = vld [vmem:[#allocation19] ss:$12 sps:$4 sm:$0xff]  }
 0x7c6   : > { %v6081_v24 = vadd.f32 %v7991_v37, %v6041_v21  ;;  %v8622_v37 = vld [vmem:[#allocation16 + $0xe0] ss:$8 sps:$4 sm:$0xff]   ;;  %v8625_v21 = vld [vmem:[#allocation16 + $0xf0] ss:$8 sps:$4 sm:$0xff]  }
 0x7c7   : > { %6467 = vmatpush1.bf16.msra.mxu1 %v8622_v37  ;;  %v8686_v37 = vld [vmem:[#allocation19 + $0x98] ss:$12 sps:$4 sm:$0xff]  }
 0x7c8   : > { %v11731_v14 = vadd.f32 %v7675_v55, %v6081_v24  ;;  %v8630_v55 = vld [vmem:[#allocation19 + $0x4] ss:$12 sps:$4 sm:$0xff]   ;;  %6468 = vmatprep.subr.bf16.mxu1 %v8627_v35  ;;  %v8633_v24 = vld [vmem:[#allocation19 + $0x1c] ss:$12 sps:$4 sm:$0xff]   ;;  %v8689_v18 = vld [vmem:[#allocation19 + $0x16c] ss:$12 sps:$4 sm:$0xff]  }
 0x7c9   : > { %6820 = vmatprep.subr.bf16.mxu0 %v8630_v55  ;;  %v8690_v35 = vld [vmem:[#allocation19 + $0x170] ss:$12 sps:$4 sm:$0xff]  }
 0x7ca   : > { %v6096_v60 = vmul.f32 0.5, %v11731_v14  ;;  %v6266_v55 = vld [vmem:[#allocation18] sm:$0x3] }
 0x7cb   : > { %6469 = vmatpush1.bf16.msra.mxu1 %v8625_v21  ;;  %v8687_v21 = vld [vmem:[#allocation19 + $0x168] ss:$12 sps:$4 sm:$0xff]  }
 0x7cc   : > { %v6097_v33 = vmul.f32 1.442695, %v6096_v60  ;;  %v8631_v60 = vld [vmem:[#allocation19 + $0x18] ss:$12 sps:$4 sm:$0xff]  }
 0x7ce   : > { %8692 = vpow2.f32 %v6097_v33  ;;  %v8636_v33 = vld [vmem:[#allocation19 + $0x34] ss:$12 sps:$4 sm:$0xff]  }
 0x7d8   : > { %v8693_v10 = vpop.eup %8692 }
 0x7d9   : > { %v6106_v23 = vrot.slane %v8693_v10, %v11735_v63  ;;  %v8642_v10 = vld [vmem:[#allocation19 + $0x64] ss:$12 sps:$4 sm:$0xff]  }
 0x7db   : > { %v6114_v44 = vrot.slane %v6106_v23, %v11735_v63  ;;  %v6107_v6 = vcombine.high %v6106_v23, %v6106_v23  ;;  %v8640_v23 = vld [vmem:[#allocation19 + $0x60] ss:$12 sps:$4 sm:$0xff]  }
 0x7dd   : > { %6122 = vrot.lane.b32.xlu0 %v6114_v44, %s9118_s25  ;;  %v6121_v15 = vrot.slane %v6107_v6, %v11735_v63  ;;  %v8645_v44 = vld [vmem:[#allocation19 + $0x7c] ss:$12 sps:$4 sm:$0xff]   ;;  %v8643_v6 = vld [vmem:[#allocation19 + $0x78] ss:$12 sps:$4 sm:$0xff]  }
 0x7df   : > { %6124 = vrot.lane.b32.xlu1 %v6121_v15, %s9118_s25  ;;  %v8651_v15 = vld [vmem:[#allocation19 + $0xac] ss:$12 sps:$4 sm:$0xff]  }
 0x84f   : > { %v6123_v52 = vpop.permute.xlu0 %6122 }
 0x850   : > { %v6128_v22 = vmul.f32 %v6123_v52, %v6094_v62  ;;  %v8665_v62 = vld [vmem:[#allocation19 + $0xf8] ss:$12 sps:$4 sm:$0xff]  }
 0x851   : > { %v6125_v32 = vpop.permute.xlu1 %6124  ;;  %v8666_v52 = vld [vmem:[#allocation19 + $0x38] ss:$12 sps:$4 sm:$0xff]  }
 0x852   : > { %v6129_v20 = vmul.f32 %v6125_v32, %v6095_v41  ;;  %v8670_v41 = vld [vmem:[#allocation19 + $0x110] ss:$12 sps:$4 sm:$0xff]  }
 0x853   : > { %v8671_v32 = vld [vmem:[#allocation19 + $0x50] ss:$12 sps:$4 sm:$0xff]  }
 0x854   : > { %v6132_v28 = vcombine.low %v6128_v22, %v6129_v20  ;;  %v8675_v22 = vld [vmem:[#allocation19 + $0x128] ss:$12 sps:$4 sm:$0xff]  }
 0x855   : > { %v8676_v20 = vld [vmem:[#allocation19 + $0x68] ss:$12 sps:$4 sm:$0xff]  }
 0x856   : > { %v6139_v7 = vrot.slane %v6132_v28, %v11735_v63  ;;  %v8680_v28 = vld [vmem:[#allocation19 + $0x140] ss:$12 sps:$4 sm:$0xff]  }
 0x858   : > { %v6146_v2 = vrot.slane %v6139_v7, %v11735_v63  ;;  %v8681_v7 = vld [vmem:[#allocation19 + $0x80] ss:$12 sps:$4 sm:$0xff]  }
 0x85a   : > { %v6148_v39 = vadd.f32 %v6146_v2, %v11731_v14  ;;  %v8655_v14 = vld [vmem:[#allocation19 + $0xc8] ss:$12 sps:$4 sm:$0xff]   ;;  %v8682_v2 = vld [vmem:[#allocation19 + $0x150] ss:$12 sps:$4 sm:$0xff]  }
 0x85b   : > { %7995 = vmatprep.subr.bf16.mxu1 %v8655_v14 }
 0x85c   : > { %v6149_v4 = vpack.c.bf16 %v6148_v39, %v6148_v39  ;;  %v8684_v39 = vld [vmem:[#allocation19 + $0x154] ss:$12 sps:$4 sm:$0xff]  }
 0x85e   : > { %7680 = vmatmul.mubr.msk.bf16.vlgmr.msra.gmra.mrb[204].mxu0 %vm1146_vm3, %v6149_v4  ;;  %v8685_v4 = vld [vmem:[#allocation19 + $0x158] ss:$12 sps:$4 sm:$0xff]  }
 0x85f   : > { %6821 = vmatpush1.bf16.msra.mxu0 %v8628_v1  ;;  %v8691_v1 = vld [vmem:[#allocation19 + $0xb0] ss:$12 sps:$4 sm:$0xff]  }
 0x860   : > { %6822 = vmatprep.subr.bf16.mxu0 %v8633_v24  ;;  %v6271_v24 = vrot.slane %v6266_v55, %v12048_v12 }
 0x863   : > { %6823 = vmatpush1.bf16.msra.mxu0 %v8631_v60  ;;  %v6275_v60 = vrot.slane %v6266_v55, %v12049_v50 }
 0x864   : > { %6824 = vmatprep.subr.bf16.mxu0 %v8636_v33 }
 0x867   : > { %6825 = vmatpush1.bf16.msra.mxu0 %v8634_v0 }
 0x868   : > { %6826 = vmatprep.subr.bf16.mxu0 %v8639_v40 }
 0x86b   : > { %6827 = vmatpush1.bf16.msra.mxu0 %v8637_v31 }
 0x86c   : > { %6828 = vmatprep.subr.bf16.mxu0 %v8642_v10 }
 0x86f   : > { %6829 = vmatpush1.bf16.msra.mxu0 %v8640_v23 }
 0x870   : > { %6830 = vmatprep.subr.bf16.mxu0 %v8645_v44 }
 0x873   : > { %6831 = vmatpush1.bf16.msra.mxu0 %v8643_v6 }
 0x874   : > { %6832 = vmatprep.subr.bf16.mxu0 %v8648_v61 }
 0x877   : > { %6833 = vmatpush1.bf16.msra.mxu0 %v8646_v13  ;;  %v6547_v13 = vld [vmem:[#allocation21] sm:$0x7] }
 0x878   : > { %6834 = vmatprep.subr.bf16.mxu0 %v8651_v15  ;;  %v6552_v15 = vrot.slane %v6547_v13, %v12048_v12 }
 0x87b   : > { %6835 = vmatpush1.bf16.msra.mxu0 %v8649_v25  ;;  %v6556_v25 = vrot.slane %v6547_v13, %v12049_v50 }
 0x87c   : > { %6836 = vmatprep.subr.bf16.mxu0 %v8654_v57 }
 0x87f   : > { %6837 = vmatpush1.bf16.msra.mxu0 %v8652_v59 }
 0x880   : > { %6838 = vmatprep.subr.bf16.mxu0 %v8659_v36  ;;  %v12050_v36 = vsub.s32 2, %v12045_v5  ;;  %v12052_v5 = vlaneseq }
 0x882   : > { %vm6939_vm8 = vcmp.lt.s32.totalorder %v12052_v5, 384 }
 0x883   : > { %6839 = vmatpush1.bf16.msra.mxu0 %v8657_v19  ;;  %v6560_v19 = vrot.slane %v6547_v13, %v12050_v36 }
 0x884   : > { %6840 = vmatprep.subr.bf16.mxu0 %v8664_v53 }
 0x887   : > { %6841 = vmatpush1.bf16.msra.mxu0 %v8662_v29 }
 0x888   : > { %6842 = vmatprep.subr.bf16.mxu0 %v8669_v26 }
 0x88b   : > { %6843 = vmatpush1.bf16.msra.mxu0 %v8667_v48 }
 0x88c   : > { %6844 = vmatprep.subr.bf16.mxu0 %v8674_v49 }
 0x88f   : > { %6845 = vmatpush1.bf16.msra.mxu0 %v8672_v27 }
 0x890   : > { %6846 = vmatprep.subr.bf16.mxu0 %v8679_v38 }
 0x893   : > { %6847 = vmatpush1.bf16.msra.mxu0 %v8677_v51 }
 0x894   : > { %6848 = vmatprep.subr.bf16.mxu0 %v8684_v39 }
 0x897   : > { %6849 = vmatpush1.bf16.msra.mxu0 %v8682_v2 }
 0x898   : > { %6850 = vmatprep.subr.bf16.mxu0 %v8689_v18 }
 0x89b   : > { %6851 = vmatpush1.bf16.msra.mxu0 %v8687_v21 }
 0x931   : > { %v6223_v16 = vpop.f32.mrb[204].mxu0 }
 0x932   : > { %v6224_v54 = vadd.f32 %v6223_v16, %v6159_v11  ;;  %v6225_v58 = vpop.f32.mrb[205].mxu0 }
 0x933   : > { %v6226_v17 = vadd.f32 %v6225_v58, %v6163_v56  ;;  %v6227_v42 = vpop.f32.mrb[206].mxu0 }
 0x934   : > { %v6230_v46 = vmax.f32 %v6224_v54, 0.0  ;;  %v6228_v45 = vpop.f32.mrb[207].mxu0 }
 0x935   : > { %v6231_v3 = vmax.f32 %v6226_v17, 0.0 }
 0x936   : > { %v6232_v34 = vpack.c.bf16 %v6230_v46, %v6230_v46 }
 0x937   : > { %v6233_v9 = vpack.c.bf16 %v6231_v3, %v6231_v3 }
 0x939   : > { %6470 = vmatprep.mubr.bf16.mxu1 %v6233_v9 }
 0x93a   : > { %6471 = vmatmul.mubr.bf16.vlgmr.msra.gmra.mrb[180].mxu1 %v6232_v34 }
 0x93b   : > { %7996 = vmatpush3.bf16.msra.mxu1 %v8656_v8 }
 0x93c   : > { %7997 = vmatprep.subr.bf16.mxu1 %v8660_v43 }
 0x93f   : > { %7998 = vmatpush3.bf16.msra.mxu1 %v8661_v30 }
 0x940   : > { %7999 = vmatprep.subr.bf16.mxu1 %v8665_v62 }
 0x943   : > { %8000 = vmatpush3.bf16.msra.mxu1 %v8666_v52 }
 0x944   : > { %8001 = vmatprep.subr.bf16.mxu1 %v8670_v41 }
 0x947   : > { %8002 = vmatpush3.bf16.msra.mxu1 %v8671_v32 }
 0x948   : > { %8003 = vmatprep.subr.bf16.mxu1 %v8675_v22 }
 0x94b   : > { %8004 = vmatpush3.bf16.msra.mxu1 %v8676_v20 }
 0x94c   : > { %8005 = vmatprep.subr.bf16.mxu1 %v8680_v28 }
 0x94f   : > { %8006 = vmatpush3.bf16.msra.mxu1 %v8681_v7 }
 0x950   : > { %8007 = vmatprep.subr.bf16.mxu1 %v8685_v4 }
 0x953   : > { %8008 = vmatpush3.bf16.msra.mxu1 %v8686_v37 }
 0x954   : > { %8009 = vmatprep.subr.bf16.mxu1 %v8690_v35 }
 0x957   : > { %8010 = vmatpush3.bf16.msra.mxu1 %v8691_v1 }
 0xa0d   : > { %v6472_v33 = vpop.f32.mrb[180].mxu1 }
 0xa0e   : > { %v6473_v14 = vadd.f32 %v6472_v33, %v6271_v24  ;;  %v6474_v0 = vpop.f32.mrb[181].mxu1 }
 0xa0f   : > { %v6475_v40 = vadd.f32 %v6474_v0, %v6275_v60  ;;  %v6476_v31 = vpop.f32.mrb[182].mxu1 }
 0xa10   : > { %v6479_v10 = vmax.f32 %v6473_v14, 0.0  ;;  %v6477_v23 = vpop.f32.mrb[183].mxu1 }
 0xa11   : > { %v6480_v44 = vmax.f32 %v6475_v40, 0.0 }
 0xa12   : > { %v6481_v61 = vpack.c.bf16 %v6479_v10, %v6479_v10 }
 0xa13   : > { %v6482_v6 = vpack.c.bf16 %v6480_v44, %v6480_v44 }
 0xa15   : > { %6852 = vmatprep.mubr.bf16.mxu0 %v6482_v6  ;;  %6893 = vmatprep.mubr.bf16.mxu1 %v6482_v6 }
 0xa16   : > { %6853 = vmatmul.mubr.bf16.vlgmr.msra.gmra.mrb[208].mxu0 %v6481_v61  ;;  %6894 = vmatmul.mubr.bf16.vlgmr.msra.gmra.mrb[184].mxu1 %v6481_v61 }
 0xae9   : > { %v6854_v57 = vpop.f32.mrb[208].mxu0  ;;  %v8011_v59 = vpop.f32.mrb[184].mxu1 }
 0xaea   : > { %v6855_v53 = vadd.f32 %v6854_v57, %v6552_v15  ;;  %v6856_v29 = vpop.f32.mrb[209].mxu0  ;;  %v8012_v26 = vpop.f32.mrb[185].mxu1 }
 0xaeb   : > { %v6857_v48 = vadd.f32 %v6856_v29, %v6556_v25  ;;  %v8013_v49 = vadd.f32 %v8012_v26, %v8011_v59  ;;  %v6858_v27 = vpop.f32.mrb[210].mxu0  ;;  %v8014_v38 = vpop.f32.mrb[186].mxu1 }
 0xaec   : > { %v6859_v51 = vpop.f32.mrb[211].mxu0  ;;  %v8015_v47 = vpop.f32.mrb[187].mxu1 }
 0xaed   : > { %v6904_v11 = vcombine.low %v6855_v53, %v6857_v48  ;;  %v6896_v56 = vadd.f32 %v8013_v49, %v6560_v19 }
 0xaef   : > { %v6911_v12 = vrot.slane %v6904_v11, %v11735_v63  ;;  %v6918_v50 = vrot.slane %v6896_v56, %v11735_v63 }
 0xaf1   : > { %v6919_v16 = vcombine.low %v6911_v12, %v6918_v50  ;;  %v6920_v54 = vcombine.high %v6911_v12, %v6918_v50 }
 0xaf3   : > { %v6927_v58 = vrot.slane %v6919_v16, %v11735_v63  ;;  %v6934_v17 = vrot.slane %v6920_v54, %v11735_v63 }
 0xaf5   : > { %6941 = vst.msk [vmem:[%s799_s10] sm:$0x7] %vm6939_vm8, %v6927_v58  ;;  %6942 = vst.msk [vmem:[%s799_s10 + $0x3] sm:$0x7] %vm6939_vm8, %v6934_v17 }
 0xaf6 PF: > { %s36_s0 = sadd.s32 1, %s9093_s0  }
 0xaf7   : > { %p33_p7 = scmp.ge.s32.totalorder %s36_s0, 4  }
 0xaf9   :  { %35 = sbr.rel (!%p33_p7) target bundleno = 20 (0x14), region = 182 }
 0xb00   :  { %6965 = vsyncpa [#allocation3], 1 }
 0xb01   :  { %6967 = vsyncpa [#allocation3 + $0x1], 1 }
 0xb02   :  { %6968 = vsyncpa [#allocation5], 1 }
 0xb03   :  { %6969 = vsyncpa [#allocation8], 1 }
 0xb04   :  { %6970 = vsyncpa [#allocation11], 1 }
 0xb05   :  { %6971 = vsyncpa [#allocation14], 1 }
 0xb06   :  { %6972 = vsyncpa [#allocation17], 1 }
 0xb07   :  { %6973 = vsyncpa [#allocation20], 1 }

</bundles_post_ra>
